<compile_context>
chip_gen: v5e
topology: v5e:2x2
jax: 0.10.0
libtpu: 0.0.40
codegen_flags: <defaults>
</compile_context>

<pallas_src>
import functools

import jax
import jax.numpy as jnp
from jax.experimental import pallas as pl
from jax.experimental.pallas import tpu as pltpu


def _fused_net_kernel(x_ref, mask_ref,
                      w1_ref, b1_ref, w2_ref, b2_ref, w3_ref, b3_ref,
                      o_ref, buf,
                      *, np_pad, wp, margin, cin):
    """Fused JNet+TNet forward over the whole (tiny) batch.

    x_ref    : (cin, np_pad)            zero-padded input frames, flat spatial
    mask_ref : (1,   np_pad)            1.0 at interior pixels, 0.0 elsewhere
    w*_ref   : (3, 3, cout, cin_layer)  fused conv weights (block-diagonal)
    b*_ref   : (cout, 1)                fused biases
    o_ref    : (4, np_pad)              [JNet RGB | TNet mask] padded frames
    buf      : (16, L) f32 VMEM scratch, L >= np_pad + 2*margin
    """
    # Zero-init the scratch once: margins and pad pixels must read as exact
    # zeros (this is the in-kernel "same" padding).
    buf[...] = jnp.zeros_like(buf)

    mask = mask_ref[...]                                     # (1, np_pad)
    buf[0:cin, margin:margin + np_pad] = x_ref[...]

    def conv3x3(n_in, w_ref, b_ref):
        cout = w_ref.shape[2]
        acc = jnp.zeros((cout, np_pad), jnp.float32)
        for dy in range(3):
            for dx in range(3):
                start = margin + (dy - 1) * wp + (dx - 1)    # static offsets
                taps = buf[0:n_in, start:start + np_pad]     # (n_in, NP)
                acc = acc + jnp.dot(w_ref[dy, dx], taps,
                                    preferred_element_type=jnp.float32)
        return acc + b_ref[...]

    c1 = w1_ref.shape[2]
    c2 = w2_ref.shape[2]

    # Layer 1 (fused JNet+TNet, 3 -> 16), ReLU, re-zero pad pixels.
    a1 = jnp.maximum(conv3x3(cin, w1_ref, b1_ref), 0.0) * mask
    buf[0:c1, margin:margin + np_pad] = a1

    # Layer 2 (block-diagonal 16 -> 16), ReLU, re-zero pad pixels.
    a2 = jnp.maximum(conv3x3(c1, w2_ref, b2_ref), 0.0) * mask
    buf[0:c2, margin:margin + np_pad] = a2

    # Layer 3 (block 16 -> 4), Sigmoid.  Pad / tail pixels hold garbage but
    # are never read again (wrapper extracts interiors only).
    a3 = conv3x3(c2, w3_ref, b3_ref)
    o_ref[...] = jax.nn.sigmoid(a3).astype(o_ref.dtype)


def _init_conv(key, cin, cout):
    """Deterministic PyTorch-style (Kaiming-uniform-ish) conv init."""
    kw, kb = jax.random.split(key)
    fan_in = cin * 3 * 3
    bound = 1.0 / (fan_in ** 0.5)
    w = jax.random.uniform(kw, (3, 3, cin, cout), jnp.float32, -bound, bound)
    b = jax.random.uniform(kb, (1, cout), jnp.float32, -bound, bound)
    return w, b


def init_net_params(key, hidden=8):
    kj, kt = jax.random.split(key)
    kj = jax.random.split(kj, 3)
    kt = jax.random.split(kt, 3)
    return {
        "jnet": [_init_conv(kj[0], 3, hidden),
                 _init_conv(kj[1], hidden, hidden),
                 _init_conv(kj[2], hidden, 3)],
        "tnet": [_init_conv(kt[0], 3, hidden),
                 _init_conv(kt[1], hidden, hidden),
                 _init_conv(kt[2], hidden, 1)],
    }


def _fuse_params(params):
    """Fuse JNet/TNet into a single 3 -> 16 -> 16 -> 4 conv stack.

    Per-net layers are (w:(3,3,cin,cout), b:(1,cout)).  Layers 2/3 are made
    block-diagonal so the two nets never mix channels.  Returns kernel-layout
    weights (3,3,cout,cin) and biases (cout,1).
    """
    (wj1, bj1), (wj2, bj2), (wj3, bj3) = params["jnet"]
    (wt1, bt1), (wt2, bt2), (wt3, bt3) = params["tnet"]
    h = wj1.shape[-1]                          # hidden width (8)
    cj, ct = wj3.shape[-1], wt3.shape[-1]      # 3, 1

    w1 = jnp.concatenate([wj1, wt1], axis=-1)                     # (3,3,3,2h)
    b1 = jnp.concatenate([bj1, bt1], axis=-1)                     # (1,2h)

    w2 = jnp.zeros((3, 3, 2 * h, 2 * h), jnp.float32)
    w2 = w2.at[:, :, :h, :h].set(wj2).at[:, :, h:, h:].set(wt2)   # block-diag
    b2 = jnp.concatenate([bj2, bt2], axis=-1)

    w3 = jnp.zeros((3, 3, 2 * h, cj + ct), jnp.float32)
    w3 = w3.at[:, :, :h, :cj].set(wj3).at[:, :, h:, cj:].set(wt3)
    b3 = jnp.concatenate([bj3, bt3], axis=-1)

    to_w = lambda w: jnp.transpose(w, (0, 1, 3, 2))   # -> (3,3,cout,cin)
    to_b = lambda b: jnp.transpose(b, (1, 0))         # -> (cout,1)
    return (to_w(w1), to_b(b1), to_w(w2), to_b(b2), to_w(w3), to_b(b3))


def net_forward(params, data_nchw):
    """Equivalent of net.forward(data): returns (x_j, x_t) in NCHW."""
    n, cin, hh, ww = data_nchw.shape
    hp, wp = hh + 2, ww + 2
    p = hp * wp
    np_flat = n * p
    np_pad = ((np_flat + 127) // 128) * 128           # lane-dense flat width
    margin = wp + 1                                   # largest |tap shift|
    buf_len = ((np_pad + 2 * margin + 127) // 128) * 128

    w1, b1, w2, b2, w3, b3 = _fuse_params(params)
    c_mid = w2.shape[2]                               # 16
    c_out = w3.shape[2]                               # 4 = 3 (JNet) + 1 (TNet)
    n_rows = max(cin, c_mid)                          # scratch sublane count

    # One-time input layout: NCHW -> zero-padded, channel-major, flat-spatial
    # (lane-dense, padded to a multiple of 128).  Done once per forward.
    x = jnp.transpose(data_nchw, (1, 0, 2, 3)).astype(jnp.float32)
    x = jnp.pad(x, ((0, 0), (0, 0), (1, 1), (1, 1)))
    x = x.reshape(cin, np_flat)
    x = jnp.pad(x, ((0, 0), (0, np_pad - np_flat)))

    # Interior mask over the padded flat frame (1 inside, 0 on the pad ring
    # and on the lane-padding tail).
    m = jnp.zeros((hp, wp), jnp.float32).at[1:1 + hh, 1:1 + ww].set(1.0)
    mask = jnp.tile(m.reshape(1, p), (1, n))
    mask = jnp.pad(mask, ((0, 0), (0, np_pad - np_flat)))

    kern = functools.partial(_fused_net_kernel, np_pad=np_pad, wp=wp,
                             margin=margin, cin=cin)
    vmem = pl.BlockSpec(memory_space=pltpu.MemorySpace.VMEM)
    out = pl.pallas_call(
        kern,
        out_shape=jax.ShapeDtypeStruct((c_out, np_pad), jnp.float32),
        in_specs=[vmem] * 8,
        out_specs=vmem,
        scratch_shapes=[pltpu.VMEM((n_rows, buf_len), jnp.float32)],
    )(x, mask, w1, b1, w2, b2, w3, b3)

    # Un-layout once: padded flat frames -> NCHW interiors.
    out = out[:, :np_flat].reshape(c_out, n, hp, wp)[:, :, 1:1 + hh, 1:1 + ww]
    out = jnp.transpose(out, (1, 0, 2, 3))            # (N, 4, H, W)
    return out[:, :3], out[:, 3:]                     # x_j, x_t


# ------------------------- pure-JAX reference ------------------------------
def _ref_conv(x_nhwc, w, b, act):
    y = jax.lax.conv_general_dilated(
        x_nhwc, w, window_strides=(1, 1), padding="SAME",
        dimension_numbers=("NHWC", "HWIO", "NHWC"),
        precision=jax.lax.Precision.HIGHEST)
    y = y + b.reshape(1, 1, 1, -1)
    return jnp.maximum(y, 0.0) if act == "relu" else jax.nn.sigmoid(y)


def _ref_forward(params, data_nchw):
    x = jnp.transpose(data_nchw, (0, 2, 3, 1))

    def stack(ps):
        y = _ref_conv(x, ps[0][0], ps[0][1], "relu")
        y = _ref_conv(y, ps[1][0], ps[1][1], "relu")
        return _ref_conv(y, ps[2][0], ps[2][1], "sigmoid")

    x_j = jnp.transpose(stack(params["jnet"]), (0, 3, 1, 2))
    x_t = jnp.transpose(stack(params["tnet"]), (0, 3, 1, 2))
    return x_j, x_t


if __name__ == "__main__":
    key = jax.random.PRNGKey(0)
    k_param, k_data = jax.random.split(key)

    params = init_net_params(k_param, hidden=8)
    data = jax.random.uniform(k_data, (2, 3, 16, 16), jnp.float32)  # NCHW

    x_j, x_t = jax.jit(net_forward)(params, data)
    jax.block_until_ready((x_j, x_t))

    assert x_j.shape == (2, 3, 16, 16)
    assert x_t.shape == (2, 1, 16, 16)

    r_j, r_t = _ref_forward(params, data)
    err = max(float(jnp.max(jnp.abs(x_j - r_j))),
              float(jnp.max(jnp.abs(x_t - r_t))))
    assert err < 5e-3, f"mismatch vs pure-JAX reference: {err}"
    print("KERNEL_OK")
</pallas_src>

<mosaic_0001>
module attributes {stable_mosaic.version = 11 : i64} {
  func.func @_fused_net_kernel(%arg0: memref<3x768xf32, #tpu.memory_space<vmem>>, %arg1: memref<1x768xf32, #tpu.memory_space<vmem>>, %arg2: memref<3x3x16x3xf32, #tpu.memory_space<vmem>>, %arg3: memref<16x1xf32, #tpu.memory_space<vmem>>, %arg4: memref<3x3x16x16xf32, #tpu.memory_space<vmem>>, %arg5: memref<16x1xf32, #tpu.memory_space<vmem>>, %arg6: memref<3x3x4x16xf32, #tpu.memory_space<vmem>>, %arg7: memref<4x1xf32, #tpu.memory_space<vmem>>, %arg8: memref<4x768xf32, #tpu.memory_space<vmem>>, %arg9: memref<16x896xf32, #tpu.memory_space<vmem>>) attributes {dimension_semantics = [], scalar_prefetch = 0 : i64, scratch_operands = 1 : i64, tpu.core_type = #tpu.core_type<tc>} {
    %cst = arith.constant 0.000000e+00 : f32
    %0 = vector.broadcast %cst : f32 to vector<16x896xf32>
    %c0 = arith.constant 0 : index
    %c0_0 = arith.constant 0 : index
    %1 = vector.load %arg9[%c0, %c0_0] : memref<16x896xf32, #tpu.memory_space<vmem>>, vector<16x896xf32>
    tpu.vector_store %arg9[%c0, %c0_0], %0 {strides = array<i32>} : memref<16x896xf32, #tpu.memory_space<vmem>>, vector<16x896xf32>,
    %c0_1 = arith.constant 0 : index
    %c0_2 = arith.constant 0 : index
    %2 = vector.load %arg1[%c0_1, %c0_2] : memref<1x768xf32, #tpu.memory_space<vmem>>, vector<1x768xf32>
    %c0_3 = arith.constant 0 : index
    %c0_4 = arith.constant 0 : index
    %3 = vector.load %arg0[%c0_3, %c0_4] : memref<3x768xf32, #tpu.memory_space<vmem>>, vector<3x768xf32>
    %c0_5 = arith.constant 0 : index
    %c19 = arith.constant 19 : index
    %4 = vector.load %arg9[%c0_5, %c19] : memref<16x896xf32, #tpu.memory_space<vmem>>, vector<3x768xf32>
    tpu.vector_store %arg9[%c0_5, %c19], %3 {strides = array<i32>} : memref<16x896xf32, #tpu.memory_space<vmem>>, vector<3x768xf32>,
    %cst_6 = arith.constant 0.000000e+00 : f32
    %5 = vector.broadcast %cst_6 : f32 to vector<16x768xf32>
    %c0_7 = arith.constant 0 : index
    %c0_8 = arith.constant 0 : index
    %6 = vector.load %arg9[%c0_7, %c0_8] : memref<16x896xf32, #tpu.memory_space<vmem>>, vector<3x768xf32>
    %c0_9 = arith.constant 0 : index
    %c0_10 = arith.constant 0 : index
    %c0_11 = arith.constant 0 : index
    %c0_12 = arith.constant 0 : index
    %7 = vector.load %arg2[%c0_9, %c0_10, %c0_11, %c0_12] : memref<3x3x16x3xf32, #tpu.memory_space<vmem>>, vector<1x1x16x3xf32>
    %8 = vector.shape_cast %7 : vector<1x1x16x3xf32> to vector<16x3xf32>
    %cst_13 = arith.constant dense<0.000000e+00> : vector<16x768xf32>
    %9 = tpu.matmul %8, %6, %cst_13 {dimension_numbers = #tpu.dot_dimension_numbers<[1], [0], [0], [1], [0, 0, 1, 1], [], []>} : vector<16x3xf32>, vector<3x768xf32>, vector<16x768xf32> -> vector<16x768xf32>
    %10 = arith.addf %5, %9 : vector<16x768xf32>
    %c0_14 = arith.constant 0 : index
    %c1 = arith.constant 1 : index
    %11 = vector.load %arg9[%c0_14, %c1] : memref<16x896xf32, #tpu.memory_space<vmem>>, vector<3x768xf32>
    %c0_15 = arith.constant 0 : index
    %c1_16 = arith.constant 1 : index
    %c0_17 = arith.constant 0 : index
    %c0_18 = arith.constant 0 : index
    %12 = vector.load %arg2[%c0_15, %c1_16, %c0_17, %c0_18] : memref<3x3x16x3xf32, #tpu.memory_space<vmem>>, vector<1x1x16x3xf32>
    %13 = vector.shape_cast %12 : vector<1x1x16x3xf32> to vector<16x3xf32>
    %cst_19 = arith.constant dense<0.000000e+00> : vector<16x768xf32>
    %14 = tpu.matmul %13, %11, %cst_19 {dimension_numbers = #tpu.dot_dimension_numbers<[1], [0], [0], [1], [0, 0, 1, 1], [], []>} : vector<16x3xf32>, vector<3x768xf32>, vector<16x768xf32> -> vector<16x768xf32>
    %15 = arith.addf %10, %14 : vector<16x768xf32>
    %c0_20 = arith.constant 0 : index
    %c2 = arith.constant 2 : index
    %16 = vector.load %arg9[%c0_20, %c2] : memref<16x896xf32, #tpu.memory_space<vmem>>, vector<3x768xf32>
    %c0_21 = arith.constant 0 : index
    %c2_22 = arith.constant 2 : index
    %c0_23 = arith.constant 0 : index
    %c0_24 = arith.constant 0 : index
    %17 = vector.load %arg2[%c0_21, %c2_22, %c0_23, %c0_24] : memref<3x3x16x3xf32, #tpu.memory_space<vmem>>, vector<1x1x16x3xf32>
    %18 = vector.shape_cast %17 : vector<1x1x16x3xf32> to vector<16x3xf32>
    %cst_25 = arith.constant dense<0.000000e+00> : vector<16x768xf32>
    %19 = tpu.matmul %18, %16, %cst_25 {dimension_numbers = #tpu.dot_dimension_numbers<[1], [0], [0], [1], [0, 0, 1, 1], [], []>} : vector<16x3xf32>, vector<3x768xf32>, vector<16x768xf32> -> vector<16x768xf32>
    %20 = arith.addf %15, %19 : vector<16x768xf32>
    %c0_26 = arith.constant 0 : index
    %c18 = arith.constant 18 : index
    %21 = vector.load %arg9[%c0_26, %c18] : memref<16x896xf32, #tpu.memory_space<vmem>>, vector<3x768xf32>
    %c1_27 = arith.constant 1 : index
    %c0_28 = arith.constant 0 : index
    %c0_29 = arith.constant 0 : index
    %c0_30 = arith.constant 0 : index
    %22 = vector.load %arg2[%c1_27, %c0_28, %c0_29, %c0_30] : memref<3x3x16x3xf32, #tpu.memory_space<vmem>>, vector<1x1x16x3xf32>
    %23 = vector.shape_cast %22 : vector<1x1x16x3xf32> to vector<16x3xf32>
    %cst_31 = arith.constant dense<0.000000e+00> : vector<16x768xf32>
    %24 = tpu.matmul %23, %21, %cst_31 {dimension_numbers = #tpu.dot_dimension_numbers<[1], [0], [0], [1], [0, 0, 1, 1], [], []>} : vector<16x3xf32>, vector<3x768xf32>, vector<16x768xf32> -> vector<16x768xf32>
    %25 = arith.addf %20, %24 : vector<16x768xf32>
    %c0_32 = arith.constant 0 : index
    %c19_33 = arith.constant 19 : index
    %26 = vector.load %arg9[%c0_32, %c19_33] : memref<16x896xf32, #tpu.memory_space<vmem>>, vector<3x768xf32>
    %c1_34 = arith.constant 1 : index
    %c1_35 = arith.constant 1 : index
    %c0_36 = arith.constant 0 : index
    %c0_37 = arith.constant 0 : index
    %27 = vector.load %arg2[%c1_34, %c1_35, %c0_36, %c0_37] : memref<3x3x16x3xf32, #tpu.memory_space<vmem>>, vector<1x1x16x3xf32>
    %28 = vector.shape_cast %27 : vector<1x1x16x3xf32> to vector<16x3xf32>
    %cst_38 = arith.constant dense<0.000000e+00> : vector<16x768xf32>
    %29 = tpu.matmul %28, %26, %cst_38 {dimension_numbers = #tpu.dot_dimension_numbers<[1], [0], [0], [1], [0, 0, 1, 1], [], []>} : vector<16x3xf32>, vector<3x768xf32>, vector<16x768xf32> -> vector<16x768xf32>
    %30 = arith.addf %25, %29 : vector<16x768xf32>
    %c0_39 = arith.constant 0 : index
    %c20 = arith.constant 20 : index
    %31 = vector.load %arg9[%c0_39, %c20] : memref<16x896xf32, #tpu.memory_space<vmem>>, vector<3x768xf32>
    %c1_40 = arith.constant 1 : index
    %c2_41 = arith.constant 2 : index
    %c0_42 = arith.constant 0 : index
    %c0_43 = arith.constant 0 : index
    %32 = vector.load %arg2[%c1_40, %c2_41, %c0_42, %c0_43] : memref<3x3x16x3xf32, #tpu.memory_space<vmem>>, vector<1x1x16x3xf32>
    %33 = vector.shape_cast %32 : vector<1x1x16x3xf32> to vector<16x3xf32>
    %cst_44 = arith.constant dense<0.000000e+00> : vector<16x768xf32>
    %34 = tpu.matmul %33, %31, %cst_44 {dimension_numbers = #tpu.dot_dimension_numbers<[1], [0], [0], [1], [0, 0, 1, 1], [], []>} : vector<16x3xf32>, vector<3x768xf32>, vector<16x768xf32> -> vector<16x768xf32>
    %35 = arith.addf %30, %34 : vector<16x768xf32>
    %c0_45 = arith.constant 0 : index
    %c36 = arith.constant 36 : index
    %36 = vector.load %arg9[%c0_45, %c36] : memref<16x896xf32, #tpu.memory_space<vmem>>, vector<3x768xf32>
    %c2_46 = arith.constant 2 : index
    %c0_47 = arith.constant 0 : index
    %c0_48 = arith.constant 0 : index
    %c0_49 = arith.constant 0 : index
    %37 = vector.load %arg2[%c2_46, %c0_47, %c0_48, %c0_49] : memref<3x3x16x3xf32, #tpu.memory_space<vmem>>, vector<1x1x16x3xf32>
    %38 = vector.shape_cast %37 : vector<1x1x16x3xf32> to vector<16x3xf32>
    %cst_50 = arith.constant dense<0.000000e+00> : vector<16x768xf32>
    %39 = tpu.matmul %38, %36, %cst_50 {dimension_numbers = #tpu.dot_dimension_numbers<[1], [0], [0], [1], [0, 0, 1, 1], [], []>} : vector<16x3xf32>, vector<3x768xf32>, vector<16x768xf32> -> vector<16x768xf32>
    %40 = arith.addf %35, %39 : vector<16x768xf32>
    %c0_51 = arith.constant 0 : index
    %c37 = arith.constant 37 : index
    %41 = vector.load %arg9[%c0_51, %c37] : memref<16x896xf32, #tpu.memory_space<vmem>>, vector<3x768xf32>
    %c2_52 = arith.constant 2 : index
    %c1_53 = arith.constant 1 : index
    %c0_54 = arith.constant 0 : index
    %c0_55 = arith.constant 0 : index
    %42 = vector.load %arg2[%c2_52, %c1_53, %c0_54, %c0_55] : memref<3x3x16x3xf32, #tpu.memory_space<vmem>>, vector<1x1x16x3xf32>
    %43 = vector.shape_cast %42 : vector<1x1x16x3xf32> to vector<16x3xf32>
    %cst_56 = arith.constant dense<0.000000e+00> : vector<16x768xf32>
    %44 = tpu.matmul %43, %41, %cst_56 {dimension_numbers = #tpu.dot_dimension_numbers<[1], [0], [0], [1], [0, 0, 1, 1], [], []>} : vector<16x3xf32>, vector<3x768xf32>, vector<16x768xf32> -> vector<16x768xf32>
    %45 = arith.addf %40, %44 : vector<16x768xf32>
    %c0_57 = arith.constant 0 : index
    %c38 = arith.constant 38 : index
    %46 = vector.load %arg9[%c0_57, %c38] : memref<16x896xf32, #tpu.memory_space<vmem>>, vector<3x768xf32>
    %c2_58 = arith.constant 2 : index
    %c2_59 = arith.constant 2 : index
    %c0_60 = arith.constant 0 : index
    %c0_61 = arith.constant 0 : index
    %47 = vector.load %arg2[%c2_58, %c2_59, %c0_60, %c0_61] : memref<3x3x16x3xf32, #tpu.memory_space<vmem>>, vector<1x1x16x3xf32>
    %48 = vector.shape_cast %47 : vector<1x1x16x3xf32> to vector<16x3xf32>
    %cst_62 = arith.constant dense<0.000000e+00> : vector<16x768xf32>
    %49 = tpu.matmul %48, %46, %cst_62 {dimension_numbers = #tpu.dot_dimension_numbers<[1], [0], [0], [1], [0, 0, 1, 1], [], []>} : vector<16x3xf32>, vector<3x768xf32>, vector<16x768xf32> -> vector<16x768xf32>
    %50 = arith.addf %45, %49 : vector<16x768xf32>
    %c0_63 = arith.constant 0 : index
    %c0_64 = arith.constant 0 : index
    %51 = vector.load %arg3[%c0_63, %c0_64] : memref<16x1xf32, #tpu.memory_space<vmem>>, vector<16x1xf32>
    %52 = vector.broadcast %51 : vector<16x1xf32> to vector<16x768xf32>
    %53 = arith.addf %50, %52 : vector<16x768xf32>
    %cst_65 = arith.constant 0.000000e+00 : f32
    %54 = vector.broadcast %cst_65 : f32 to vector<16x768xf32>
    %55 = arith.maximumf %53, %54 : vector<16x768xf32>
    %56 = vector.broadcast %2 : vector<1x768xf32> to vector<16x768xf32>
    %57 = arith.mulf %55, %56 : vector<16x768xf32>
    %c0_66 = arith.constant 0 : index
    %c19_67 = arith.constant 19 : index
    %58 = vector.load %arg9[%c0_66, %c19_67] : memref<16x896xf32, #tpu.memory_space<vmem>>, vector<16x768xf32>
    tpu.vector_store %arg9[%c0_66, %c19_67], %57 {strides = array<i32>} : memref<16x896xf32, #tpu.memory_space<vmem>>, vector<16x768xf32>,
    %cst_68 = arith.constant 0.000000e+00 : f32
    %59 = vector.broadcast %cst_68 : f32 to vector<16x768xf32>
    %c0_69 = arith.constant 0 : index
    %c0_70 = arith.constant 0 : index
    %60 = vector.load %arg9[%c0_69, %c0_70] : memref<16x896xf32, #tpu.memory_space<vmem>>, vector<16x768xf32>
    %c0_71 = arith.constant 0 : index
    %c0_72 = arith.constant 0 : index
    %c0_73 = arith.constant 0 : index
    %c0_74 = arith.constant 0 : index
    %61 = vector.load %arg4[%c0_71, %c0_72, %c0_73, %c0_74] : memref<3x3x16x16xf32, #tpu.memory_space<vmem>>, vector<1x1x16x16xf32>
    %62 = vector.shape_cast %61 : vector<1x1x16x16xf32> to vector<16x16xf32>
    %cst_75 = arith.constant dense<0.000000e+00> : vector<16x768xf32>
    %63 = tpu.matmul %62, %60, %cst_75 {dimension_numbers = #tpu.dot_dimension_numbers<[1], [0], [0], [1], [0, 0, 1, 1], [], []>} : vector<16x16xf32>, vector<16x768xf32>, vector<16x768xf32> -> vector<16x768xf32>
    %64 = arith.addf %59, %63 : vector<16x768xf32>
    %c0_76 = arith.constant 0 : index
    %c1_77 = arith.constant 1 : index
    %65 = vector.load %arg9[%c0_76, %c1_77] : memref<16x896xf32, #tpu.memory_space<vmem>>, vector<16x768xf32>
    %c0_78 = arith.constant 0 : index
    %c1_79 = arith.constant 1 : index
    %c0_80 = arith.constant 0 : index
    %c0_81 = arith.constant 0 : index
    %66 = vector.load %arg4[%c0_78, %c1_79, %c0_80, %c0_81] : memref<3x3x16x16xf32, #tpu.memory_space<vmem>>, vector<1x1x16x16xf32>
    %67 = vector.shape_cast %66 : vector<1x1x16x16xf32> to vector<16x16xf32>
    %cst_82 = arith.constant dense<0.000000e+00> : vector<16x768xf32>
    %68 = tpu.matmul %67, %65, %cst_82 {dimension_numbers = #tpu.dot_dimension_numbers<[1], [0], [0], [1], [0, 0, 1, 1], [], []>} : vector<16x16xf32>, vector<16x768xf32>, vector<16x768xf32> -> vector<16x768xf32>
    %69 = arith.addf %64, %68 : vector<16x768xf32>
    %c0_83 = arith.constant 0 : index
    %c2_84 = arith.constant 2 : index
    %70 = vector.load %arg9[%c0_83, %c2_84] : memref<16x896xf32, #tpu.memory_space<vmem>>, vector<16x768xf32>
    %c0_85 = arith.constant 0 : index
    %c2_86 = arith.constant 2 : index
    %c0_87 = arith.constant 0 : index
    %c0_88 = arith.constant 0 : index
    %71 = vector.load %arg4[%c0_85, %c2_86, %c0_87, %c0_88] : memref<3x3x16x16xf32, #tpu.memory_space<vmem>>, vector<1x1x16x16xf32>
    %72 = vector.shape_cast %71 : vector<1x1x16x16xf32> to vector<16x16xf32>
    %cst_89 = arith.constant dense<0.000000e+00> : vector<16x768xf32>
    %73 = tpu.matmul %72, %70, %cst_89 {dimension_numbers = #tpu.dot_dimension_numbers<[1], [0], [0], [1], [0, 0, 1, 1], [], []>} : vector<16x16xf32>, vector<16x768xf32>, vector<16x768xf32> -> vector<16x768xf32>
    %74 = arith.addf %69, %73 : vector<16x768xf32>
    %c0_90 = arith.constant 0 : index
    %c18_91 = arith.constant 18 : index
    %75 = vector.load %arg9[%c0_90, %c18_91] : memref<16x896xf32, #tpu.memory_space<vmem>>, vector<16x768xf32>
    %c1_92 = arith.constant 1 : index
    %c0_93 = arith.constant 0 : index
    %c0_94 = arith.constant 0 : index
    %c0_95 = arith.constant 0 : index
    %76 = vector.load %arg4[%c1_92, %c0_93, %c0_94, %c0_95] : memref<3x3x16x16xf32, #tpu.memory_space<vmem>>, vector<1x1x16x16xf32>
    %77 = vector.shape_cast %76 : vector<1x1x16x16xf32> to vector<16x16xf32>
    %cst_96 = arith.constant dense<0.000000e+00> : vector<16x768xf32>
    %78 = tpu.matmul %77, %75, %cst_96 {dimension_numbers = #tpu.dot_dimension_numbers<[1], [0], [0], [1], [0, 0, 1, 1], [], []>} : vector<16x16xf32>, vector<16x768xf32>, vector<16x768xf32> -> vector<16x768xf32>
    %79 = arith.addf %74, %78 : vector<16x768xf32>
    %c0_97 = arith.constant 0 : index
    %c19_98 = arith.constant 19 : index
    %80 = vector.load %arg9[%c0_97, %c19_98] : memref<16x896xf32, #tpu.memory_space<vmem>>, vector<16x768xf32>
    %c1_99 = arith.constant 1 : index
    %c1_100 = arith.constant 1 : index
    %c0_101 = arith.constant 0 : index
    %c0_102 = arith.constant 0 : index
    %81 = vector.load %arg4[%c1_99, %c1_100, %c0_101, %c0_102] : memref<3x3x16x16xf32, #tpu.memory_space<vmem>>, vector<1x1x16x16xf32>
    %82 = vector.shape_cast %81 : vector<1x1x16x16xf32> to vector<16x16xf32>
    %cst_103 = arith.constant dense<0.000000e+00> : vector<16x768xf32>
    %83 = tpu.matmul %82, %80, %cst_103 {dimension_numbers = #tpu.dot_dimension_numbers<[1], [0], [0], [1], [0, 0, 1, 1], [], []>} : vector<16x16xf32>, vector<16x768xf32>, vector<16x768xf32> -> vector<16x768xf32>
    %84 = arith.addf %79, %83 : vector<16x768xf32>
    %c0_104 = arith.constant 0 : index
    %c20_105 = arith.constant 20 : index
    %85 = vector.load %arg9[%c0_104, %c20_105] : memref<16x896xf32, #tpu.memory_space<vmem>>, vector<16x768xf32>
    %c1_106 = arith.constant 1 : index
    %c2_107 = arith.constant 2 : index
    %c0_108 = arith.constant 0 : index
    %c0_109 = arith.constant 0 : index
    %86 = vector.load %arg4[%c1_106, %c2_107, %c0_108, %c0_109] : memref<3x3x16x16xf32, #tpu.memory_space<vmem>>, vector<1x1x16x16xf32>
    %87 = vector.shape_cast %86 : vector<1x1x16x16xf32> to vector<16x16xf32>
    %cst_110 = arith.constant dense<0.000000e+00> : vector<16x768xf32>
    %88 = tpu.matmul %87, %85, %cst_110 {dimension_numbers = #tpu.dot_dimension_numbers<[1], [0], [0], [1], [0, 0, 1, 1], [], []>} : vector<16x16xf32>, vector<16x768xf32>, vector<16x768xf32> -> vector<16x768xf32>
    %89 = arith.addf %84, %88 : vector<16x768xf32>
    %c0_111 = arith.constant 0 : index
    %c36_112 = arith.constant 36 : index
    %90 = vector.load %arg9[%c0_111, %c36_112] : memref<16x896xf32, #tpu.memory_space<vmem>>, vector<16x768xf32>
    %c2_113 = arith.constant 2 : index
    %c0_114 = arith.constant 0 : index
    %c0_115 = arith.constant 0 : index
    %c0_116 = arith.constant 0 : index
    %91 = vector.load %arg4[%c2_113, %c0_114, %c0_115, %c0_116] : memref<3x3x16x16xf32, #tpu.memory_space<vmem>>, vector<1x1x16x16xf32>
    %92 = vector.shape_cast %91 : vector<1x1x16x16xf32> to vector<16x16xf32>
    %cst_117 = arith.constant dense<0.000000e+00> : vector<16x768xf32>
    %93 = tpu.matmul %92, %90, %cst_117 {dimension_numbers = #tpu.dot_dimension_numbers<[1], [0], [0], [1], [0, 0, 1, 1], [], []>} : vector<16x16xf32>, vector<16x768xf32>, vector<16x768xf32> -> vector<16x768xf32>
    %94 = arith.addf %89, %93 : vector<16x768xf32>
    %c0_118 = arith.constant 0 : index
    %c37_119 = arith.constant 37 : index
    %95 = vector.load %arg9[%c0_118, %c37_119] : memref<16x896xf32, #tpu.memory_space<vmem>>, vector<16x768xf32>
    %c2_120 = arith.constant 2 : index
    %c1_121 = arith.constant 1 : index
    %c0_122 = arith.constant 0 : index
    %c0_123 = arith.constant 0 : index
    %96 = vector.load %arg4[%c2_120, %c1_121, %c0_122, %c0_123] : memref<3x3x16x16xf32, #tpu.memory_space<vmem>>, vector<1x1x16x16xf32>
    %97 = vector.shape_cast %96 : vector<1x1x16x16xf32> to vector<16x16xf32>
    %cst_124 = arith.constant dense<0.000000e+00> : vector<16x768xf32>
    %98 = tpu.matmul %97, %95, %cst_124 {dimension_numbers = #tpu.dot_dimension_numbers<[1], [0], [0], [1], [0, 0, 1, 1], [], []>} : vector<16x16xf32>, vector<16x768xf32>, vector<16x768xf32> -> vector<16x768xf32>
    %99 = arith.addf %94, %98 : vector<16x768xf32>
    %c0_125 = arith.constant 0 : index
    %c38_126 = arith.constant 38 : index
    %100 = vector.load %arg9[%c0_125, %c38_126] : memref<16x896xf32, #tpu.memory_space<vmem>>, vector<16x768xf32>
    %c2_127 = arith.constant 2 : index
    %c2_128 = arith.constant 2 : index
    %c0_129 = arith.constant 0 : index
    %c0_130 = arith.constant 0 : index
    %101 = vector.load %arg4[%c2_127, %c2_128, %c0_129, %c0_130] : memref<3x3x16x16xf32, #tpu.memory_space<vmem>>, vector<1x1x16x16xf32>
    %102 = vector.shape_cast %101 : vector<1x1x16x16xf32> to vector<16x16xf32>
    %cst_131 = arith.constant dense<0.000000e+00> : vector<16x768xf32>
    %103 = tpu.matmul %102, %100, %cst_131 {dimension_numbers = #tpu.dot_dimension_numbers<[1], [0], [0], [1], [0, 0, 1, 1], [], []>} : vector<16x16xf32>, vector<16x768xf32>, vector<16x768xf32> -> vector<16x768xf32>
    %104 = arith.addf %99, %103 : vector<16x768xf32>
    %c0_132 = arith.constant 0 : index
    %c0_133 = arith.constant 0 : index
    %105 = vector.load %arg5[%c0_132, %c0_133] : memref<16x1xf32, #tpu.memory_space<vmem>>, vector<16x1xf32>
    %106 = vector.broadcast %105 : vector<16x1xf32> to vector<16x768xf32>
    %107 = arith.addf %104, %106 : vector<16x768xf32>
    %cst_134 = arith.constant 0.000000e+00 : f32
    %108 = vector.broadcast %cst_134 : f32 to vector<16x768xf32>
    %109 = arith.maximumf %107, %108 : vector<16x768xf32>
    %110 = vector.broadcast %2 : vector<1x768xf32> to vector<16x768xf32>
    %111 = arith.mulf %109, %110 : vector<16x768xf32>
    %c0_135 = arith.constant 0 : index
    %c19_136 = arith.constant 19 : index
    %112 = vector.load %arg9[%c0_135, %c19_136] : memref<16x896xf32, #tpu.memory_space<vmem>>, vector<16x768xf32>
    tpu.vector_store %arg9[%c0_135, %c19_136], %111 {strides = array<i32>} : memref<16x896xf32, #tpu.memory_space<vmem>>, vector<16x768xf32>,
    %cst_137 = arith.constant 0.000000e+00 : f32
    %113 = vector.broadcast %cst_137 : f32 to vector<4x768xf32>
    %c0_138 = arith.constant 0 : index
    %c0_139 = arith.constant 0 : index
    %114 = vector.load %arg9[%c0_138, %c0_139] : memref<16x896xf32, #tpu.memory_space<vmem>>, vector<16x768xf32>
    %c0_140 = arith.constant 0 : index
    %c0_141 = arith.constant 0 : index
    %c0_142 = arith.constant 0 : index
    %c0_143 = arith.constant 0 : index
    %115 = vector.load %arg6[%c0_140, %c0_141, %c0_142, %c0_143] : memref<3x3x4x16xf32, #tpu.memory_space<vmem>>, vector<1x1x4x16xf32>
    %116 = vector.shape_cast %115 : vector<1x1x4x16xf32> to vector<4x16xf32>
    %cst_144 = arith.constant dense<0.000000e+00> : vector<4x768xf32>
    %117 = tpu.matmul %116, %114, %cst_144 {dimension_numbers = #tpu.dot_dimension_numbers<[1], [0], [0], [1], [0, 0, 1, 1], [], []>} : vector<4x16xf32>, vector<16x768xf32>, vector<4x768xf32> -> vector<4x768xf32>
    %118 = arith.addf %113, %117 : vector<4x768xf32>
    %c0_145 = arith.constant 0 : index
    %c1_146 = arith.constant 1 : index
    %119 = vector.load %arg9[%c0_145, %c1_146] : memref<16x896xf32, #tpu.memory_space<vmem>>, vector<16x768xf32>
    %c0_147 = arith.constant 0 : index
    %c1_148 = arith.constant 1 : index
    %c0_149 = arith.constant 0 : index
    %c0_150 = arith.constant 0 : index
    %120 = vector.load %arg6[%c0_147, %c1_148, %c0_149, %c0_150] : memref<3x3x4x16xf32, #tpu.memory_space<vmem>>, vector<1x1x4x16xf32>
    %121 = vector.shape_cast %120 : vector<1x1x4x16xf32> to vector<4x16xf32>
    %cst_151 = arith.constant dense<0.000000e+00> : vector<4x768xf32>
    %122 = tpu.matmul %121, %119, %cst_151 {dimension_numbers = #tpu.dot_dimension_numbers<[1], [0], [0], [1], [0, 0, 1, 1], [], []>} : vector<4x16xf32>, vector<16x768xf32>, vector<4x768xf32> -> vector<4x768xf32>
    %123 = arith.addf %118, %122 : vector<4x768xf32>
    %c0_152 = arith.constant 0 : index
    %c2_153 = arith.constant 2 : index
    %124 = vector.load %arg9[%c0_152, %c2_153] : memref<16x896xf32, #tpu.memory_space<vmem>>, vector<16x768xf32>
    %c0_154 = arith.constant 0 : index
    %c2_155 = arith.constant 2 : index
    %c0_156 = arith.constant 0 : index
    %c0_157 = arith.constant 0 : index
    %125 = vector.load %arg6[%c0_154, %c2_155, %c0_156, %c0_157] : memref<3x3x4x16xf32, #tpu.memory_space<vmem>>, vector<1x1x4x16xf32>
    %126 = vector.shape_cast %125 : vector<1x1x4x16xf32> to vector<4x16xf32>
    %cst_158 = arith.constant dense<0.000000e+00> : vector<4x768xf32>
    %127 = tpu.matmul %126, %124, %cst_158 {dimension_numbers = #tpu.dot_dimension_numbers<[1], [0], [0], [1], [0, 0, 1, 1], [], []>} : vector<4x16xf32>, vector<16x768xf32>, vector<4x768xf32> -> vector<4x768xf32>
    %128 = arith.addf %123, %127 : vector<4x768xf32>
    %c0_159 = arith.constant 0 : index
    %c18_160 = arith.constant 18 : index
    %129 = vector.load %arg9[%c0_159, %c18_160] : memref<16x896xf32, #tpu.memory_space<vmem>>, vector<16x768xf32>
    %c1_161 = arith.constant 1 : index
    %c0_162 = arith.constant 0 : index
    %c0_163 = arith.constant 0 : index
    %c0_164 = arith.constant 0 : index
    %130 = vector.load %arg6[%c1_161, %c0_162, %c0_163, %c0_164] : memref<3x3x4x16xf32, #tpu.memory_space<vmem>>, vector<1x1x4x16xf32>
    %131 = vector.shape_cast %130 : vector<1x1x4x16xf32> to vector<4x16xf32>
    %cst_165 = arith.constant dense<0.000000e+00> : vector<4x768xf32>
    %132 = tpu.matmul %131, %129, %cst_165 {dimension_numbers = #tpu.dot_dimension_numbers<[1], [0], [0], [1], [0, 0, 1, 1], [], []>} : vector<4x16xf32>, vector<16x768xf32>, vector<4x768xf32> -> vector<4x768xf32>
    %133 = arith.addf %128, %132 : vector<4x768xf32>
    %c0_166 = arith.constant 0 : index
    %c19_167 = arith.constant 19 : index
    %134 = vector.load %arg9[%c0_166, %c19_167] : memref<16x896xf32, #tpu.memory_space<vmem>>, vector<16x768xf32>
    %c1_168 = arith.constant 1 : index
    %c1_169 = arith.constant 1 : index
    %c0_170 = arith.constant 0 : index
    %c0_171 = arith.constant 0 : index
    %135 = vector.load %arg6[%c1_168, %c1_169, %c0_170, %c0_171] : memref<3x3x4x16xf32, #tpu.memory_space<vmem>>, vector<1x1x4x16xf32>
    %136 = vector.shape_cast %135 : vector<1x1x4x16xf32> to vector<4x16xf32>
    %cst_172 = arith.constant dense<0.000000e+00> : vector<4x768xf32>
    %137 = tpu.matmul %136, %134, %cst_172 {dimension_numbers = #tpu.dot_dimension_numbers<[1], [0], [0], [1], [0, 0, 1, 1], [], []>} : vector<4x16xf32>, vector<16x768xf32>, vector<4x768xf32> -> vector<4x768xf32>
    %138 = arith.addf %133, %137 : vector<4x768xf32>
    %c0_173 = arith.constant 0 : index
    %c20_174 = arith.constant 20 : index
    %139 = vector.load %arg9[%c0_173, %c20_174] : memref<16x896xf32, #tpu.memory_space<vmem>>, vector<16x768xf32>
    %c1_175 = arith.constant 1 : index
    %c2_176 = arith.constant 2 : index
    %c0_177 = arith.constant 0 : index
    %c0_178 = arith.constant 0 : index
    %140 = vector.load %arg6[%c1_175, %c2_176, %c0_177, %c0_178] : memref<3x3x4x16xf32, #tpu.memory_space<vmem>>, vector<1x1x4x16xf32>
    %141 = vector.shape_cast %140 : vector<1x1x4x16xf32> to vector<4x16xf32>
    %cst_179 = arith.constant dense<0.000000e+00> : vector<4x768xf32>
    %142 = tpu.matmul %141, %139, %cst_179 {dimension_numbers = #tpu.dot_dimension_numbers<[1], [0], [0], [1], [0, 0, 1, 1], [], []>} : vector<4x16xf32>, vector<16x768xf32>, vector<4x768xf32> -> vector<4x768xf32>
    %143 = arith.addf %138, %142 : vector<4x768xf32>
    %c0_180 = arith.constant 0 : index
    %c36_181 = arith.constant 36 : index
    %144 = vector.load %arg9[%c0_180, %c36_181] : memref<16x896xf32, #tpu.memory_space<vmem>>, vector<16x768xf32>
    %c2_182 = arith.constant 2 : index
    %c0_183 = arith.constant 0 : index
    %c0_184 = arith.constant 0 : index
    %c0_185 = arith.constant 0 : index
    %145 = vector.load %arg6[%c2_182, %c0_183, %c0_184, %c0_185] : memref<3x3x4x16xf32, #tpu.memory_space<vmem>>, vector<1x1x4x16xf32>
    %146 = vector.shape_cast %145 : vector<1x1x4x16xf32> to vector<4x16xf32>
    %cst_186 = arith.constant dense<0.000000e+00> : vector<4x768xf32>
    %147 = tpu.matmul %146, %144, %cst_186 {dimension_numbers = #tpu.dot_dimension_numbers<[1], [0], [0], [1], [0, 0, 1, 1], [], []>} : vector<4x16xf32>, vector<16x768xf32>, vector<4x768xf32> -> vector<4x768xf32>
    %148 = arith.addf %143, %147 : vector<4x768xf32>
    %c0_187 = arith.constant 0 : index
    %c37_188 = arith.constant 37 : index
    %149 = vector.load %arg9[%c0_187, %c37_188] : memref<16x896xf32, #tpu.memory_space<vmem>>, vector<16x768xf32>
    %c2_189 = arith.constant 2 : index
    %c1_190 = arith.constant 1 : index
    %c0_191 = arith.constant 0 : index
    %c0_192 = arith.constant 0 : index
    %150 = vector.load %arg6[%c2_189, %c1_190, %c0_191, %c0_192] : memref<3x3x4x16xf32, #tpu.memory_space<vmem>>, vector<1x1x4x16xf32>
    %151 = vector.shape_cast %150 : vector<1x1x4x16xf32> to vector<4x16xf32>
    %cst_193 = arith.constant dense<0.000000e+00> : vector<4x768xf32>
    %152 = tpu.matmul %151, %149, %cst_193 {dimension_numbers = #tpu.dot_dimension_numbers<[1], [0], [0], [1], [0, 0, 1, 1], [], []>} : vector<4x16xf32>, vector<16x768xf32>, vector<4x768xf32> -> vector<4x768xf32>
    %153 = arith.addf %148, %152 : vector<4x768xf32>
    %c0_194 = arith.constant 0 : index
    %c38_195 = arith.constant 38 : index
    %154 = vector.load %arg9[%c0_194, %c38_195] : memref<16x896xf32, #tpu.memory_space<vmem>>, vector<16x768xf32>
    %c2_196 = arith.constant 2 : index
    %c2_197 = arith.constant 2 : index
    %c0_198 = arith.constant 0 : index
    %c0_199 = arith.constant 0 : index
    %155 = vector.load %arg6[%c2_196, %c2_197, %c0_198, %c0_199] : memref<3x3x4x16xf32, #tpu.memory_space<vmem>>, vector<1x1x4x16xf32>
    %156 = vector.shape_cast %155 : vector<1x1x4x16xf32> to vector<4x16xf32>
    %cst_200 = arith.constant dense<0.000000e+00> : vector<4x768xf32>
    %157 = tpu.matmul %156, %154, %cst_200 {dimension_numbers = #tpu.dot_dimension_numbers<[1], [0], [0], [1], [0, 0, 1, 1], [], []>} : vector<4x16xf32>, vector<16x768xf32>, vector<4x768xf32> -> vector<4x768xf32>
    %158 = arith.addf %153, %157 : vector<4x768xf32>
    %c0_201 = arith.constant 0 : index
    %c0_202 = arith.constant 0 : index
    %159 = vector.load %arg7[%c0_201, %c0_202] : memref<4x1xf32, #tpu.memory_space<vmem>>, vector<4x1xf32>
    %160 = vector.broadcast %159 : vector<4x1xf32> to vector<4x768xf32>
    %161 = arith.addf %158, %160 : vector<4x768xf32>
    %162 = arith.negf %161 : vector<4x768xf32>
    %163 = math.exp %162 : vector<4x768xf32>
    %cst_203 = arith.constant 1.000000e+00 : f32
    %164 = vector.broadcast %cst_203 : f32 to vector<4x768xf32>
    %165 = arith.addf %164, %163 : vector<4x768xf32>
    %166 = arith.divf %164, %165 : vector<4x768xf32>
    %c0_204 = arith.constant 0 : index
    %c0_205 = arith.constant 0 : index
    %167 = vector.load %arg8[%c0_204, %c0_205] : memref<4x768xf32, #tpu.memory_space<vmem>>, vector<4x768xf32>
    tpu.vector_store %arg8[%c0_204, %c0_205], %166 {strides = array<i32>} : memref<4x768xf32, #tpu.memory_space<vmem>>, vector<4x768xf32>,
    return
  }
}

</mosaic_0001>

<bundles_post_ra>
// kernel: net_forward.1
= control target key start
LH: loop header
LB: loop body
LE: loop exit
PB: predicated region body
PF: predicated region fallthrough
CT: control target
= control target key end

     0   :  { %s6653_s11 = smov 19   ;;  %v6654_v9 = vmov 0.0   ;;  %vm93_vm0 = vcmask 149504   ;;  %vm73_vm1 = vcmask 154624   ;;  %vm86_vm2 = vcmask 1042584   ;;  %s6656_s12 = smov 126   ;;  %s8912_s0 = inlined_call_operand.vmem [shape: f32[3,768], index: 0, kind: input, shape index: {}]   ;;  %s8913_s2 = inlined_call_operand.vmem [shape: f32[3,3,16,3], index: 2, kind: input, shape index: {}]   ;;  %s8914_s3 = inlined_call_operand.vmem [shape: f32[16,1], index: 3, kind: input, shape index: {}]   ;;  %s8915_s1 = inlined_call_operand.vmem [shape: f32[1,768], index: 1, kind: input, shape index: {}]   ;;  %s8916_s4 = inlined_call_operand.vmem [shape: f32[3,3,16,16], index: 4, kind: input, shape index: {}]   ;;  %s8917_s5 = inlined_call_operand.vmem [shape: f32[16,1], index: 5, kind: input, shape index: {}]   ;;  %s8918_s6 = inlined_call_operand.vmem [shape: f32[3,3,4,16], index: 6, kind: input, shape index: {}]   ;;  %s8919_s7 = inlined_call_operand.vmem [shape: f32[4,1], index: 7, kind: input, shape index: {}]   ;;  %s8920_s8 = inlined_call_operand.vmem [shape: f32[4,768], index: 8, kind: output, shape index: {}]  }
   0x1   :  { %v45_v0 = vld [vmem:[%s8912_s0 + $0x8] sm:$0x77]  ;;  %v44_v1 = vld [vmem:[%s8912_s0] sm:$0x77]  ;;  %v46_v2 = vld [vmem:[%s8912_s0 + $0x10] sm:$0x77] }
   0x2   :  { %52 = vst [vmem:[#allocation1 + $0x10] ss:$2 sm:$0xff] %v45_v0  ;;  %s6655_s0 = smov 127   ;;  %s6657_s13 = smov 110   ;;  %vm128_vm3 = vcmask 1039360   ;;  %vm142_vm4 = vcmask 1042432  }
   0x3   :  { %50 = vst [vmem:[#allocation1] ss:$2 sm:$0xff] %v44_v1  ;;  %s6658_s14 = smov 109   ;;  %s6659_s15 = smov 108   ;;  %v5685_v31 = vld [vmem:[%s8913_s2 + $0x10] sm:$0xff]  ;;  %vm135_vm5 = vcmask 23552  }
   0x4   :  { %54 = vst [vmem:[#allocation1 + $0x20] ss:$2 sm:$0xff] %v46_v2  ;;  %s6660_s16 = smov 92   ;;  %s6661_s17 = smov 91   ;;  %v5686_v38 = vld [vmem:[%s8913_s2 + $0x18] sm:$0xff]  ;;  %vm466_vm6 = vcmask 1031168  }
   0x5   :  { %29 = vst [vmem:[#allocation2] sm:$0xff] %v6654_v9  ;;  %s6662_s22 = smov 90   ;;  %v101_v45 = vld [vmem:[%s8913_s2] sm:$0xff]  ;;  %v102_v51 = vld [vmem:[%s8913_s2 + $0x8] sm:$0xff]  ;;  %vm658_vm7 = vcmask 900096   ;;  %vm850_vm8 = vcmask 891904  }
   0x6   :  { %30 = vst [vmem:[#allocation2 + $0x8] sm:$0xff] %v6654_v9  ;;  %v5723_v1 = vld [vmem:[%s8913_s2 + $0x20] sm:$0xff]  ;;  %vm1042_vm9 = vcmask 883712   ;;  %vm1234_vm10 = vcmask 752640   ;;  %vm1426_vm11 = vcmask 744448   ;;  %vm1618_vm12 = vcmask 736256  }
   0x7   :  { %31 = vst [vmem:[#allocation2 + $0x10] sm:$0xff] %v6654_v9  ;;  %vm1914_vm13 = vcmask 1047704   ;;  %vm2026_vm14 = vcmask 130048  }
   0x8   :  { %32 = vst [vmem:[#allocation2 + $0x18] sm:$0xff] %v6654_v9 }
   0x9   :  { %v57_v3 = vld.sshfl [vmem:[#allocation1 + $0x10] sm:$0xff pattern:$0x75316420]  ;;  %v58_v6 = vld.sshfl [vmem:[#allocation1 + $0x18] sm:$0xff pattern:$0x75316420] }
   0xa   :  { %65 = vrot.lane.b32.xlu1 %v57_v3, %s6653_s11  ;;  %v55_v4 = vld.sshfl [vmem:[#allocation1] sm:$0xff pattern:$0x75316420]  ;;  %v56_v7 = vld.sshfl [vmem:[#allocation1 + $0x8] sm:$0xff pattern:$0x75316420] }
   0xb   :  { %61 = vrot.lane.b32.xlu0 %v55_v4, %s6653_s11  ;;  %v59_v5 = vld.sshfl [vmem:[#allocation1 + $0x20] sm:$0xff pattern:$0x75316420]  ;;  %v60_v8 = vld.sshfl [vmem:[#allocation1 + $0x28] sm:$0xff pattern:$0x75316420] }
   0xc   :  { %69 = vrot.lane.b32.xlu2 %v59_v5, %s6653_s11  ;;  %33 = vst [vmem:[#allocation2 + $0x20] sm:$0xff] %v6654_v9 }
   0xd   :  { %34 = vst [vmem:[#allocation2 + $0x28] sm:$0xff] %v6654_v9 }
   0xe   :  { %35 = vst [vmem:[#allocation2 + $0x30] sm:$0xff] %v6654_v9 }
   0xf   :  { %36 = vst [vmem:[#allocation2 + $0x38] sm:$0xff] %v6654_v9 }
  0x10   :  { %42 = vst [vmem:[#allocation2 + $0x68] sm:$0xff] %v6654_v9 }
  0x12   :  { %67 = vrot.lane.b32.xlu1 %v58_v6, %s6653_s11 }
  0x13   :  { %63 = vrot.lane.b32.xlu0 %v56_v7, %s6653_s11 }
  0x14   :  { %71 = vrot.lane.b32.xlu2 %v60_v8, %s6653_s11  ;;  %v5724_v8 = vld [vmem:[%s8913_s2 + $0x28] sm:$0xff] }
  0x66   :  { %v70_v10 = vpop.permute.xlu2 %69 }
  0x6e   :  { %v72_v11 = vpop.permute.xlu2 %71 }
  0x6f   :  { %v78_v12 = vsel %vm73_vm1, %v70_v10, %v72_v11  ;;  %94 = vst.msk [vmem:[#allocation2 + $0x30] sm:$0x7] %vm93_vm0, %v72_v11 }
  0x70   :  { %92 = vst [vmem:[#allocation2 + $0x28] sm:$0x7] %v78_v12 }
  0x76   :  { %v6745_v25 = vld [vmem:[#allocation2 + $0x30] sm:$0x7] }
  0x77   :  { %v6749_v26 = vld [vmem:[#allocation2 + $0x28] sm:$0x7] }
  0x7c   :  { %v66_v13 = vpop.permute.xlu1 %65 }
  0x7d   :  { %v62_v14 = vpop.permute.xlu0 %61 }
  0x7e   :  { %87 = vst.msk [vmem:[#allocation2] sm:$0x7] %vm86_vm2, %v62_v14 }
  0x84   :  { %v68_v15 = vpop.permute.xlu1 %67 }
  0x85   :  { %v76_v16 = vsel %vm73_vm1, %v66_v13, %v68_v15  ;;  %v77_v17 = vsel %vm73_vm1, %v68_v15, %v70_v10  ;;  %v64_v18 = vpop.permute.xlu0 %63  ;;  %v6727_v19 = vld [vmem:[#allocation2] sm:$0x7] }
  0x86   :  { %90 = vst [vmem:[#allocation2 + $0x18] sm:$0x7] %v76_v16  ;;  %v74_v20 = vsel %vm73_vm1, %v62_v14, %v64_v18  ;;  %v75_v21 = vsel %vm73_vm1, %v64_v18, %v66_v13  ;;  %114 = vrot.lane.b32.xlu0 %v6727_v19, %s6655_s0  ;;  %v5743_v13 = vld [vmem:[%s8913_s2 + $0x30] sm:$0xff] }
  0x87   :  { %91 = vst [vmem:[#allocation2 + $0x20] sm:$0x7] %v77_v17 }
  0x88   :  { %88 = vst [vmem:[#allocation2 + $0x8] sm:$0x7] %v74_v20 }
  0x89   :  { %89 = vst [vmem:[#allocation2 + $0x10] sm:$0x7] %v75_v21 }
  0x8d   :  { %v6733_v22 = vld [vmem:[#allocation2 + $0x18] sm:$0x7] }
  0x8e   :  { %120 = vrot.lane.b32.xlu0 %v6733_v22, %s6655_s0  ;;  %v6751_v27 = vld [vmem:[#allocation2 + $0x20] sm:$0x7] }
  0x8f   :  { %v6737_v23 = vld [vmem:[#allocation2 + $0x8] sm:$0x7] }
  0x90   :  { %v6739_v24 = vld [vmem:[#allocation2 + $0x10] sm:$0x7]  ;;  %116 = vrot.lane.b32.xlu1 %v6737_v23, %s6655_s0 }
  0x91   :  { %118 = vrot.lane.b32.xlu2 %v6739_v24, %s6655_s0 }
  0x96   :  { %126 = vrot.lane.b32.xlu0 %v6745_v25, %s6655_s0 }
  0x98   :  { %122 = vrot.lane.b32.xlu1 %v6751_v27, %s6655_s0 }
  0x99   :  { %124 = vrot.lane.b32.xlu2 %v6749_v26, %s6655_s0 }
  0x9e   :  { %456 = vrot.lane.b32.xlu0 %v6739_v24, %s6656_s12 }
  0xa0   :  { %452 = vrot.lane.b32.xlu1 %v6727_v19, %s6656_s12 }
  0xa1   :  { %454 = vrot.lane.b32.xlu2 %v6737_v23, %s6656_s12 }
  0xa6   :  { %462 = vrot.lane.b32.xlu0 %v6749_v26, %s6656_s12 }
  0xa8   :  { %458 = vrot.lane.b32.xlu1 %v6733_v22, %s6656_s12 }
  0xa9   :  { %460 = vrot.lane.b32.xlu2 %v6751_v27, %s6656_s12 }
  0xae   :  { %646 = vrot.lane.b32.xlu0 %v6737_v23, %s6657_s13 }
  0xb0   :  { %464 = vrot.lane.b32.xlu1 %v6745_v25, %s6656_s12 }
  0xb1   :  { %644 = vrot.lane.b32.xlu2 %v6727_v19, %s6657_s13 }
  0xb6   :  { %652 = vrot.lane.b32.xlu0 %v6751_v27, %s6657_s13 }
  0xb8   :  { %648 = vrot.lane.b32.xlu1 %v6739_v24, %s6657_s13 }
  0xb9   :  { %650 = vrot.lane.b32.xlu2 %v6733_v22, %s6657_s13 }
  0xbe   :  { %836 = vrot.lane.b32.xlu0 %v6727_v19, %s6658_s14 }
  0xc0   :  { %654 = vrot.lane.b32.xlu1 %v6749_v26, %s6657_s13 }
  0xc1   :  { %656 = vrot.lane.b32.xlu2 %v6745_v25, %s6657_s13 }
  0xc6   :  { %842 = vrot.lane.b32.xlu0 %v6733_v22, %s6658_s14 }
  0xc8   :  { %838 = vrot.lane.b32.xlu1 %v6737_v23, %s6658_s14 }
  0xc9   :  { %840 = vrot.lane.b32.xlu2 %v6739_v24, %s6658_s14 }
  0xce   :  { %848 = vrot.lane.b32.xlu0 %v6745_v25, %s6658_s14 }
  0xd0   :  { %844 = vrot.lane.b32.xlu1 %v6751_v27, %s6658_s14 }
  0xd1   :  { %846 = vrot.lane.b32.xlu2 %v6749_v26, %s6658_s14 }
  0xd6   :  { %1032 = vrot.lane.b32.xlu0 %v6739_v24, %s6659_s15 }
  0xd8   :  { %1028 = vrot.lane.b32.xlu1 %v6727_v19, %s6659_s15 }
  0xd9   :  { %1030 = vrot.lane.b32.xlu2 %v6737_v23, %s6659_s15 }
  0xde   :  { %1038 = vrot.lane.b32.xlu0 %v6749_v26, %s6659_s15 }
  0xe0   :  { %1034 = vrot.lane.b32.xlu1 %v6733_v22, %s6659_s15 }
  0xe1   :  { %1036 = vrot.lane.b32.xlu2 %v6751_v27, %s6659_s15 }
  0xe6   :  { %1222 = vrot.lane.b32.xlu0 %v6737_v23, %s6660_s16 }
  0xe8   :  { %1040 = vrot.lane.b32.xlu1 %v6745_v25, %s6659_s15 }
  0xe9   :  { %1220 = vrot.lane.b32.xlu2 %v6727_v19, %s6660_s16 }
  0xeb   :  { %v119_v28 = vpop.permute.xlu2 %118 }
  0xee   :  { %1228 = vrot.lane.b32.xlu0 %v6751_v27, %s6660_s16 }
  0xf0   :  { %1224 = vrot.lane.b32.xlu1 %v6739_v24, %s6660_s16 }
  0xf1   :  { %1226 = vrot.lane.b32.xlu2 %v6733_v22, %s6660_s16 }
  0xf3   :  { %v125_v33 = vpop.permute.xlu2 %124 }
  0xf6   :  { %1412 = vrot.lane.b32.xlu0 %v6727_v19, %s6661_s17 }
  0xf8   :  { %1230 = vrot.lane.b32.xlu1 %v6749_v26, %s6660_s16  ;;  %v115_v29 = vpop.permute.xlu0 %114 }
  0xf9   :  { %1232 = vrot.lane.b32.xlu2 %v6745_v25, %s6660_s16 }
  0xfb   :  { %v455_v43 = vpop.permute.xlu2 %454 }
  0xfe   :  { %1418 = vrot.lane.b32.xlu0 %v6733_v22, %s6661_s17 }
 0x100   :  { %1414 = vrot.lane.b32.xlu1 %v6737_v23, %s6661_s17  ;;  %v121_v30 = vpop.permute.xlu0 %120 }
 0x101   :  { %1416 = vrot.lane.b32.xlu2 %v6739_v24, %s6661_s17  ;;  %v131_v32 = vsel %vm128_vm3, %v119_v28, %v121_v30 }
 0x102   :  { %v117_v34 = vpop.permute.xlu1 %116  ;;  %5693 = vmatpush.msk.msra.mxu2 %vm142_vm4, %v131_v32  ;;  %v5763_v32 = vld [vmem:[%s8913_s2 + $0x40] sm:$0xff] }
 0x103   :  { %v129_v35 = vsel %vm128_vm3, %v115_v29, %v117_v34  ;;  %v130_v36 = vsel %vm128_vm3, %v117_v34, %v119_v28  ;;  %5694 = vmatmul.msk.f32.vlgmr.msra.gmra.mxu2 %vm135_vm5, %v5685_v31  ;;  %v461_v49 = vpop.permute.xlu2 %460 }
 0x104   :  { %5687 = vmatpush.msk.msra.mxu0 %vm142_vm4, %v129_v35  ;;  %5690 = vmatpush.msk.msra.mxu1 %vm142_vm4, %v130_v36 }
 0x105   :  { %5688 = vmatmul.msk.f32.vlgmr.msra.gmra.mxu0 %vm135_vm5, %v5685_v31  ;;  %5691 = vmatmul.msk.f32.vlgmr.msra.gmra.mxu1 %vm135_vm5, %v5685_v31 }
 0x106   :  { %5705 = vmatpush.msk.msrb.mxu2 %vm142_vm4, %v6727_v19  ;;  %1424 = vrot.lane.b32.xlu0 %v6745_v25, %s6661_s17 }
 0x108   :  { %5717 = vmatpush.msk.msra.mxu2 %vm142_vm4, %v6751_v27  ;;  %1420 = vrot.lane.b32.xlu1 %v6751_v27, %s6661_s17  ;;  %v127_v37 = vpop.permute.xlu0 %126 }
 0x109   :  { %1422 = vrot.lane.b32.xlu2 %v6749_v26, %s6661_s17  ;;  %v134_v39 = vsel %vm128_vm3, %v125_v33, %v127_v37 }
 0x10a   :  { %v123_v40 = vpop.permute.xlu1 %122  ;;  %5702 = vmatpush.msk.msrb.mxu1 %vm142_vm4, %v134_v39 }
 0x10b   :  { %v132_v41 = vsel %vm128_vm3, %v121_v30, %v123_v40  ;;  %v133_v42 = vsel %vm128_vm3, %v123_v40, %v125_v33  ;;  %5695 = vmatmul.msk.f32.gmra.mxu2 %vm135_vm5, %v5686_v38  ;;  %v645_v55 = vpop.permute.xlu2 %644 }
 0x10c   :  { %5714 = vmatpush.msk.msra.mxu1 %vm142_vm4, %v6733_v22  ;;  %5696 = vmatpush.msk.msra.mxu3 %vm142_vm4, %v132_v41 }
 0x10d   :  { %5699 = vmatpush.msk.msrb.mxu0 %vm142_vm4, %v133_v42  ;;  %5692 = vmatmul.msk.f32.gmra.mxu1 %vm135_vm5, %v5686_v38  ;;  %v5783_v42 = vld [vmem:[%s8913_s2 + $0x50] sm:$0xff] }
 0x10e   :  { %5689 = vmatmul.msk.f32.gmra.mxu0 %vm135_vm5, %v5686_v38  ;;  %5697 = vmatmul.msk.f32.vlgmr.msra.gmra.mxu3 %vm135_vm5, %v5685_v31 }
 0x10f   :  { %5711 = vmatpush.msk.msra.mxu0 %vm142_vm4, %v6739_v24  ;;  %5708 = vmatpush.msk.msrb.mxu3 %vm142_vm4, %v6737_v23 }
 0x110   :  { %1608 = vrot.lane.b32.xlu0 %v6739_v24, %s6662_s22  ;;  %1604 = vrot.lane.b32.xlu1 %v6727_v19, %s6662_s22  ;;  %v457_v44 = vpop.permute.xlu0 %456  ;;  %v5744_v19 = vld [vmem:[%s8913_s2 + $0x38] sm:$0xff] }
 0x111   :  { %5720 = vmatpush.msk.msra.mxu3 %vm142_vm4, %v6749_v26  ;;  %1606 = vrot.lane.b32.xlu2 %v6737_v23, %s6662_s22  ;;  %v468_v48 = vsel %vm466_vm6, %v455_v43, %v457_v44 }
 0x112   :  { %v453_v46 = vpop.permute.xlu1 %452 }
 0x113   :  { %v467_v47 = vsel %vm466_vm6, %v453_v46, %v455_v43  ;;  %5706 = vmatmul.msk.f32.vlgmr.msrb.gmra.mxu2 %vm135_vm5, %v101_v45  ;;  %v651_v61 = vpop.permute.xlu2 %650 }
 0x115   :  { %5703 = vmatmul.msk.f32.vlgmr.msrb.gmra.mxu1 %vm135_vm5, %v5685_v31 }
 0x116   :  { %5700 = vmatmul.msk.f32.vlgmr.msrb.gmra.mxu0 %vm135_vm5, %v5685_v31  ;;  %5698 = vmatmul.msk.f32.gmra.mxu3 %vm135_vm5, %v5686_v38 }
 0x117   :  { %5725 = vmatpush.msk.msrb.mxu0 %vm142_vm4, %v467_v47  ;;  %5728 = vmatpush.msk.msrb.mxu1 %vm142_vm4, %v468_v48 }
 0x118   :  { %1614 = vrot.lane.b32.xlu0 %v6749_v26, %s6662_s22  ;;  %1610 = vrot.lane.b32.xlu1 %v6733_v22, %s6662_s22  ;;  %v463_v50 = vpop.permute.xlu0 %462 }
 0x119   :  { %1612 = vrot.lane.b32.xlu2 %v6751_v27, %s6662_s22  ;;  %v471_v60 = vsel %vm466_vm6, %v461_v49, %v463_v50 }
 0x11a   :  { %v459_v52 = vpop.permute.xlu1 %458 }
 0x11b   :  { %v469_v53 = vsel %vm466_vm6, %v457_v44, %v459_v52  ;;  %5707 = vmatmul.msk.f32.gmra.mxu2 %vm135_vm5, %v102_v51  ;;  %v470_v54 = vsel %vm466_vm6, %v459_v52, %v461_v49  ;;  %v657_v4 = vpop.permute.xlu2 %656  ;;  %v5784_v49 = vld [vmem:[%s8913_s2 + $0x58] sm:$0xff] }
 0x11c   :  { %5731 = vmatpush.msk.msrb.mxu2 %vm142_vm4, %v469_v53 }
 0x11d   :  { %5704 = vmatmul.msk.f32.gmra.mxu1 %vm135_vm5, %v5686_v38 }
 0x11e   :  { %5701 = vmatmul.msk.f32.gmra.mxu0 %vm135_vm5, %v5686_v38  ;;  %5709 = vmatmul.msk.f32.vlgmr.msrb.gmra.mxu3 %vm135_vm5, %v101_v45  ;;  %v5764_v38 = vld [vmem:[%s8913_s2 + $0x48] sm:$0xff] }
 0x11f   :  { %5734 = vmatpush.msk.msrb.mxu3 %vm142_vm4, %v470_v54 }
 0x120   :  { %1616 = vrot.lane.b32.xlu1 %v6745_v25, %s6662_s22  ;;  %v647_v56 = vpop.permute.xlu0 %646 }
 0x121   :  { %v659_v57 = vsel %vm658_vm7, %v645_v55, %v647_v56 }
 0x122   :  { %v465_v58 = vpop.permute.xlu1 %464 }
 0x123   :  { %5718 = vmatmul.msk.f32.vlgmr.msra.gmra.mxu2 %vm135_vm5, %v101_v45  ;;  %v472_v59 = vsel %vm466_vm6, %v463_v50, %v465_v58  ;;  %v841_v10 = vpop.permute.xlu2 %840 }
 0x124   :  { %5745 = vmatpush.msk.msra.mxu2 %vm142_vm4, %v659_v57 }
 0x125   :  { %5715 = vmatmul.msk.f32.vlgmr.msra.gmra.mxu1 %vm135_vm5, %v101_v45 }
 0x126   :  { %5712 = vmatmul.msk.f32.vlgmr.msra.gmra.mxu0 %vm135_vm5, %v101_v45  ;;  %5710 = vmatmul.msk.f32.gmra.mxu3 %vm135_vm5, %v102_v51 }
 0x127   :  { %5737 = vmatpush.msk.msra.mxu0 %vm142_vm4, %v471_v60  ;;  %5740 = vmatpush.msk.msra.mxu1 %vm142_vm4, %v472_v59 }
 0x128   :  { %v653_v0 = vpop.permute.xlu0 %652 }
 0x129   :  { %v662_v6 = vsel %vm658_vm7, %v651_v61, %v653_v0 }
 0x12a   :  { %v649_v62 = vpop.permute.xlu1 %648 }
 0x12b   :  { %5719 = vmatmul.msk.f32.gmra.mxu2 %vm135_vm5, %v102_v51  ;;  %v660_v63 = vsel %vm658_vm7, %v647_v56, %v649_v62  ;;  %v661_v5 = vsel %vm658_vm7, %v649_v62, %v651_v61  ;;  %v847_v18 = vpop.permute.xlu2 %846 }
 0x12d   :  { %5716 = vmatmul.msk.f32.gmra.mxu1 %vm135_vm5, %v102_v51 }
 0x12e   :  { %5713 = vmatmul.msk.f32.gmra.mxu0 %vm135_vm5, %v102_v51  ;;  %5721 = vmatmul.msk.f32.vlgmr.msra.gmra.mxu3 %vm135_vm5, %v101_v45 }
 0x12f   :  { %5748 = vmatpush.msk.msra.mxu3 %vm142_vm4, %v660_v63 }
 0x130   :  { %v837_v7 = vpop.permute.xlu0 %836 }
 0x132   :  { %v655_v2 = vpop.permute.xlu1 %654 }
 0x133   :  { %v663_v3 = vsel %vm658_vm7, %v653_v0, %v655_v2  ;;  %5732 = vmatmul.msk.f32.vlgmr.msrb.gmra.mxu2 %vm135_vm5, %v5723_v1  ;;  %v664_v11 = vsel %vm658_vm7, %v655_v2, %v657_v4  ;;  %v1031_v23 = vpop.permute.xlu2 %1030 }
 0x134   :  { %5757 = vmatpush.msk.msrb.mxu2 %vm142_vm4, %v663_v3  ;;  %v5803_v3 = vld [vmem:[%s8913_s2 + $0x60] sm:$0xff] }
 0x135   :  { %5729 = vmatmul.msk.f32.vlgmr.msrb.gmra.mxu1 %vm135_vm5, %v5723_v1 }
 0x136   :  { %5726 = vmatmul.msk.f32.vlgmr.msrb.gmra.mxu0 %vm135_vm5, %v5723_v1  ;;  %5722 = vmatmul.msk.f32.gmra.mxu3 %vm135_vm5, %v102_v51 }
 0x137   :  { %5751 = vmatpush.msk.msrb.mxu0 %vm142_vm4, %v661_v5  ;;  %5754 = vmatpush.msk.msrb.mxu1 %vm142_vm4, %v662_v6 }
 0x138   :  { %v843_v12 = vpop.permute.xlu0 %842 }
 0x139   :  { %v853_v14 = vsel %vm850_vm8, %v841_v10, %v843_v12 }
 0x13a   :  { %v839_v9 = vpop.permute.xlu1 %838 }
 0x13b   :  { %5733 = vmatmul.msk.f32.gmra.mxu2 %vm135_vm5, %v5724_v8  ;;  %v851_v16 = vsel %vm850_vm8, %v837_v7, %v839_v9  ;;  %v852_v17 = vsel %vm850_vm8, %v839_v9, %v841_v10  ;;  %v1037_v29 = vpop.permute.xlu2 %1036 }
 0x13d   :  { %5730 = vmatmul.msk.f32.gmra.mxu1 %vm135_vm5, %v5724_v8 }
 0x13e   :  { %5727 = vmatmul.msk.f32.gmra.mxu0 %vm135_vm5, %v5724_v8  ;;  %5735 = vmatmul.msk.f32.vlgmr.msrb.gmra.mxu3 %vm135_vm5, %v5723_v1 }
 0x13f   :  { %5760 = vmatpush.msk.msrb.mxu3 %vm142_vm4, %v664_v11 }
 0x140   :  { %v849_v20 = vpop.permute.xlu0 %848 }
 0x141   :  { %v856_v26 = vsel %vm850_vm8, %v847_v18, %v849_v20 }
 0x142   :  { %v845_v15 = vpop.permute.xlu1 %844 }
 0x143   :  { %5746 = vmatmul.msk.f32.vlgmr.msra.gmra.mxu2 %vm135_vm5, %v5743_v13  ;;  %v854_v21 = vsel %vm850_vm8, %v843_v12, %v845_v15  ;;  %v855_v25 = vsel %vm850_vm8, %v845_v15, %v847_v18  ;;  %v1221_v37 = vpop.permute.xlu2 %1220 }
 0x144   :  { %5771 = vmatpush.msk.msra.mxu2 %vm142_vm4, %v853_v14  ;;  %v5804_v14 = vld [vmem:[%s8913_s2 + $0x68] sm:$0xff] }
 0x145   :  { %5741 = vmatmul.msk.f32.vlgmr.msra.gmra.mxu1 %vm135_vm5, %v5723_v1 }
 0x146   :  { %5738 = vmatmul.msk.f32.vlgmr.msra.gmra.mxu0 %vm135_vm5, %v5723_v1  ;;  %5736 = vmatmul.msk.f32.gmra.mxu3 %vm135_vm5, %v5724_v8 }
 0x147   :  { %5765 = vmatpush.msk.msra.mxu0 %vm142_vm4, %v851_v16  ;;  %5768 = vmatpush.msk.msra.mxu1 %vm142_vm4, %v852_v17 }
 0x148   :  { %v1033_v27 = vpop.permute.xlu0 %1032 }
 0x149   :  { %v1044_v30 = vsel %vm1042_vm9, %v1031_v23, %v1033_v27 }
 0x14a   :  { %v1029_v22 = vpop.permute.xlu1 %1028 }
 0x14b   :  { %5747 = vmatmul.msk.f32.gmra.mxu2 %vm135_vm5, %v5744_v19  ;;  %v1043_v24 = vsel %vm1042_vm9, %v1029_v22, %v1031_v23  ;;  %v1227_v43 = vpop.permute.xlu2 %1226 }
 0x14d   :  { %5742 = vmatmul.msk.f32.gmra.mxu1 %vm135_vm5, %v5724_v8 }
 0x14e   :  { %5739 = vmatmul.msk.f32.gmra.mxu0 %vm135_vm5, %v5724_v8  ;;  %5749 = vmatmul.msk.f32.vlgmr.msra.gmra.mxu3 %vm135_vm5, %v5743_v13 }
 0x14f   :  { %5774 = vmatpush.msk.msra.mxu3 %vm142_vm4, %v854_v21  ;;  %v5823_v21 = vld [vmem:[%s8913_s2 + $0x70] sm:$0xff] }
 0x150   :  { %v1039_v31 = vpop.permute.xlu0 %1038 }
 0x151   :  { %v1047_v34 = vsel %vm1042_vm9, %v1037_v29, %v1039_v31 }
 0x152   :  { %v1035_v28 = vpop.permute.xlu1 %1034 }
 0x153   :  { %5758 = vmatmul.msk.f32.vlgmr.msrb.gmra.mxu2 %vm135_vm5, %v5743_v13  ;;  %v1045_v35 = vsel %vm1042_vm9, %v1033_v27, %v1035_v28  ;;  %v1046_v36 = vsel %vm1042_vm9, %v1035_v28, %v1037_v29  ;;  %v1233_v50 = vpop.permute.xlu2 %1232 }
 0x154   :  { %5785 = vmatpush.msk.msrb.mxu2 %vm142_vm4, %v1043_v24 }
 0x155   :  { %5755 = vmatmul.msk.f32.vlgmr.msrb.gmra.mxu1 %vm135_vm5, %v5743_v13 }
 0x156   :  { %5752 = vmatmul.msk.f32.vlgmr.msrb.gmra.mxu0 %vm135_vm5, %v5743_v13  ;;  %5750 = vmatmul.msk.f32.gmra.mxu3 %vm135_vm5, %v5744_v19 }
 0x157   :  { %5777 = vmatpush.msk.msrb.mxu0 %vm142_vm4, %v855_v25  ;;  %5780 = vmatpush.msk.msrb.mxu1 %vm142_vm4, %v856_v26 }
 0x158   :  { %v1223_v41 = vpop.permute.xlu0 %1222 }
 0x159   :  { %v1235_v45 = vsel %vm1234_vm10, %v1221_v37, %v1223_v41 }
 0x15a   :  { %v1041_v33 = vpop.permute.xlu1 %1040 }
 0x15b   :  { %5759 = vmatmul.msk.f32.gmra.mxu2 %vm135_vm5, %v5744_v19  ;;  %v1048_v40 = vsel %vm1042_vm9, %v1039_v31, %v1041_v33  ;;  %v1417_v60 = vpop.permute.xlu2 %1416  ;;  %v5824_v31 = vld [vmem:[%s8913_s2 + $0x78] sm:$0xff] }
 0x15d   :  { %5756 = vmatmul.msk.f32.gmra.mxu1 %vm135_vm5, %v5744_v19 }
 0x15e   :  { %5753 = vmatmul.msk.f32.gmra.mxu0 %vm135_vm5, %v5744_v19  ;;  %5761 = vmatmul.msk.f32.vlgmr.msrb.gmra.mxu3 %vm135_vm5, %v5743_v13 }
 0x15f   :  { %5788 = vmatpush.msk.msrb.mxu3 %vm142_vm4, %v1044_v30 }
 0x160   :  { %v1229_v48 = vpop.permute.xlu0 %1228 }
 0x161   :  { %v1238_v51 = vsel %vm1234_vm10, %v1227_v43, %v1229_v48 }
 0x162   :  { %v1225_v39 = vpop.permute.xlu1 %1224 }
 0x163   :  { %5772 = vmatmul.msk.f32.vlgmr.msra.gmra.mxu2 %vm135_vm5, %v5763_v32  ;;  %v1237_v44 = vsel %vm1234_vm10, %v1225_v39, %v1227_v43  ;;  %v1236_v46 = vsel %vm1234_vm10, %v1223_v41, %v1225_v39  ;;  %v1423_v5 = vpop.permute.xlu2 %1422  ;;  %v1793_v41 = vld [vmem:[%s8914_s3] sm:$0xff] }
 0x164   :  { %5797 = vmatpush.msk.msra.mxu2 %vm142_vm4, %v1047_v34 }
 0x165   :  { %5769 = vmatmul.msk.f32.vlgmr.msra.gmra.mxu1 %vm135_vm5, %v5763_v32 }
 0x166   :  { %5766 = vmatmul.msk.f32.vlgmr.msra.gmra.mxu0 %vm135_vm5, %v5763_v32  ;;  %5762 = vmatmul.msk.f32.gmra.mxu3 %vm135_vm5, %v5744_v19 }
 0x167   :  { %5791 = vmatpush.msk.msra.mxu0 %vm142_vm4, %v1045_v35  ;;  %5794 = vmatpush.msk.msra.mxu1 %vm142_vm4, %v1046_v36 }
 0x168   :  { %v1413_v53 = vpop.permute.xlu0 %1412 }
 0x16a   :  { %v1231_v47 = vpop.permute.xlu1 %1230 }
 0x16b   :  { %5773 = vmatmul.msk.f32.gmra.mxu2 %vm135_vm5, %v5764_v38  ;;  %v1239_v57 = vsel %vm1234_vm10, %v1229_v48, %v1231_v47  ;;  %v1240_v58 = vsel %vm1234_vm10, %v1231_v47, %v1233_v50  ;;  %v1607_v25 = vpop.permute.xlu2 %1606 }
 0x16d   :  { %5770 = vmatmul.msk.f32.gmra.mxu1 %vm135_vm5, %v5764_v38 }
 0x16e   :  { %5767 = vmatmul.msk.f32.gmra.mxu0 %vm135_vm5, %v5764_v38  ;;  %5775 = vmatmul.msk.f32.vlgmr.msra.gmra.mxu3 %vm135_vm5, %v5763_v32 }
 0x16f   :  { %5800 = vmatpush.msk.msra.mxu3 %vm142_vm4, %v1048_v40 }
 0x170   :  { %v1419_v1 = vpop.permute.xlu0 %1418 }
 0x171   :  { %v1429_v9 = vsel %vm1426_vm11, %v1417_v60, %v1419_v1 }
 0x172   :  { %v1415_v52 = vpop.permute.xlu1 %1414 }
 0x173   :  { %5786 = vmatmul.msk.f32.vlgmr.msrb.gmra.mxu2 %vm135_vm5, %v5783_v42  ;;  %v1427_v55 = vsel %vm1426_vm11, %v1413_v53, %v1415_v52  ;;  %v1428_v0 = vsel %vm1426_vm11, %v1415_v52, %v1417_v60  ;;  %v1613_v35 = vpop.permute.xlu2 %1612  ;;  %v5843_v52 = vld [vmem:[%s8913_s2 + $0x80] sm:$0xff]  ;;  %v5844_v60 = vld [vmem:[%s8913_s2 + $0x88] sm:$0xff] }
 0x174   :  { %5811 = vmatpush.msk.msrb.mxu2 %vm142_vm4, %v1237_v44  ;;  %v6663_v44 = vmov 0  }
 0x175   :  { %5781 = vmatmul.msk.f32.vlgmr.msrb.gmra.mxu1 %vm135_vm5, %v5763_v32  ;;  %6067 = vset.pattern.permute.xlu0 %v6663_v44 }
 0x176   :  { %5778 = vmatmul.msk.f32.vlgmr.msrb.gmra.mxu0 %vm135_vm5, %v5763_v32  ;;  %5776 = vmatmul.msk.f32.gmra.mxu3 %vm135_vm5, %v5764_v38 }
 0x177   :  { %5805 = vmatpush.msk.msrb.mxu0 %vm142_vm4, %v1235_v45  ;;  %5808 = vmatpush.msk.msrb.mxu1 %vm142_vm4, %v1236_v46 }
 0x178   :  { %v1425_v13 = vpop.permute.xlu0 %1424  ;;  %1797 = vperm.xlu0 %6067, %v1793_v41   ;;  %6066 = vset.pattern.permute.xlu2 %v6663_v44 }
 0x179   :  { %v1432_v18 = vsel %vm1426_vm11, %v1423_v5, %v1425_v13  ;;  %6348 = vset.pattern.permute.xlu1 %v6663_v44 }
 0x17a   :  { %v1421_v63 = vpop.permute.xlu1 %1420 }
 0x17b   :  { %5787 = vmatmul.msk.f32.gmra.mxu2 %vm135_vm5, %v5784_v49  ;;  %v1431_v7 = vsel %vm1426_vm11, %v1421_v63, %v1423_v5  ;;  %v1430_v10 = vsel %vm1426_vm11, %v1419_v1, %v1421_v63 }
 0x17d   :  { %5782 = vmatmul.msk.f32.gmra.mxu1 %vm135_vm5, %v5764_v38 }
 0x17e   :  { %5779 = vmatmul.msk.f32.gmra.mxu0 %vm135_vm5, %v5764_v38  ;;  %5789 = vmatmul.msk.f32.vlgmr.msrb.gmra.mxu3 %vm135_vm5, %v5783_v42 }
 0x17f   :  { %5814 = vmatpush.msk.msrb.mxu3 %vm142_vm4, %v1238_v51 }
 0x182   :  { %v7034_v54 = vpop.f32.mrf.mxu1  ;;  %v7037_v56 = vpop.f32.mrf.mxu0 }
 0x183   :  { %5798 = vmatmul.msk.f32.vlgmr.msra.gmra.mxu2 %vm135_vm5, %v5783_v42  ;;  %v1605_v11 = vpop.permute.xlu1 %1604  ;;  %v1609_v23 = vpop.permute.xlu0 %1608 }
 0x184   :  { %5825 = vmatpush.msk.msra.mxu2 %vm142_vm4, %v1427_v55  ;;  %v1619_v28 = vsel %vm1618_vm12, %v1605_v11, %v1607_v25  ;;  %v1620_v29 = vsel %vm1618_vm12, %v1607_v25, %v1609_v23 }
 0x185   :  { %5795 = vmatmul.msk.f32.vlgmr.msra.gmra.mxu1 %vm135_vm5, %v5783_v42 }
 0x186   :  { %5792 = vmatmul.msk.f32.vlgmr.msra.gmra.mxu0 %vm135_vm5, %v5783_v42  ;;  %5790 = vmatmul.msk.f32.gmra.mxu3 %vm135_vm5, %v5784_v49  ;;  %v7047_v59 = vpop.f32.mrf.mxu2 }
 0x187   :  { %5817 = vmatpush.msk.msra.mxu0 %vm142_vm4, %v1239_v57  ;;  %5820 = vmatpush.msk.msra.mxu1 %vm142_vm4, %v1240_v58 }
 0x18a   :  { %v7050_v61 = vpop.f32.mrf.mxu1 }
 0x18b   :  { %v7052_v62 = vpop.f32.mrf.mxu0  ;;  %5799 = vmatmul.msk.f32.gmra.mxu2 %vm135_vm5, %v5784_v49  ;;  %v1611_v20 = vpop.permute.xlu1 %1610 }
 0x18c   :  { %v1621_v26 = vsel %vm1618_vm12, %v1609_v23, %v1611_v20  ;;  %v1622_v36 = vsel %vm1618_vm12, %v1611_v20, %v1613_v35  ;;  %v1615_v39 = vpop.permute.xlu0 %1614 }
 0x18d   :  { %5796 = vmatmul.msk.f32.gmra.mxu1 %vm135_vm5, %v5784_v49  ;;  %v1623_v45 = vsel %vm1618_vm12, %v1613_v35, %v1615_v39 }
 0x18e   :  { %5793 = vmatmul.msk.f32.gmra.mxu0 %vm135_vm5, %v5784_v49  ;;  %5801 = vmatmul.msk.f32.vlgmr.msra.gmra.mxu3 %vm135_vm5, %v5783_v42  ;;  %v7059_v2 = vpop.f32.mrf.mxu2 }
 0x18f   :  { %5828 = vmatpush.msk.msra.mxu3 %vm142_vm4, %v1428_v0 }
 0x191   :  { %v7065_v4 = vpop.f32.mrf.mxu3 }
 0x192   :  { %v7067_v6 = vpop.f32.mrf.mxu1 }
 0x193   :  { %v7070_v8 = vpop.f32.mrf.mxu0  ;;  %5812 = vmatmul.msk.f32.vlgmr.msrb.gmra.mxu2 %vm135_vm5, %v5803_v3  ;;  %v1617_v42 = vpop.permute.xlu1 %1616 }
 0x194   :  { %5837 = vmatpush.msk.msrb.mxu2 %vm142_vm4, %v1431_v7  ;;  %v1624_v46 = vsel %vm1618_vm12, %v1615_v39, %v1617_v42 }
 0x195   :  { %5809 = vmatmul.msk.f32.vlgmr.msrb.gmra.mxu1 %vm135_vm5, %v5803_v3 }
 0x196   :  { %5806 = vmatmul.msk.f32.vlgmr.msrb.gmra.mxu0 %vm135_vm5, %v5803_v3  ;;  %5802 = vmatmul.msk.f32.gmra.mxu3 %vm135_vm5, %v5784_v49  ;;  %v7080_v12 = vpop.f32.mrf.mxu2 }
 0x197   :  { %5831 = vmatpush.msk.msrb.mxu0 %vm142_vm4, %v1429_v9  ;;  %5834 = vmatpush.msk.msrb.mxu1 %vm142_vm4, %v1430_v10  ;;  %v1794_v9 = vld [vmem:[%s8914_s3 + $0x8] sm:$0xff] }
 0x198   :  { %1802 = vperm.xlu2 %6066, %v1794_v9  }
 0x199   :  { %v7086_v15 = vpop.f32.mrf.mxu3 }
 0x19a   :  { %v7088_v16 = vpop.f32.mrf.mxu1 }
 0x19b   :  { %8933 = vst [vmem:[#allocation3_spill] sm:$0xff] %v7088_v16  ;;  %v7090_v17 = vpop.f32.mrf.mxu0  ;;  %5813 = vmatmul.msk.f32.gmra.mxu2 %vm135_vm5, %v5804_v14 }
 0x19d   :  { %5810 = vmatmul.msk.f32.gmra.mxu1 %vm135_vm5, %v5804_v14 }
 0x19e   :  { %5807 = vmatmul.msk.f32.gmra.mxu0 %vm135_vm5, %v5804_v14  ;;  %5815 = vmatmul.msk.f32.vlgmr.msrb.gmra.mxu3 %vm135_vm5, %v5803_v3  ;;  %v7097_v19 = vpop.f32.mrf.mxu2 }
 0x19f   :  { %5840 = vmatpush.msk.msrb.mxu3 %vm142_vm4, %v1432_v18 }
 0x1a1   :  { %v7103_v22 = vpop.f32.mrf.mxu3 }
 0x1a2   :  { %v7105_v24 = vpop.f32.mrf.mxu1 }
 0x1a3   :  { %v7108_v27 = vpop.f32.mrf.mxu0  ;;  %5826 = vmatmul.msk.f32.vlgmr.msra.gmra.mxu2 %vm135_vm5, %v5823_v21 }
 0x1a4   :  { %5851 = vmatpush.msk.msra.mxu2 %vm142_vm4, %v1621_v26 }
 0x1a5   :  { %5821 = vmatmul.msk.f32.vlgmr.msra.gmra.mxu1 %vm135_vm5, %v5803_v3 }
 0x1a6   :  { %5818 = vmatmul.msk.f32.vlgmr.msra.gmra.mxu0 %vm135_vm5, %v5803_v3  ;;  %5816 = vmatmul.msk.f32.gmra.mxu3 %vm135_vm5, %v5804_v14  ;;  %v7118_v30 = vpop.f32.mrf.mxu2 }
 0x1a7   :  { %5845 = vmatpush.msk.msra.mxu0 %vm142_vm4, %v1619_v28  ;;  %5848 = vmatpush.msk.msra.mxu1 %vm142_vm4, %v1620_v29 }
 0x1a9   :  { %v7124_v32 = vpop.f32.mrf.mxu3 }
 0x1aa   :  { %v7126_v33 = vpop.f32.mrf.mxu1 }
 0x1ab   :  { %v7128_v34 = vpop.f32.mrf.mxu0  ;;  %5827 = vmatmul.msk.f32.gmra.mxu2 %vm135_vm5, %v5824_v31 }
 0x1ad   :  { %5822 = vmatmul.msk.f32.gmra.mxu1 %vm135_vm5, %v5804_v14 }
 0x1ae   :  { %5819 = vmatmul.msk.f32.gmra.mxu0 %vm135_vm5, %v5804_v14  ;;  %5829 = vmatmul.msk.f32.vlgmr.msra.gmra.mxu3 %vm135_vm5, %v5823_v21  ;;  %v7135_v37 = vpop.f32.mrf.mxu2 }
 0x1af   :  { %5854 = vmatpush.msk.msra.mxu3 %vm142_vm4, %v1622_v36 }
 0x1b1   :  { %v7138_v38 = vpop.f32.mrf.mxu3 }
 0x1b2   :  { %v7140_v40 = vpop.f32.mrf.mxu1 }
 0x1b3   :  { %v7145_v43 = vpop.f32.mrf.mxu0  ;;  %5838 = vmatmul.msk.f32.vlgmr.msrb.gmra.mxu2 %vm135_vm5, %v5823_v21 }
 0x1b5   :  { %5835 = vmatmul.msk.f32.vlgmr.msrb.gmra.mxu1 %vm135_vm5, %v5823_v21 }
 0x1b6   :  { %5832 = vmatmul.msk.f32.vlgmr.msrb.gmra.mxu0 %vm135_vm5, %v5823_v21  ;;  %5830 = vmatmul.msk.f32.gmra.mxu3 %vm135_vm5, %v5824_v31  ;;  %v7154_v47 = vpop.f32.mrf.mxu2 }
 0x1b7   :  { %5857 = vmatpush.msk.msrb.mxu0 %vm142_vm4, %v1623_v45  ;;  %5860 = vmatpush.msk.msrb.mxu1 %vm142_vm4, %v1624_v46  ;;  %vm5671_vm4 = vcmask 1043456  }
 0x1b9   :  { %v7157_v48 = vpop.f32.mrf.mxu3 }
 0x1ba   :  { %8934 = vst [vmem:[#allocation4_spill] sm:$0xff] %v7157_v48  ;;  %v7159_v49 = vpop.f32.mrf.mxu1 }
 0x1bb   :  { %v7161_v50 = vpop.f32.mrf.mxu0  ;;  %5839 = vmatmul.msk.f32.gmra.mxu2 %vm135_vm5, %v5824_v31 }
 0x1bd   :  { %5836 = vmatmul.msk.f32.gmra.mxu1 %vm135_vm5, %v5824_v31 }
 0x1be   :  { %5833 = vmatmul.msk.f32.gmra.mxu0 %vm135_vm5, %v5824_v31  ;;  %5841 = vmatmul.msk.f32.vlgmr.msrb.gmra.mxu3 %vm135_vm5, %v5823_v21  ;;  %v7167_v51 = vpop.f32.mrf.mxu2 }
 0x1c1   :  { %v7172_v53 = vpop.f32.mrf.mxu3 }
 0x1c2   :  { %8935 = vst [vmem:[#allocation5_spill] sm:$0xff] %v7172_v53  ;;  %v7174_v55 = vpop.f32.mrf.mxu1 }
 0x1c3   :  { %8936 = vst [vmem:[#allocation6_spill] sm:$0xff] %v7174_v55  ;;  %v7176_v57 = vpop.f32.mrf.mxu0  ;;  %5852 = vmatmul.msk.f32.vlgmr.msra.gmra.mxu2 %vm135_vm5, %v5843_v52 }
 0x1c4   :  { %8937 = vst [vmem:[#allocation7_spill] sm:$0xff] %v7176_v57 }
 0x1c5   :  { %5849 = vmatmul.msk.f32.vlgmr.msra.gmra.mxu1 %vm135_vm5, %v5843_v52 }
 0x1c6   :  { %5846 = vmatmul.msk.f32.vlgmr.msra.gmra.mxu0 %vm135_vm5, %v5843_v52  ;;  %5842 = vmatmul.msk.f32.gmra.mxu3 %vm135_vm5, %v5824_v31  ;;  %v7182_v58 = vpop.f32.mrf.mxu2 }
 0x1c9   :  { %v7187_v63 = vpop.f32.mrf.mxu3 }
 0x1ca   :  { %8938 = vst [vmem:[#allocation8_spill] sm:$0xff] %v7187_v63  ;;  %v7189_v0 = vpop.f32.mrf.mxu1 }
 0x1cb   :  { %8939 = vst [vmem:[#allocation9_spill] sm:$0xff] %v7189_v0  ;;  %v7191_v1 = vpop.f32.mrf.mxu0  ;;  %5853 = vmatmul.msk.f32.gmra.mxu2 %vm135_vm5, %v5844_v60 }
 0x1cc   :  { %8940 = vst [vmem:[#allocation10_spill] sm:$0xff] %v7191_v1 }
 0x1cd   :  { %5850 = vmatmul.msk.f32.gmra.mxu1 %vm135_vm5, %v5844_v60 }
 0x1ce   :  { %5847 = vmatmul.msk.f32.gmra.mxu0 %vm135_vm5, %v5844_v60  ;;  %5855 = vmatmul.msk.f32.vlgmr.msra.gmra.mxu3 %vm135_vm5, %v5843_v52  ;;  %v7197_v3 = vpop.f32.mrf.mxu2 }
 0x1d1   :  { %v7199_v5 = vpop.f32.mrf.mxu3 }
 0x1d2   :  { %v7201_v7 = vpop.f32.mrf.mxu1 }
 0x1d3   :  { %8941 = vst [vmem:[#allocation11_spill] sm:$0xff] %v7201_v7  ;;  %v7206_v10 = vpop.f32.mrf.mxu0 }
 0x1d5   :  { %5861 = vmatmul.msk.f32.vlgmr.msrb.gmra.mxu1 %vm135_vm5, %v5843_v52 }
 0x1d6   :  { %5858 = vmatmul.msk.f32.vlgmr.msrb.gmra.mxu0 %vm135_vm5, %v5843_v52  ;;  %5856 = vmatmul.msk.f32.gmra.mxu3 %vm135_vm5, %v5844_v60  ;;  %v7211_v11 = vpop.f32.mrf.mxu2 }
 0x1d7   :  { %8942 = vst [vmem:[#allocation12_spill] sm:$0xff] %v7211_v11 }
 0x1d9   :  { %v7213_v13 = vpop.f32.mrf.mxu3 }
 0x1da   :  { %v7215_v14 = vpop.f32.mrf.mxu1 }
 0x1db   :  { %8943 = vst [vmem:[#allocation13_spill] sm:$0xff] %v7215_v14  ;;  %v7217_v18 = vpop.f32.mrf.mxu0 }
 0x1dd   :  { %5862 = vmatmul.msk.f32.gmra.mxu1 %vm135_vm5, %v5844_v60 }
 0x1de   :  { %5859 = vmatmul.msk.f32.gmra.mxu0 %vm135_vm5, %v5844_v60  ;;  %v7221_v20 = vpop.f32.mrf.mxu2 }
 0x1df   :  { %8944 = vst [vmem:[#allocation14_spill] sm:$0xff] %v7221_v20 }
 0x1e1   :  { %v7223_v21 = vpop.f32.mrf.mxu3 }
 0x1e2   :  { %8945 = vst [vmem:[#allocation15_spill] sm:$0xff] %v7223_v21  ;;  %v7225_v23 = vpop.f32.mrf.mxu1 }
 0x1e3   :  { %v892_v25 = vpop.f32.mrf.mxu0 }
 0x1e6   :  { %v7227_v26 = vpop.f32.mrf.mxu2 }
 0x1e9   :  { %v7229_v28 = vpop.f32.mrf.mxu3 }
 0x1ea   :  { %8946 = vst [vmem:[#allocation16_spill] sm:$0xff] %v7229_v28  ;;  %v7231_v29 = vpop.f32.mrf.mxu1 }
 0x1eb   :  { %v7233_v31 = vpop.f32.mrf.mxu0 }
 0x1ee   :  { %v7235_v35 = vpop.f32.mrf.mxu2 }
 0x1f1   :  { %v7237_v36 = vpop.f32.mrf.mxu3 }
 0x1f2   :  { %8947 = vst [vmem:[#allocation17_spill] sm:$0xff] %v7237_v36  ;;  %v7239_v39 = vpop.f32.mrf.mxu1 }
 0x1f3   :  { %8948 = vst [vmem:[#allocation18_spill] sm:$0xff] %v7239_v39  ;;  %v7241_v41 = vpop.f32.mrf.mxu0 }
 0x1f4   :  { %8949 = vst [vmem:[#allocation19_spill] sm:$0xff] %v7241_v41 }
 0x1f6   :  { %v1084_v42 = vpop.f32.mrf.mxu2 }
 0x1f9   :  { %v7243_v44 = vpop.f32.mrf.mxu3 }
 0x1fa   :  { %8950 = vst [vmem:[#allocation20_spill] sm:$0xff] %v7243_v44  ;;  %v7245_v45 = vpop.f32.mrf.mxu1 }
 0x1fb   :  { %8951 = vst [vmem:[#allocation21_spill] sm:$0xff] %v7245_v45  ;;  %v7247_v46 = vpop.f32.mrf.mxu0 }
 0x1fc   :  { %8952 = vst [vmem:[#allocation22_spill] sm:$0xff] %v7247_v46 }
 0x1fe   :  { %v7249_v52 = vpop.f32.mrf.mxu2 }
 0x201   :  { %v7251_v60 = vpop.f32.mrf.mxu3 }
 0x202   :  { %v7253_v9 = vpop.f32.mrf.mxu1 }
 0x203   :  { %8953 = vst [vmem:[#allocation23_spill] sm:$0xff] %v7253_v9  ;;  %v7255_v11 = vpop.f32.mrf.mxu0 }
 0x206   :  { %v7257_v36 = vpop.f32.mrf.mxu2 }
 0x207   :  { %8954 = vst [vmem:[#allocation24_spill] sm:$0xff] %v7257_v36 }
 0x209   :  { %v1110_v39 = vpop.f32.mrf.mxu3 }
 0x20a   :  { %v7259_v21 = vpop.f32.mrf.mxu1 }
 0x20b   :  { %8955 = vst [vmem:[#allocation25_spill] sm:$0xff] %v7259_v21  ;;  %v7261_v41 = vpop.f32.mrf.mxu0 }
 0x20e   :  { %v7263_v44 = vpop.f32.mrf.mxu2 }
 0x20f   :  { %8956 = vst [vmem:[#allocation26_spill] sm:$0xff] %v7263_v44 }
 0x211   :  { %v7265_v45 = vpop.f32.mrf.mxu3 }
 0x212   :  { %8957 = vst [vmem:[#allocation27_spill] sm:$0xff] %v7265_v45  ;;  %v7267_v46 = vpop.f32.mrf.mxu1 }
 0x213   :  { %v1276_v20 = vpop.f32.mrf.mxu0 }
 0x216   :  { %v7269_v28 = vpop.f32.mrf.mxu2 }
 0x219   :  { %v7271_v14 = vpop.f32.mrf.mxu3 }
 0x21a   :  { %8958 = vst [vmem:[#allocation28_spill] sm:$0xff] %v7271_v14  ;;  %v1302_v9 = vpop.f32.mrf.mxu1 }
 0x21b   :  { %v1279_v7 = vpop.f32.mrf.mxu0 }
 0x21e   :  { %v7273_v1 = vpop.f32.mrf.mxu2 }
 0x21f   :  { %8959 = vst [vmem:[#allocation29_spill] sm:$0xff] %v7273_v1 }
 0x221   :  { %v7275_v36 = vpop.f32.mrf.mxu3 }
 0x222   :  { %8960 = vst [vmem:[#allocation30_spill] sm:$0xff] %v7275_v36  ;;  %v7277_v21 = vpop.f32.mrf.mxu1  ;;  %v329_v36 = vadd.f32 %v7080_v12, %v7037_v56  ;;  %v352_v12 = vadd.f32 %v7103_v22, %v7034_v54 }
 0x223   :  { %8961 = vst [vmem:[#allocation31_spill] sm:$0xff] %v7277_v21  ;;  %v7279_v0 = vpop.f32.mrf.mxu0 }
 0x224   :  { %8962 = vst [vmem:[#allocation32_spill] sm:$0xff] %v7279_v0  ;;  %v629_v0 = vadd.f32 %v7145_v43, %v329_v36 }
 0x226   :  { %v1468_v44 = vpop.f32.mrf.mxu2 }
 0x229   :  { %v7281_v63 = vpop.f32.mrf.mxu3 }
 0x22a   :  { %8963 = vst [vmem:[#allocation33_spill] sm:$0xff] %v7281_v63  ;;  %v7283_v45 = vpop.f32.mrf.mxu1  ;;  %v821_v63 = vadd.f32 %v7182_v58, %v629_v0  ;;  %v375_v58 = vadd.f32 %v7108_v27, %v7047_v59 }
 0x22b   :  { %8964 = vst [vmem:[#allocation34_spill] sm:$0xff] %v7283_v45  ;;  %v7285_v57 = vpop.f32.mrf.mxu0 }
 0x22c   :  { %8965 = vst [vmem:[#allocation35_spill] sm:$0xff] %v7285_v57  ;;  %v1013_v1 = vadd.f32 %v892_v25, %v821_v63 }
 0x22e   :  { %v1471_v55 = vpop.f32.mrf.mxu2 }
 0x231   :  { %v7287_v53 = vpop.f32.mrf.mxu3 }
 0x232   :  { %8966 = vst [vmem:[#allocation36_spill] sm:$0xff] %v7287_v53  ;;  %v7289_v14 = vpop.f32.mrf.mxu1  ;;  %v1205_v53 = vadd.f32 %v1084_v42, %v1013_v1  ;;  %v631_v1 = vadd.f32 %v7154_v47, %v375_v58  ;;  %v8972_v58 = vld [vmem:[#allocation3_spill] sm:$0xff] }
 0x233   :  { %8967 = vst [vmem:[#allocation37_spill] sm:$0xff] %v7289_v14  ;;  %v7291_v48 = vpop.f32.mrf.mxu0  ;;  %v355_v14 = vadd.f32 %v7124_v32, %v7050_v61  ;;  %v378_v61 = vadd.f32 %v7128_v34, %v7059_v2  ;;  %v630_v32 = vadd.f32 %v7140_v40, %v352_v12  ;;  %v7326_v2 = vpop.permute.xlu0 %1797  ;;  %v7331_v34 = vld [vmem:[%s8915_s1] sm:$0x3f] }
 0x234   :  { %8968 = vst [vmem:[#allocation38_spill] sm:$0xff] %v7291_v48  ;;  %v332_v48 = vadd.f32 %v7097_v19, %v7052_v62  ;;  %v1397_v63 = vadd.f32 %v1276_v20, %v1205_v53  ;;  %v823_v40 = vadd.f32 %v7206_v10, %v631_v1  ;;  %v398_v10 = vadd.f32 %v7105_v24, %v7065_v4 }
 0x235   :  { %v636_v43 = vadd.f32 %v7159_v49, %v355_v14  ;;  %v637_v59 = vadd.f32 %v7167_v51, %v378_v61  ;;  %v822_v27 = vadd.f32 %v7199_v5, %v630_v32  ;;  %v8976_v32 = vld [vmem:[#allocation6_spill] sm:$0xff] }
 0x236   :  { %v7295_v21 = vpop.f32.mrf.mxu2  ;;  %v635_v0 = vadd.f32 %v7161_v50, %v332_v48  ;;  %v1589_v22 = vadd.f32 %v1468_v44, %v1397_v63  ;;  %v401_v44 = vadd.f32 %v7126_v33, %v7086_v15  ;;  %v444_v15 = vadd.f32 %v7138_v38, %v7067_v6  ;;  %v8970_v33 = vld [vmem:[#allocation29_spill] sm:$0xff] }
 0x237   :  { %v828_v62 = vadd.f32 %v7213_v13, %v636_v43  ;;  %v1014_v51 = vadd.f32 %v7225_v23, %v822_v27  ;;  %v1015_v13 = vadd.f32 %v7227_v26, %v823_v40  ;;  %v421_v23 = vadd.f32 %v7118_v30, %v7070_v8 }
 0x238   :  { %v827_v54 = vadd.f32 %v7197_v3, %v635_v0  ;;  %v829_v3 = vadd.f32 %v7217_v18, %v637_v59  ;;  %v8973_v0 = vld [vmem:[#allocation4_spill] sm:$0xff] }
 0x239   :  { %v1494_v16 = vpop.f32.mrf.mxu3  ;;  %v1020_v48 = vadd.f32 %v7231_v29, %v828_v62  ;;  %v7341_v29 = vperm.slane %v7331_v34, 0  ;;  %v1206_v18 = vadd.f32 %v7251_v60, %v1014_v51  ;;  %v1207_v26 = vadd.f32 %v7255_v11, %v1015_v13  ;;  %v7360_v11 = vpop.permute.xlu2 %1802  ;;  %v8978_v59 = vld [vmem:[#allocation8_spill] sm:$0xff]  ;;  %v8981_v13 = vld [vmem:[#allocation10_spill] sm:$0xff] }
 0x23a   :  { %v7299_v45 = vpop.f32.mrf.mxu1  ;;  %v1019_v47 = vadd.f32 %v7233_v31, %v827_v54  ;;  %v1021_v31 = vadd.f32 %v7235_v35, %v829_v3  ;;  %v424_v35 = vadd.f32 %v7135_v37, %v7090_v17  ;;  %v447_v17 = vadd.f32 %v8973_v0, %v8972_v58  ;;  %v8974_v37 = vld [vmem:[#allocation5_spill] sm:$0xff]  ;;  %v8977_v54 = vld [vmem:[#allocation7_spill] sm:$0xff]  ;;  %v8992_v0 = vld [vmem:[#allocation22_spill] sm:$0xff] }
 0x23b   :  { %v7301_v57 = vpop.f32.mrf.mxu0  ;;  %v1212_v5 = vadd.f32 %v1110_v39, %v1020_v48  ;;  %8969 = vst [vmem:[#allocation39_spill] sm:$0xff] %v7341_v29  ;;  %v1398_v12 = vadd.f32 %v7267_v46, %v1206_v18  ;;  %v1399_v60 = vadd.f32 %v7269_v28, %v1207_v26  ;;  %v8971_v46 = vld [vmem:[#allocation36_spill] sm:$0xff]  ;;  %v632_v28 = vadd.f32 %v8974_v37, %v398_v10  ;;  %v8993_v37 = vld [vmem:[#allocation25_spill] sm:$0xff] }
 0x23c   :  { %v1211_v14 = vadd.f32 %v7249_v52, %v1019_v47  ;;  %v1213_v52 = vadd.f32 %v7261_v41, %v1021_v31  ;;  %v634_v62 = vadd.f32 %v8976_v32, %v444_v15  ;;  %v638_v27 = vadd.f32 %v8978_v59, %v401_v44  ;;  %v8979_v47 = vld [vmem:[#allocation9_spill] sm:$0xff]  ;;  %v8984_v18 = vld [vmem:[#allocation16_spill] sm:$0xff] }
 0x23d   :  { %v1404_v36 = vadd.f32 %v1302_v9, %v1212_v5  ;;  %v7379_v5 = vperm.slane %v7331_v34, 1 }
 0x23e   :  { %v7307_v56 = vpop.f32.mrf.mxu2  ;;  %v1403_v39 = vadd.f32 %v1279_v7, %v1211_v14  ;;  %v1405_v41 = vadd.f32 %v8970_v33, %v1213_v52  ;;  %v8986_v52 = vld [vmem:[#allocation20_spill] sm:$0xff] }
 0x23f   :  { %v1596_v4 = vadd.f32 %v1494_v16, %v1404_v36  ;;  %v1590_v16 = vadd.f32 %v8971_v46, %v1398_v12  ;;  %8980 = vst [vmem:[#allocation29_spill] sm:$0xff] %v7379_v5  ;;  %v7396_v46 = vperm.slane %v7331_v34, 2 }
 0x240   :  { %v1595_v8 = vadd.f32 %v1471_v55, %v1403_v39  ;;  %v8975_v55 = vld [vmem:[#allocation38_spill] sm:$0xff]  ;;  %v1597_v6 = vadd.f32 %v7301_v57, %v1405_v41  ;;  %v639_v57 = vadd.f32 %v8981_v13, %v424_v35  ;;  %v9002_v13 = vld [vmem:[#allocation24_spill] sm:$0xff] }
 0x241   :  { %v7319_v19 = vpop.f32.mrf.mxu3  ;;  %v1591_v63 = vadd.f32 %v8975_v55, %v1399_v60  ;;  %8989 = vst [vmem:[#allocation36_spill] sm:$0xff] %v7396_v46  ;;  %v8994_v55 = vld [vmem:[#allocation18_spill] sm:$0xff] }
 0x242   :  { %v1683_v49 = vpop.f32.mrf.mxu1 }
 0x243   :  { %v1660_v50 = vpop.f32.mrf.mxu0  ;;  %v1782_v38 = vadd.f32 %v1683_v49, %v1590_v16  ;;  %v8982_v49 = vld [vmem:[#allocation11_spill] sm:$0xff]  ;;  %v8990_v16 = vld [vmem:[#allocation12_spill] sm:$0xff] }
 0x244   :  { %v1781_v53 = vadd.f32 %v1660_v50, %v1589_v22  ;;  %v633_v22 = vadd.f32 %v8977_v54, %v421_v23  ;;  %v824_v14 = vadd.f32 %v8982_v49, %v632_v28  ;;  %v8997_v54 = vld [vmem:[#allocation26_spill] sm:$0xff]  ;;  %v9003_v49 = vld [vmem:[#allocation35_spill] sm:$0xff] }
 0x245   :  { %v1806_v39 = vadd.f32 %v7326_v2, %v1782_v38  ;;  %v8996_v38 = vld [vmem:[#allocation19_spill] sm:$0xff] }
 0x246   :  { %v1706_v20 = vpop.f32.mrf.mxu2  ;;  %v1805_v25 = vadd.f32 %v7326_v2, %v1781_v53  ;;  %v640_v53 = vadd.f32 %v8979_v47, %v447_v17  ;;  %v9000_v47 = vld [vmem:[#allocation27_spill] sm:$0xff] }
 0x247   :  { %v1783_v48 = vadd.f32 %v1706_v20, %v1591_v63 }
 0x248   :  { %v1817_v42 = vmax.f32 %v1805_v25, 0.0  ;;  %v8983_v25 = vld [vmem:[#allocation13_spill] sm:$0xff]  ;;  %v832_v36 = vadd.f32 %v8984_v18, %v640_v53  ;;  %v9005_v18 = vld [vmem:[#allocation31_spill] sm:$0xff] }
 0x249   :  { %v7354_v24 = vpop.f32.mrf.mxu3  ;;  %v830_v10 = vadd.f32 %v8983_v25, %v638_v27 }
 0x24a   :  { %v1686_v30 = vpop.f32.mrf.mxu1  ;;  %v1842_v7 = vmul.f32 %v7341_v29, %v1817_v42  ;;  %v8985_v42 = vld [vmem:[#allocation14_spill] sm:$0xff] }
 0x24b   :  { %v1663_v9 = vpop.f32.mrf.mxu0  ;;  %v1788_v43 = vadd.f32 %v1686_v30, %v1596_v4  ;;  %v831_v44 = vadd.f32 %v8985_v42, %v639_v57  ;;  %v1022_v12 = vadd.f32 %v8986_v52, %v830_v10  ;;  %v1807_v4 = vadd.f32 %v7326_v2, %v1783_v48  ;;  %v9004_v10 = vld [vmem:[#allocation30_spill] sm:$0xff]  ;;  %v9006_v42 = vld [vmem:[#allocation32_spill] sm:$0xff] }
 0x24c   :  { %v1787_v61 = vadd.f32 %v1663_v9, %v1595_v8  ;;  %1866 = vrot.lane.b32.xlu1 %v1842_v7, %s6653_s11  ;;  %v8987_v8 = vld [vmem:[#allocation15_spill] sm:$0xff]  ;;  %v8988_v7 = vld [vmem:[#allocation21_spill] sm:$0xff]  ;;  %v825_v9 = vadd.f32 %v8990_v16, %v633_v22 }
 0x24d   :  { %v1812_v1 = vadd.f32 %v7360_v11, %v1788_v43  ;;  %v826_v30 = vadd.f32 %v8987_v8, %v634_v62  ;;  %v1024_v15 = vadd.f32 %v8988_v7, %v832_v36  ;;  %v8991_v43 = vld [vmem:[#allocation17_spill] sm:$0xff]  ;;  %v1023_v17 = vadd.f32 %v8992_v0, %v831_v44 }
 0x24e   :  { %v1709_v50 = vpop.f32.mrf.mxu2  ;;  %v1811_v40 = vadd.f32 %v7360_v11, %v1787_v61  ;;  %v1016_v58 = vadd.f32 %v8991_v43, %v824_v14  ;;  %v1214_v28 = vadd.f32 %v8993_v37, %v1022_v12  ;;  %v8995_v61 = vld [vmem:[#allocation28_spill] sm:$0xff]  ;;  %v8998_v22 = vld [vmem:[#allocation33_spill] sm:$0xff]  ;;  %v1819_v48 = vmax.f32 %v1807_v4, 0.0 }
 0x24f   :  { %v1789_v3 = vadd.f32 %v1709_v50, %v1597_v6  ;;  %v1824_v51 = vmax.f32 %v1812_v1, 0.0  ;;  %v1018_v63 = vadd.f32 %v8994_v55, %v826_v30  ;;  %v1216_v32 = vadd.f32 %v8995_v61, %v1024_v15  ;;  %v8999_v50 = vld [vmem:[#allocation23_spill] sm:$0xff]  ;;  %v9007_v8 = vld [vmem:[#allocation37_spill] sm:$0xff] }
 0x250   :  { %v1823_v31 = vmax.f32 %v1811_v40, 0.0  ;;  %v1818_v6 = vmax.f32 %v1806_v39, 0.0  ;;  %v1017_v1 = vadd.f32 %v8996_v38, %v825_v9  ;;  %v1215_v59 = vadd.f32 %v8997_v54, %v1023_v17 }
 0x251   :  { %v1813_v20 = vadd.f32 %v7360_v11, %v1789_v3  ;;  %v1729_v23 = vpop.f32.mrf.mxu3  ;;  %v1849_v26 = vmul.f32 %v7379_v5, %v1824_v51  ;;  %v1406_v27 = vadd.f32 %v8998_v22, %v1214_v28  ;;  %v1208_v40 = vadd.f32 %v8999_v50, %v1016_v58  ;;  %v9001_v3 = vld [vmem:[#allocation34_spill] sm:$0xff] }
 0x252   :  { %v1775_v35 = vpop.f32.mrf.mxu1  ;;  %v1848_v60 = vmul.f32 %v7341_v29, %v1823_v31  ;;  %v1210_v53 = vadd.f32 %v9000_v47, %v1018_v63  ;;  %v1408_v51 = vadd.f32 %v9001_v3, %v1216_v32  ;;  %v1209_v57 = vadd.f32 %v9002_v13, %v1017_v1 }
 0x253   :  { %v1825_v33 = vmax.f32 %v1813_v20, 0.0  ;;  %v1752_v41 = vpop.f32.mrf.mxu0  ;;  %1880 = vrot.lane.b32.xlu2 %v1849_v26, %s6653_s11  ;;  %v1407_v14 = vadd.f32 %v9003_v49, %v1215_v59  ;;  %v1598_v25 = vadd.f32 %v7299_v45, %v1406_v27  ;;  %v1400_v31 = vadd.f32 %v9004_v10, %v1208_v40 }
 0x254   :  { %1878 = vrot.lane.b32.xlu1 %v1848_v60, %s6653_s11  ;;  %v1402_v36 = vadd.f32 %v9005_v18, %v1210_v53  ;;  %v1600_v20 = vadd.f32 %v7354_v24, %v1408_v51  ;;  %v1843_v39 = vmul.f32 %v7379_v5, %v1818_v6  ;;  %v1401_v44 = vadd.f32 %v9006_v42, %v1209_v57 }
 0x255   :  { %v1850_v62 = vmul.f32 %v7396_v46, %v1825_v33  ;;  %v1599_v52 = vadd.f32 %v7307_v56, %v1407_v14  ;;  %v1844_v60 = vmul.f32 %v7396_v46, %v1819_v48  ;;  %v1592_v30 = vadd.f32 %v9007_v8, %v1400_v31 }
 0x256   :  { %v1593_v15 = vadd.f32 %v7295_v21, %v1401_v44  ;;  %v1594_v24 = vadd.f32 %v7319_v19, %v1402_v36  ;;  %v7432_v28 = vperm.slane %v7331_v34, 3  ;;  %v7435_v21 = vperm.slane %v7331_v34, 5 }
 0x257   :  { %1882 = vrot.lane.b32.xlu0 %v1850_v62, %s6653_s11  ;;  %v1784_v56 = vadd.f32 %v1729_v23, %v1592_v30  ;;  %v7438_v55 = vperm.slane %v7331_v34, 4 }
 0x258   :  { %v1785_v43 = vadd.f32 %v1752_v41, %v1593_v15  ;;  %v1786_v58 = vadd.f32 %v1775_v35, %v1594_v24  ;;  %9008 = vst [vmem:[#allocation3_spill] sm:$0xff] %v7432_v28 }
 0x259   :  { %v1732_v26 = vpop.f32.mrf.mxu3  ;;  %9009 = vst [vmem:[#allocation4_spill] sm:$0xff] %v7435_v21  ;;  %v1808_v23 = vadd.f32 %v7326_v2, %v1784_v56 }
 0x25a   :  { %v1790_v12 = vadd.f32 %v1732_v26, %v1598_v25  ;;  %v1778_v4 = vpop.f32.mrf.mxu1  ;;  %9010 = vst [vmem:[#allocation5_spill] sm:$0xff] %v7438_v55  ;;  %v1809_v41 = vadd.f32 %v7326_v2, %v1785_v43 }
 0x25b   :  { %v1755_v45 = vpop.f32.mrf.mxu0  ;;  %v1792_v7 = vadd.f32 %v1778_v4, %v1600_v20  ;;  %1868 = vrot.lane.b32.xlu2 %v1843_v39, %s6653_s11  ;;  %v1820_v34 = vmax.f32 %v1808_v23, 0.0 }
 0x25c   :  { %v1814_v33 = vadd.f32 %v7360_v11, %v1790_v12  ;;  %v1791_v16 = vadd.f32 %v1755_v45, %v1599_v52  ;;  %1870 = vrot.lane.b32.xlu1 %v1844_v60, %s6653_s11  ;;  %v1821_v32 = vmax.f32 %v1809_v41, 0.0 }
 0x25d   :  { %v1816_v9 = vadd.f32 %v7360_v11, %v1792_v7  ;;  %v1845_v6 = vmul.f32 %v7432_v28, %v1820_v34 }
 0x25e   :  { %v1826_v0 = vmax.f32 %v1814_v33, 0.0  ;;  %v1815_v17 = vadd.f32 %v7360_v11, %v1791_v16  ;;  %v1810_v11 = vadd.f32 %v7326_v2, %v1786_v58  ;;  %v1846_v38 = vmul.f32 %v7438_v55, %v1821_v32 }
 0x25f   :  { %v1828_v37 = vmax.f32 %v1816_v9, 0.0 }
 0x260   :  { %v1827_v19 = vmax.f32 %v1815_v17, 0.0  ;;  %v1851_v63 = vmul.f32 %v7432_v28, %v1826_v0  ;;  %v1822_v62 = vmax.f32 %v1810_v11, 0.0 }
 0x261   :  { %v1853_v35 = vmul.f32 %v7435_v21, %v1828_v37 }
 0x262   :  { %v1852_v61 = vmul.f32 %v7438_v55, %v1827_v19  ;;  %v1847_v1 = vmul.f32 %v7435_v21, %v1822_v62  ;;  %v7630_v62 = vld [vmem:[%s8916_s4 + $0x18] sm:$0xff] }
 0x263   :  { %1884 = vrot.lane.b32.xlu2 %v1851_v63, %s6653_s11 }
 0x264   :  { %1886 = vrot.lane.b32.xlu0 %v1852_v61, %s6653_s11  ;;  %1888 = vrot.lane.b32.xlu1 %v1853_v35, %s6653_s11  ;;  %v7616_v35 = vld [vmem:[%s8916_s4 + $0x10] sm:$0xff] }
 0x26b   :  { %1872 = vrot.lane.b32.xlu2 %v1845_v6, %s6653_s11 }
 0x26c   :  { %1874 = vrot.lane.b32.xlu0 %v1846_v38, %s6653_s11  ;;  %1876 = vrot.lane.b32.xlu1 %v1847_v1, %s6653_s11 }
 0x2ad   :  { %v1881_v2 = vpop.permute.xlu2 %1880 }
 0x2b5   :  { %v1869_v59 = vpop.permute.xlu2 %1868 }
 0x2bd   :  { %v1885_v40 = vpop.permute.xlu2 %1884 }
 0x2be   :  { %v1867_v54 = vpop.permute.xlu1 %1866 }
 0x2bf   :  { %1915 = vst.msk [vmem:[#allocation2] sm:$0xff] %vm1914_vm13, %v1867_v54  ;;  %v7457_v22 = vsel %vm73_vm1, %v1867_v54, %v1869_v59 }
 0x2c5   :  { %v1873_v25 = vpop.permute.xlu2 %1872 }
 0x2c6   :  { %v1879_v27 = vpop.permute.xlu1 %1878  ;;  %v7459_v48 = vld [vmem:[#allocation2] sm:$0xff] }
 0x2c7   :  { %1922 = vst.msk [vmem:[#allocation2 + $0x38] sm:$0xff] %vm1914_vm13, %v1879_v27  ;;  %v7464_v50 = vpack.i.bf16 %v7457_v22, %v7459_v48  ;;  %v7469_v53 = vsel %vm73_vm1, %v1879_v27, %v1881_v2 }
 0x2c9   :  { %6074 = vrot.lane.b32.xlu0 %v7464_v50, %s6655_s0  ;;  %v1883_v47 = vpop.permute.xlu0 %1882 }
 0x2ca   :  { %v7474_v13 = vsel %vm73_vm1, %v1881_v2, %v1883_v47  ;;  %v7495_v36 = vsel %vm73_vm1, %v1883_v47, %v1885_v40 }
 0x2cb   :  { %v7541_v7 = vpack.i.bf16 %v7495_v36, %v7474_v13 }
 0x2ce   :  { %v1871_v3 = vpop.permute.xlu1 %1870  ;;  %v7471_v51 = vld [vmem:[#allocation2 + $0x38] sm:$0xff] }
 0x2cf   :  { %v7477_v57 = vsel %vm73_vm1, %v1869_v59, %v1871_v3  ;;  %v7481_v49 = vpack.i.bf16 %v7469_v53, %v7471_v51  ;;  %v7492_v10 = vsel %vm73_vm1, %v1871_v3, %v1873_v25 }
 0x2d0   :  { %v7485_v14 = vpack.i.bf16 %v7477_v57, %v7474_v13  ;;  %v7506_v39 = vpack.i.bf16 %v7492_v10, %v7495_v36  ;;  %v6143_v15 = vpack.i.bf16 %v7492_v10, %v7477_v57 }
 0x2d1   :  { %6069 = vrot.lane.b32.xlu2 %v7481_v49, %s6655_s0 }
 0x2d2   :  { %6079 = vrot.lane.b32.xlu1 %v7485_v14, %s6655_s0 }
 0x2d6   :  { %v1889_v31 = vpop.permute.xlu1 %1888  ;;  %v1887_v18 = vpop.permute.xlu0 %1886 }
 0x2d7   :  { %1928 = vst.msk [vmem:[#allocation2 + $0x68] sm:$0xff] %vm73_vm1, %v1889_v31  ;;  %v7499_v20 = vsel %vm73_vm1, %v1885_v40, %v1887_v18  ;;  %v7502_v26 = vsel %vm73_vm1, %v1887_v18, %v1889_v31 }
 0x2d8   :  { %v7510_v42 = vpack.i.bf16 %v7502_v26, %v7499_v20 }
 0x2da   :  { %6089 = vrot.lane.b32.xlu1 %v7506_v39, %s6655_s0  ;;  %6094 = vrot.lane.b32.xlu2 %v7510_v42, %s6655_s0 }
 0x2de   :  { %v1877_v44 = vpop.permute.xlu1 %1876  ;;  %v1875_v52 = vpop.permute.xlu0 %1874  ;;  %v1956_v30 = vld [vmem:[#allocation2 + $0x68] sm:$0xff] }
 0x2df   :  { %1921 = vst.msk [vmem:[#allocation2 + $0x30] sm:$0xff] %vm73_vm1, %v1877_v44  ;;  %v7518_v12 = vsel %vm73_vm1, %v1873_v25, %v1875_v52  ;;  %v7521_v4 = vsel %vm73_vm1, %v1875_v52, %v1877_v44 }
 0x2e0   :  { %v7525_v60 = vpack.i.bf16 %v7521_v4, %v7518_v12  ;;  %v7564_v24 = vpack.i.bf16 %v7518_v12, %v7499_v20  ;;  %v7574_v33 = vpack.i.bf16 %v7521_v4, %v7502_v26 }
 0x2e2   :  { %6109 = vrot.lane.b32.xlu1 %v7464_v50, %s6656_s12  ;;  %6084 = vrot.lane.b32.xlu0 %v7525_v60, %s6655_s0 }
 0x2e6   :  { %v1949_v8 = vld [vmem:[#allocation2 + $0x30] sm:$0xff] }
 0x2e7   :  { %v7531_v45 = vpack.i.bf16 %v1949_v8, %v1956_v30 }
 0x2e9   :  { %6099 = vrot.lane.b32.xlu2 %v7531_v45, %s6655_s0 }
 0x2ea   :  { %6119 = vrot.lane.b32.xlu1 %v7525_v60, %s6656_s12  ;;  %6104 = vrot.lane.b32.xlu0 %v7481_v49, %s6656_s12 }
 0x2f1   :  { %6114 = vrot.lane.b32.xlu2 %v7485_v14, %s6656_s12 }
 0x2f2   :  { %6139 = vrot.lane.b32.xlu1 %v7541_v7, %s6657_s13  ;;  %6129 = vrot.lane.b32.xlu0 %v7510_v42, %s6656_s12 }
 0x2f9   :  { %6124 = vrot.lane.b32.xlu2 %v7506_v39, %s6656_s12 }
 0x2fa   :  { %6154 = vrot.lane.b32.xlu1 %v7464_v50, %s6657_s13  ;;  %6134 = vrot.lane.b32.xlu0 %v7531_v45, %s6656_s12 }
 0x301   :  { %6144 = vrot.lane.b32.xlu2 %v6143_v15, %s6657_s13 }
 0x302   :  { %6169 = vrot.lane.b32.xlu1 %v7464_v50, %s6658_s14  ;;  %6149 = vrot.lane.b32.xlu0 %v7481_v49, %s6657_s13 }
 0x309   :  { %6159 = vrot.lane.b32.xlu2 %v7564_v24, %s6657_s13 }
 0x30a   :  { %6184 = vrot.lane.b32.xlu1 %v7485_v14, %s6658_s14  ;;  %6164 = vrot.lane.b32.xlu0 %v7481_v49, %s6658_s14 }
 0x311   :  { %6174 = vrot.lane.b32.xlu2 %v7574_v33, %s6657_s13 }
 0x312   :  { %6194 = vrot.lane.b32.xlu1 %v7506_v39, %s6658_s14  ;;  %6179 = vrot.lane.b32.xlu0 %v7531_v45, %s6657_s13 }
 0x319   :  { %6199 = vrot.lane.b32.xlu2 %v7510_v42, %s6658_s14 }
 0x31a   :  { %6214 = vrot.lane.b32.xlu1 %v6143_v15, %s6659_s15  ;;  %6189 = vrot.lane.b32.xlu0 %v7525_v60, %s6658_s14 }
 0x321   :  { %6204 = vrot.lane.b32.xlu2 %v7531_v45, %s6658_s14 }
 0x322   :  { %6229 = vrot.lane.b32.xlu1 %v7564_v24, %s6659_s15  ;;  %6209 = vrot.lane.b32.xlu0 %v7541_v7, %s6659_s15 }
 0x329   :  { %6219 = vrot.lane.b32.xlu2 %v7481_v49, %s6659_s15 }
 0x32a   :  { %6244 = vrot.lane.b32.xlu1 %v7574_v33, %s6659_s15  ;;  %6224 = vrot.lane.b32.xlu0 %v7464_v50, %s6659_s15 }
 0x32b   :  { %v6070_v16 = vpop.permute.xlu2 %6069 }
 0x32c   :  { %v6072_v56 = vunpack.i.h.bf16 %v6070_v16  ;;  %v6071_v9 = vunpack.i.l.bf16 %v6070_v16 }
 0x32e   :  { %v2008_v43 = vsel %vm128_vm3, %v6071_v9, %v6072_v56 }
 0x32f   :  { %2047 = vmatpush.msrb.mxu2 %v2008_v43 }
 0x331   :  { %6234 = vrot.lane.b32.xlu2 %v7481_v49, %s6660_s16 }
 0x332   :  { %6269 = vrot.lane.b32.xlu1 %v7510_v42, %s6660_s16  ;;  %6239 = vrot.lane.b32.xlu0 %v7464_v50, %s6660_s16 }
 0x334   :  { %v6095_v58 = vpop.permute.xlu2 %6094 }
 0x335   :  { %v6097_v0 = vunpack.i.h.bf16 %v6095_v58  ;;  %v6096_v17 = vunpack.i.l.bf16 %v6095_v58 }
 0x337   :  { %v2012_v41 = vsel %vm128_vm3, %v6096_v17, %v6097_v0 }
 0x339   :  { %6249 = vrot.lane.b32.xlu2 %v7531_v45, %s6659_s15 }
 0x33a   :  { %6274 = vrot.lane.b32.xlu1 %v7531_v45, %s6660_s16  ;;  %6254 = vrot.lane.b32.xlu0 %v7485_v14, %s6660_s16 }
 0x33b   :  { %v6075_v37 = vpop.permute.xlu0 %6074 }
 0x33c   :  { %v6077_v19 = vunpack.i.h.bf16 %v6075_v37  ;;  %v6076_v23 = vunpack.i.l.bf16 %v6075_v37 }
 0x33e   :  { %v2002_v63 = vsel %vm128_vm3, %v6076_v23, %v6077_v19 }
 0x33f   :  { %2048 = vmatpush.msrb.mxu2 %v2002_v63 }
 0x340   :  { %5865 = vmatmul.msk.f32.vlgmr.msrb.gmra.mxu2 %vm2026_vm14, %v7616_v35 }
 0x341   :  { %2139 = vmatpush.msra.mxu2 %v2012_v41  ;;  %6259 = vrot.lane.b32.xlu2 %v7525_v60, %s6660_s16 }
 0x342   :  { %6289 = vrot.lane.b32.xlu1 %v7481_v49, %s6661_s17  ;;  %6264 = vrot.lane.b32.xlu0 %v7506_v39, %s6660_s16 }
 0x343   :  { %v6100_v61 = vpop.permute.xlu2 %6099 }
 0x344   :  { %v6080_v11 = vpop.permute.xlu1 %6079  ;;  %v6101_v38 = vunpack.i.l.bf16 %v6100_v61  ;;  %v6102_v31 = vunpack.i.h.bf16 %v6100_v61 }
 0x345   :  { %v6081_v34 = vunpack.i.l.bf16 %v6080_v11  ;;  %v6082_v32 = vunpack.i.h.bf16 %v6080_v11 }
 0x346   :  { %v2013_v2 = vsel %vm128_vm3, %v6097_v0, %v6101_v38 }
 0x347   :  { %v2009_v6 = vsel %vm128_vm3, %v6072_v56, %v6081_v34  ;;  %v2003_v1 = vsel %vm128_vm3, %v6077_v19, %v6082_v32 }
 0x348   :  { %2070 = vmatpush.msrb.mxu3 %v2009_v6  ;;  %5866 = vmatmul.msk.f32.gmra.mxu2 %vm2026_vm14, %v7630_v62 }
 0x349   :  { %6279 = vrot.lane.b32.xlu2 %v7541_v7, %s6661_s17 }
 0x34a   :  { %6304 = vrot.lane.b32.xlu1 %v7481_v49, %s6662_s22  ;;  %6284 = vrot.lane.b32.xlu0 %v6143_v15, %s6661_s17 }
 0x34b   :  { %2071 = vmatpush.msrb.mxu3 %v2003_v1  ;;  %v6115_v18 = vpop.permute.xlu2 %6114 }
 0x34c   :  { %5867 = vmatmul.msk.f32.vlgmr.msrb.gmra.mxu3 %vm2026_vm14, %v7616_v35  ;;  %v6090_v54 = vpop.permute.xlu1 %6089 }
 0x34d   :  { %2162 = vmatpush.msra.mxu3 %v2013_v2  ;;  %v6092_v59 = vunpack.i.h.bf16 %v6090_v54  ;;  %v6091_v27 = vunpack.i.l.bf16 %v6090_v54 }
 0x34f   :  { %v2010_v40 = vsel %vm128_vm3, %v6081_v34, %v6091_v27  ;;  %v2011_v47 = vsel %vm128_vm3, %v6091_v27, %v6096_v17  ;;  %v2004_v3 = vsel %vm128_vm3, %v6082_v32, %v6092_v59 }
 0x350   :  { %2093 = vmatpush.msra.mxu0 %v2010_v40  ;;  %2116 = vmatpush.msra.mxu1 %v2011_v47  ;;  %v5889_v40 = vld [vmem:[%s8916_s4 + $0x20] sm:$0xff] }
 0x351   :  { %6294 = vrot.lane.b32.xlu2 %v7464_v50, %s6661_s17 }
 0x352   :  { %2094 = vmatpush.msra.mxu0 %v2004_v3  ;;  %6319 = vrot.lane.b32.xlu1 %v7531_v45, %s6661_s17 }
 0x353   :  { %6299 = vrot.lane.b32.xlu0 %v7564_v24, %s6661_s17  ;;  %5869 = vmatmul.msk.f32.vlgmr.msra.gmra.mxu0 %vm2026_vm14, %v7616_v35  ;;  %v6117_v24 = vunpack.i.h.bf16 %v6115_v18 }
 0x354   :  { %5868 = vmatmul.msk.f32.gmra.mxu3 %vm2026_vm14, %v7630_v62  ;;  %2191 = vmatpush.msrb.mxu0 %v7471_v51  ;;  %v6110_v49 = vpop.permute.xlu1 %6109  ;;  %v6085_v25 = vpop.permute.xlu0 %6084  ;;  %v6116_v51 = vunpack.i.l.bf16 %v6115_v18 }
 0x355   :  { %v6087_v44 = vunpack.i.h.bf16 %v6085_v25  ;;  %v6086_v52 = vunpack.i.l.bf16 %v6085_v25 }
 0x356   :  { %2192 = vmatpush.msrb.mxu0 %v7459_v48 }
 0x357   :  { %v2005_v8 = vsel %vm128_vm3, %v6092_v59, %v6086_v52  ;;  %v2006_v30 = vsel %vm128_vm3, %v6086_v52, %v6087_v44  ;;  %v2007_v7 = vsel %vm128_vm3, %v6087_v44, %v6102_v31 }
 0x358   :  { %2283 = vmatpush.msra.mxu0 %v7499_v20  ;;  %2117 = vmatpush.msra.mxu1 %v2005_v8 }
 0x359   :  { %2140 = vmatpush.msra.mxu2 %v2006_v30  ;;  %6309 = vrot.lane.b32.xlu2 %v7464_v50, %s6662_s22 }
 0x35a   :  { %2163 = vmatpush.msra.mxu3 %v2007_v7  ;;  %2284 = vmatpush.msra.mxu0 %v7518_v12 }
 0x35b   :  { %5871 = vmatmul.msk.f32.vlgmr.msra.gmra.mxu1 %vm2026_vm14, %v7616_v35  ;;  %5873 = vmatmul.msk.f32.vlgmr.msra.gmra.mxu2 %vm2026_vm14, %v7616_v35 }
 0x35c   :  { %2214 = vmatpush.msrb.mxu1 %v7469_v53  ;;  %2237 = vmatpush.msrb.mxu2 %v7474_v13  ;;  %v6105_v48 = vpop.permute.xlu0 %6104  ;;  %v7677_v50 = vpop.permute.xlu1 %6119  ;;  %v6112_v13 = vunpack.i.h.bf16 %v6110_v49 }
 0x35d   :  { %2260 = vmatpush.msrb.mxu3 %v7495_v36  ;;  %6329 = vrot.lane.b32.xlu1 %v7525_v60, %s6662_s22  ;;  %v6107_v20 = vunpack.i.h.bf16 %v6105_v48  ;;  %v6106_v12 = vunpack.i.l.bf16 %v6105_v48  ;;  %v6125_v53 = vpop.permute.xlu2 %6124  ;;  %v6111_v36 = vunpack.i.l.bf16 %v6110_v49  ;;  %v6122_v0 = vunpack.i.h.bf16 %v7677_v50 }
 0x35e   :  { %6314 = vrot.lane.b32.xlu0 %v7574_v33, %s6661_s17  ;;  %5870 = vmatmul.msk.f32.gmra.mxu0 %vm2026_vm14, %v7630_v62  ;;  %v6126_v33 = vunpack.i.l.bf16 %v6125_v53  ;;  %v6121_v17 = vunpack.i.l.bf16 %v7677_v50  ;;  %v5890_v50 = vld [vmem:[%s8916_s4 + $0x28] sm:$0xff] }
 0x35f   :  { %5875 = vmatmul.msk.f32.vlgmr.msra.gmra.mxu3 %vm2026_vm14, %v7616_v35  ;;  %2215 = vmatpush.msrb.mxu1 %v7457_v22  ;;  %v2352_v60 = vsel %vm466_vm6, %v6106_v12, %v6107_v20  ;;  %v2353_v15 = vsel %vm466_vm6, %v6107_v20, %v6116_v51  ;;  %v2346_v22 = vsel %vm466_vm6, %v6111_v36, %v6112_v13  ;;  %v3792_v35 = vld [vmem:[%s8917_s5] sm:$0xff] }
 0x360   :  { %2238 = vmatpush.msrb.mxu2 %v7477_v57  ;;  %2261 = vmatpush.msrb.mxu3 %v7492_v10  ;;  %v2347_v57 = vsel %vm466_vm6, %v6112_v13, %v6117_v24  ;;  %v7701_v10 = vld [vmem:[%s8916_s4] sm:$0xff]  ;;  %v2354_v56 = vsel %vm466_vm6, %v6116_v51, %v6126_v33  ;;  %v2350_v11 = vsel %vm466_vm6, %v6121_v17, %v6122_v0 }
 0x361   :  { %2306 = vmatpush.msra.mxu1 %v7502_v26  ;;  %6324 = vrot.lane.b32.xlu2 %v7485_v14, %s6662_s22  ;;  %v6127_v14 = vunpack.i.h.bf16 %v6125_v53 }
 0x362   :  { %2390 = vmatpush.msra.mxu2 %v2352_v60  ;;  %2413 = vmatpush.msra.mxu3 %v2353_v15 }
 0x363   :  { %2307 = vmatpush.msra.mxu1 %v7521_v4  ;;  %5874 = vmatmul.msk.f32.gmra.mxu2 %vm2026_vm14, %v7630_v62  ;;  %v2348_v43 = vsel %vm466_vm6, %v6117_v24, %v6127_v14  ;;  %v2349_v41 = vsel %vm466_vm6, %v6127_v14, %v6121_v17 }
 0x364   :  { %5872 = vmatmul.msk.f32.gmra.mxu1 %vm2026_vm14, %v7630_v62  ;;  %2391 = vmatpush.msra.mxu2 %v2346_v22  ;;  %v6130_v26 = vpop.permute.xlu0 %6129  ;;  %v7710_v9 = vpop.permute.xlu1 %6139 }
 0x365   :  { %2414 = vmatpush.msra.mxu3 %v2347_v57  ;;  %v6132_v4 = vunpack.i.h.bf16 %v6130_v26  ;;  %v6131_v16 = vunpack.i.l.bf16 %v6130_v26  ;;  %v7719_v37 = vpop.permute.xlu2 %6144  ;;  %v6142_v54 = vunpack.i.h.bf16 %v7710_v9  ;;  %v6141_v59 = vunpack.i.l.bf16 %v7710_v9 }
 0x366   :  { %6339 = vrot.lane.b32.xlu0 %v7510_v42, %s6662_s22  ;;  %5877 = vmatmul.msk.f32.vlgmr.msrb.gmra.mxu0 %vm2026_vm14, %v7701_v10  ;;  %v6147_v49 = vunpack.i.h.bf16 %v7719_v37  ;;  %v6146_v25 = vunpack.i.l.bf16 %v7719_v37 }
 0x367   :  { %5876 = vmatmul.msk.f32.gmra.mxu3 %vm2026_vm14, %v7630_v62  ;;  %2436 = vmatpush.msrb.mxu0 %v2354_v56  ;;  %v2355_v42 = vsel %vm466_vm6, %v6126_v33, %v6131_v16  ;;  %v2356_v58 = vsel %vm466_vm6, %v6131_v16, %v6132_v4  ;;  %v2565_v44 = vsel %vm658_vm7, %v6141_v59, %v6142_v54 }
 0x368   :  { %v2559_v7 = vsel %vm658_vm7, %v6146_v25, %v6147_v49 }
 0x369   :  { %6334 = vrot.lane.b32.xlu2 %v7506_v39, %s6662_s22  ;;  %2437 = vmatpush.msrb.mxu0 %v2348_v43  ;;  %v1942_v39 = vld [vmem:[%s8916_s4 + $0x8] sm:$0xff] }
 0x36b   :  { %5881 = vmatmul.msk.f32.vlgmr.msrb.gmra.mxu2 %vm2026_vm14, %v7701_v10 }
 0x36c   :  { %5879 = vmatmul.msk.f32.vlgmr.msrb.gmra.mxu1 %vm2026_vm14, %v7701_v10  ;;  %2482 = vmatpush.msrb.mxu2 %v2356_v58  ;;  %v6135_v19 = vpop.permute.xlu0 %6134 }
 0x36d   :  { %2459 = vmatpush.msrb.mxu1 %v2355_v42  ;;  %v6137_v23 = vunpack.i.h.bf16 %v6135_v19  ;;  %v6136_v63 = vunpack.i.l.bf16 %v6135_v19  ;;  %v6160_v62 = vpop.permute.xlu2 %6159  ;;  %v5903_v19 = vld [vmem:[%s8916_s4 + $0x30] sm:$0xff] }
 0x36e   :  { %6344 = vrot.lane.b32.xlu0 %v7531_v45, %s6662_s22  ;;  %5878 = vmatmul.msk.f32.gmra.mxu0 %vm2026_vm14, %v1942_v39  ;;  %v6155_v45 = vpop.permute.xlu1 %6154  ;;  %v6161_v31 = vunpack.i.l.bf16 %v6160_v62  ;;  %v6162_v8 = vunpack.i.h.bf16 %v6160_v62 }
 0x36f   :  { %5883 = vmatmul.msk.f32.vlgmr.msrb.gmra.mxu3 %vm2026_vm14, %v7701_v10  ;;  %2460 = vmatpush.msrb.mxu1 %v2349_v41  ;;  %v2357_v61 = vsel %vm466_vm6, %v6132_v4, %v6136_v63  ;;  %v2351_v34 = vsel %vm466_vm6, %v6122_v0, %v6137_v23  ;;  %v6157_v6 = vunpack.i.h.bf16 %v6155_v45  ;;  %v6156_v38 = vunpack.i.l.bf16 %v6155_v45 }
 0x370   :  { %2483 = vmatpush.msrb.mxu2 %v2350_v11  ;;  %2505 = vmatpush.msrb.mxu3 %v2357_v61  ;;  %v2566_v51 = vsel %vm658_vm7, %v6142_v54, %v6161_v31  ;;  %v2560_v20 = vsel %vm658_vm7, %v6147_v49, %v6162_v8 }
 0x371   :  { %3796 = vperm.xlu2 %6066, %v3792_v35   ;;  %v2557_v3 = vsel %vm658_vm7, %v6156_v38, %v6157_v6  ;;  %v2558_v30 = vsel %vm658_vm7, %v6157_v6, %v6146_v25 }
 0x372   :  { %2506 = vmatpush.msrb.mxu3 %v2351_v34 }
 0x373   :  { %5882 = vmatmul.msk.f32.gmra.mxu2 %vm2026_vm14, %v1942_v39 }
 0x374   :  { %5880 = vmatmul.msk.f32.gmra.mxu1 %vm2026_vm14, %v1942_v39  ;;  %v6150_v32 = vpop.permute.xlu0 %6149 }
 0x375   :  { %v6152_v1 = vunpack.i.h.bf16 %v6150_v32  ;;  %v6151_v2 = vunpack.i.l.bf16 %v6150_v32  ;;  %v6175_v48 = vpop.permute.xlu2 %6174 }
 0x376   :  { %5885 = vmatmul.msk.f32.vlgmr.msra.gmra.mxu0 %vm2026_vm14, %v7701_v10  ;;  %v6170_v18 = vpop.permute.xlu1 %6169  ;;  %v6176_v12 = vunpack.i.l.bf16 %v6175_v48  ;;  %v6177_v53 = vunpack.i.h.bf16 %v6175_v48 }
 0x377   :  { %5884 = vmatmul.msk.f32.gmra.mxu3 %vm2026_vm14, %v1942_v39  ;;  %v2563_v27 = vsel %vm658_vm7, %v6151_v2, %v6152_v1  ;;  %v2564_v47 = vsel %vm658_vm7, %v6152_v1, %v6141_v59  ;;  %v6171_v14 = vunpack.i.l.bf16 %v6170_v18  ;;  %v5904_v2 = vld [vmem:[%s8916_s4 + $0x38] sm:$0xff] }
 0x378   :  { %2601 = vmatpush.msra.mxu0 %v2563_v27  ;;  %v2567_v15 = vsel %vm658_vm7, %v6161_v31, %v6176_v12  ;;  %v2561_v22 = vsel %vm658_vm7, %v6162_v8, %v6177_v53 }
 0x37a   :  { %2602 = vmatpush.msra.mxu0 %v2557_v3 }
 0x37b   :  { %5891 = vmatmul.msk.f32.vlgmr.msra.gmra.mxu2 %vm2026_vm14, %v5889_v40 }
 0x37c   :  { %5887 = vmatmul.msk.f32.vlgmr.msra.gmra.mxu1 %vm2026_vm14, %v7701_v10  ;;  %2647 = vmatpush.msra.mxu2 %v2565_v44  ;;  %v6165_v52 = vpop.permute.xlu0 %6164  ;;  %v6172_v10 = vunpack.i.h.bf16 %v6170_v18 }
 0x37d   :  { %2624 = vmatpush.msra.mxu1 %v2564_v47  ;;  %v6167_v24 = vunpack.i.h.bf16 %v6165_v52  ;;  %v6166_v33 = vunpack.i.l.bf16 %v6165_v52  ;;  %v6200_v4 = vpop.permute.xlu2 %6199 }
 0x37e   :  { %5886 = vmatmul.msk.f32.gmra.mxu0 %vm2026_vm14, %v1942_v39  ;;  %2648 = vmatpush.msra.mxu2 %v2559_v7  ;;  %v6185_v36 = vpop.permute.xlu1 %6184  ;;  %v2768_v58 = vsel %vm850_vm8, %v6171_v14, %v6172_v10  ;;  %v6202_v41 = vunpack.i.h.bf16 %v6200_v4  ;;  %v6201_v11 = vunpack.i.l.bf16 %v6200_v4 }
 0x37f   :  { %5893 = vmatmul.msk.f32.vlgmr.msra.gmra.mxu3 %vm2026_vm14, %v5889_v40  ;;  %2625 = vmatpush.msra.mxu1 %v2558_v30  ;;  %v6186_v16 = vunpack.i.l.bf16 %v6185_v36  ;;  %v2774_v56 = vsel %vm850_vm8, %v6166_v33, %v6167_v24  ;;  %v6187_v9 = vunpack.i.h.bf16 %v6185_v36 }
 0x380   :  { %2670 = vmatpush.msra.mxu3 %v2566_v51  ;;  %v2778_v1 = vsel %vm850_vm8, %v6201_v11, %v6202_v41  ;;  %v5917_v51 = vld [vmem:[%s8916_s4 + $0x40] sm:$0xff] }
 0x381   :  { %v2775_v17 = vsel %vm850_vm8, %v6167_v24, %v6186_v16  ;;  %v2769_v37 = vsel %vm850_vm8, %v6172_v10, %v6187_v9  ;;  %v5918_v10 = vld [vmem:[%s8916_s4 + $0x48] sm:$0xff] }
 0x382   :  { %2671 = vmatpush.msra.mxu3 %v2560_v20 }
 0x383   :  { %5892 = vmatmul.msk.f32.gmra.mxu2 %vm2026_vm14, %v5890_v50 }
 0x384   :  { %5888 = vmatmul.msk.f32.gmra.mxu1 %vm2026_vm14, %v1942_v39  ;;  %v6180_v13 = vpop.permute.xlu0 %6179 }
 0x385   :  { %v6181_v60 = vunpack.i.l.bf16 %v6180_v13  ;;  %v6182_v26 = vunpack.i.h.bf16 %v6180_v13  ;;  %v6205_v63 = vpop.permute.xlu2 %6204 }
 0x386   :  { %5895 = vmatmul.msk.f32.vlgmr.msrb.gmra.mxu0 %vm2026_vm14, %v5889_v40  ;;  %v6195_v0 = vpop.permute.xlu1 %6194  ;;  %v6206_v62 = vunpack.i.l.bf16 %v6205_v63  ;;  %v6207_v27 = vunpack.i.h.bf16 %v6205_v63 }
 0x387   :  { %5894 = vmatmul.msk.f32.gmra.mxu3 %vm2026_vm14, %v5890_v50  ;;  %2693 = vmatpush.msrb.mxu0 %v2567_v15  ;;  %v2568_v57 = vsel %vm658_vm7, %v6176_v12, %v6181_v60  ;;  %v2562_v42 = vsel %vm658_vm7, %v6177_v53, %v6182_v26  ;;  %v6196_v39 = vunpack.i.l.bf16 %v6195_v0  ;;  %v6197_v23 = vunpack.i.h.bf16 %v6195_v0 }
 0x388   :  { %v2779_v47 = vsel %vm850_vm8, %v6202_v41, %v6206_v62 }
 0x389   :  { %2694 = vmatpush.msrb.mxu0 %v2561_v22  ;;  %v2776_v35 = vsel %vm850_vm8, %v6186_v16, %v6196_v39  ;;  %v2770_v45 = vsel %vm850_vm8, %v6187_v9, %v6197_v23  ;;  %v2777_v38 = vsel %vm850_vm8, %v6196_v39, %v6201_v11 }
 0x38b   :  { %5899 = vmatmul.msk.f32.vlgmr.msrb.gmra.mxu2 %vm2026_vm14, %v5889_v40 }
 0x38c   :  { %5897 = vmatmul.msk.f32.vlgmr.msrb.gmra.mxu1 %vm2026_vm14, %v5889_v40  ;;  %2812 = vmatpush.msrb.mxu2 %v2774_v56  ;;  %v6190_v43 = vpop.permute.xlu0 %6189 }
 0x38d   :  { %2716 = vmatpush.msrb.mxu1 %v2568_v57  ;;  %v6192_v34 = vunpack.i.h.bf16 %v6190_v43  ;;  %v6191_v32 = vunpack.i.l.bf16 %v6190_v43 }
 0x38e   :  { %5896 = vmatmul.msk.f32.gmra.mxu0 %vm2026_vm14, %v5890_v50  ;;  %2813 = vmatpush.msrb.mxu2 %v2768_v58  ;;  %v6215_v6 = vpop.permute.xlu1 %6214 }
 0x38f   :  { %5901 = vmatmul.msk.f32.vlgmr.msrb.gmra.mxu3 %vm2026_vm14, %v5889_v40  ;;  %2717 = vmatpush.msrb.mxu1 %v2562_v42  ;;  %v2771_v54 = vsel %vm850_vm8, %v6197_v23, %v6191_v32  ;;  %v2772_v59 = vsel %vm850_vm8, %v6191_v32, %v6192_v34  ;;  %v6220_v40 = vpop.permute.xlu2 %6219  ;;  %v2773_v49 = vsel %vm850_vm8, %v6192_v34, %v6207_v27  ;;  %v6217_v20 = vunpack.i.h.bf16 %v6215_v6 }
 0x390   :  { %2835 = vmatpush.msrb.mxu3 %v2775_v17  ;;  %v6222_v25 = vunpack.i.h.bf16 %v6220_v40  ;;  %v6221_v31 = vunpack.i.l.bf16 %v6220_v40  ;;  %v6216_v12 = vunpack.i.l.bf16 %v6215_v6 }
 0x392   :  { %2836 = vmatpush.msrb.mxu3 %v2769_v37  ;;  %v2985_v8 = vsel %vm1042_vm9, %v6221_v31, %v6222_v25  ;;  %v2981_v33 = vsel %vm1042_vm9, %v6216_v12, %v6217_v20 }
 0x393   :  { %5900 = vmatmul.msk.f32.gmra.mxu2 %vm2026_vm14, %v5890_v50 }
 0x394   :  { %5898 = vmatmul.msk.f32.gmra.mxu1 %vm2026_vm14, %v5890_v50  ;;  %v7792_v61 = vpop.permute.xlu0 %6209 }
 0x395   :  { %v6212_v30 = vunpack.i.h.bf16 %v7792_v61  ;;  %v6211_v7 = vunpack.i.l.bf16 %v7792_v61 }
 0x396   :  { %5905 = vmatmul.msk.f32.vlgmr.msra.gmra.mxu0 %vm2026_vm14, %v5903_v19  ;;  %v6230_v52 = vpop.permute.xlu1 %6229 }
 0x397   :  { %5902 = vmatmul.msk.f32.gmra.mxu3 %vm2026_vm14, %v5890_v50  ;;  %2858 = vmatpush.msra.mxu0 %v2776_v35  ;;  %v6235_v50 = vpop.permute.xlu2 %6234  ;;  %v6231_v53 = vunpack.i.l.bf16 %v6230_v52  ;;  %v2986_v36 = vsel %vm1042_vm9, %v6222_v25, %v6211_v7  ;;  %v2987_v60 = vsel %vm1042_vm9, %v6211_v7, %v6212_v30  ;;  %v6232_v15 = vunpack.i.h.bf16 %v6230_v52 }
 0x398   :  { %v6237_v43 = vunpack.i.h.bf16 %v6235_v50  ;;  %v6236_v42 = vunpack.i.l.bf16 %v6235_v50 }
 0x399   :  { %2859 = vmatpush.msra.mxu0 %v2770_v45  ;;  %v2988_v57 = vsel %vm1042_vm9, %v6212_v30, %v6231_v53  ;;  %v2982_v14 = vsel %vm1042_vm9, %v6217_v20, %v6232_v15 }
 0x39a   :  { %v3196_v63 = vsel %vm1234_vm10, %v6236_v42, %v6237_v43 }
 0x39b   :  { %5909 = vmatmul.msk.f32.vlgmr.msra.gmra.mxu2 %vm2026_vm14, %v5903_v19 }
 0x39c   :  { %5907 = vmatmul.msk.f32.vlgmr.msra.gmra.mxu1 %vm2026_vm14, %v5903_v19  ;;  %2904 = vmatpush.msra.mxu2 %v2778_v1  ;;  %v6225_v3 = vpop.permute.xlu0 %6224 }
 0x39d   :  { %2881 = vmatpush.msra.mxu1 %v2777_v38  ;;  %v6227_v18 = vunpack.i.h.bf16 %v6225_v3  ;;  %v6226_v44 = vunpack.i.l.bf16 %v6225_v3  ;;  %v7853_v38 = vld [vmem:[%s8916_s4 + $0x50] sm:$0xff] }
 0x39e   :  { %5906 = vmatmul.msk.f32.gmra.mxu0 %vm2026_vm14, %v5904_v2  ;;  %2905 = vmatpush.msra.mxu2 %v2772_v59  ;;  %v6245_v22 = vpop.permute.xlu1 %6244 }
 0x39f   :  { %5911 = vmatmul.msk.f32.vlgmr.msra.gmra.mxu3 %vm2026_vm14, %v5903_v19  ;;  %2882 = vmatpush.msra.mxu1 %v2771_v54  ;;  %v2979_v48 = vsel %vm1042_vm9, %v6226_v44, %v6227_v18  ;;  %v2980_v24 = vsel %vm1042_vm9, %v6227_v18, %v6216_v12  ;;  %v6246_v26 = vunpack.i.l.bf16 %v6245_v22  ;;  %v6250_v4 = vpop.permute.xlu2 %6249  ;;  %v6247_v16 = vunpack.i.h.bf16 %v6245_v22 }
 0x3a0   :  { %2927 = vmatpush.msra.mxu3 %v2779_v47  ;;  %v6251_v0 = vunpack.i.l.bf16 %v6250_v4  ;;  %v6252_v35 = vunpack.i.h.bf16 %v6250_v4 }
 0x3a1   :  { %v2989_v9 = vsel %vm1042_vm9, %v6231_v53, %v6246_v26  ;;  %v2983_v58 = vsel %vm1042_vm9, %v6232_v15, %v6247_v16 }
 0x3a2   :  { %2928 = vmatpush.msra.mxu3 %v2773_v49  ;;  %v2990_v23 = vsel %vm1042_vm9, %v6246_v26, %v6251_v0  ;;  %v2984_v61 = vsel %vm1042_vm9, %v6247_v16, %v6252_v35 }
 0x3a3   :  { %5910 = vmatmul.msk.f32.gmra.mxu2 %vm2026_vm14, %v5904_v2 }
 0x3a4   :  { %5908 = vmatmul.msk.f32.gmra.mxu1 %vm2026_vm14, %v5904_v2  ;;  %v6240_v13 = vpop.permute.xlu0 %6239 }
 0x3a5   :  { %v6242_v17 = vunpack.i.h.bf16 %v6240_v13  ;;  %v6241_v37 = vunpack.i.l.bf16 %v6240_v13 }
 0x3a6   :  { %5913 = vmatmul.msk.f32.vlgmr.msrb.gmra.mxu0 %vm2026_vm14, %v5903_v19  ;;  %v6270_v39 = vpop.permute.xlu1 %6269 }
 0x3a7   :  { %5912 = vmatmul.msk.f32.gmra.mxu3 %vm2026_vm14, %v5904_v2  ;;  %3023 = vmatpush.msrb.mxu0 %v2985_v8  ;;  %v6260_v41 = vpop.permute.xlu2 %6259  ;;  %v3190_v45 = vsel %vm1234_vm10, %v6241_v37, %v6242_v17  ;;  %v6272_v27 = vunpack.i.h.bf16 %v6270_v39  ;;  %v6271_v40 = vunpack.i.l.bf16 %v6270_v39  ;;  %v7875_v8 = vld [vmem:[%s8916_s4 + $0x58] sm:$0xff] }
 0x3a8   :  { %v6262_v3 = vunpack.i.h.bf16 %v6260_v41  ;;  %v6261_v49 = vunpack.i.l.bf16 %v6260_v41 }
 0x3a9   :  { %3024 = vmatpush.msrb.mxu0 %v2979_v48  ;;  %v3200_v52 = vsel %vm1234_vm10, %v6271_v40, %v6272_v27 }
 0x3aa   :  { %v3194_v48 = vsel %vm1234_vm10, %v6261_v49, %v6262_v3 }
 0x3ab   :  { %5919 = vmatmul.msk.f32.vlgmr.msrb.gmra.mxu2 %vm2026_vm14, %v5917_v51 }
 0x3ac   :  { %5915 = vmatmul.msk.f32.vlgmr.msrb.gmra.mxu1 %vm2026_vm14, %v5903_v19  ;;  %3069 = vmatpush.msrb.mxu2 %v2987_v60  ;;  %v6255_v56 = vpop.permute.xlu0 %6254 }
 0x3ad   :  { %3046 = vmatpush.msrb.mxu1 %v2986_v36  ;;  %v6256_v19 = vunpack.i.l.bf16 %v6255_v56  ;;  %v6257_v11 = vunpack.i.h.bf16 %v6255_v56  ;;  %v7910_v56 = vld [vmem:[%s8916_s4 + $0x60] sm:$0xff] }
 0x3ae   :  { %5914 = vmatmul.msk.f32.gmra.mxu0 %vm2026_vm14, %v5904_v2  ;;  %3070 = vmatpush.msrb.mxu2 %v2981_v33 }
 0x3af   :  { %5921 = vmatmul.msk.f32.vlgmr.msrb.gmra.mxu3 %vm2026_vm14, %v5917_v51  ;;  %3047 = vmatpush.msrb.mxu1 %v2980_v24  ;;  %v3197_v32 = vsel %vm1234_vm10, %v6237_v43, %v6256_v19  ;;  %v3191_v62 = vsel %vm1234_vm10, %v6242_v17, %v6257_v11  ;;  %v7859_v59 = vpop.permute.xlu2 %6279 }
 0x3b0   :  { %3092 = vmatpush.msrb.mxu3 %v2988_v57 }
 0x3b2   :  { %3093 = vmatpush.msrb.mxu3 %v2982_v14  ;;  %v6281_v14 = vunpack.i.l.bf16 %v7859_v59 }
 0x3b3   :  { %5920 = vmatmul.msk.f32.gmra.mxu2 %vm2026_vm14, %v5918_v10 }
 0x3b4   :  { %5916 = vmatmul.msk.f32.gmra.mxu1 %vm2026_vm14, %v5904_v2  ;;  %v6265_v34 = vpop.permute.xlu0 %6264  ;;  %v6275_v2 = vpop.permute.xlu1 %6274 }
 0x3b5   :  { %v6266_v6 = vunpack.i.l.bf16 %v6265_v34  ;;  %v6267_v1 = vunpack.i.h.bf16 %v6265_v34  ;;  %v6276_v31 = vunpack.i.l.bf16 %v6275_v2  ;;  %v6277_v30 = vunpack.i.h.bf16 %v6275_v2 }
 0x3b6   :  { %5923 = vmatmul.msk.f32.vlgmr.msra.gmra.mxu0 %vm2026_vm14, %v5917_v51 }
 0x3b7   :  { %5922 = vmatmul.msk.f32.gmra.mxu3 %vm2026_vm14, %v5918_v10  ;;  %3115 = vmatpush.msra.mxu0 %v2989_v9  ;;  %v3198_v54 = vsel %vm1234_vm10, %v6256_v19, %v6266_v6  ;;  %v3192_v47 = vsel %vm1234_vm10, %v6257_v11, %v6267_v1  ;;  %v3199_v44 = vsel %vm1234_vm10, %v6266_v6, %v6271_v40  ;;  %v6295_v12 = vpop.permute.xlu2 %6294 }
 0x3b8   :  { %v3193_v7 = vsel %vm1234_vm10, %v6267_v1, %v6261_v49  ;;  %v3201_v50 = vsel %vm1234_vm10, %v6272_v27, %v6276_v31  ;;  %v3195_v53 = vsel %vm1234_vm10, %v6262_v3, %v6277_v30  ;;  %v6297_v15 = vunpack.i.h.bf16 %v6295_v12 }
 0x3b9   :  { %3116 = vmatpush.msra.mxu0 %v2983_v58  ;;  %v6296_v24 = vunpack.i.l.bf16 %v6295_v12 }
 0x3bb   :  { %5927 = vmatmul.msk.f32.vlgmr.msra.gmra.mxu2 %vm2026_vm14, %v5917_v51  ;;  %v3401_v4 = vsel %vm1426_vm11, %v6296_v24, %v6297_v15 }
 0x3bc   :  { %5925 = vmatmul.msk.f32.vlgmr.msra.gmra.mxu1 %vm2026_vm14, %v5917_v51  ;;  %3234 = vmatpush.msra.mxu2 %v3196_v63  ;;  %v7864_v18 = vpop.permute.xlu0 %6284 }
 0x3bd   :  { %3138 = vmatpush.msra.mxu1 %v2990_v23  ;;  %v6287_v9 = vunpack.i.h.bf16 %v7864_v18  ;;  %v6286_v43 = vunpack.i.l.bf16 %v7864_v18 }
 0x3be   :  { %5924 = vmatmul.msk.f32.gmra.mxu0 %vm2026_vm14, %v5918_v10  ;;  %3235 = vmatpush.msra.mxu2 %v3190_v45  ;;  %v5946_v45 = vld [vmem:[%s8916_s4 + $0x68] sm:$0xff] }
 0x3bf   :  { %5929 = vmatmul.msk.f32.vlgmr.msra.gmra.mxu3 %vm2026_vm14, %v5917_v51  ;;  %3139 = vmatpush.msra.mxu1 %v2984_v61  ;;  %v6290_v51 = vpop.permute.xlu1 %6289  ;;  %v7914_v42 = vpop.permute.xlu2 %6309  ;;  %v3402_v23 = vsel %vm1426_vm11, %v6297_v15, %v6286_v43  ;;  %v3403_v63 = vsel %vm1426_vm11, %v6286_v43, %v6287_v9 }
 0x3c0   :  { %3257 = vmatpush.msra.mxu3 %v3197_v32  ;;  %v6292_v36 = vunpack.i.h.bf16 %v6290_v51  ;;  %v6291_v60 = vunpack.i.l.bf16 %v6290_v51  ;;  %v6312_v18 = vunpack.i.h.bf16 %v7914_v42 }
 0x3c2   :  { %3258 = vmatpush.msra.mxu3 %v3191_v62  ;;  %v3407_v57 = vsel %vm1426_vm11, %v6291_v60, %v6292_v36  ;;  %v3408_v17 = vsel %vm1426_vm11, %v6292_v36, %v6281_v14 }
 0x3c3   :  { %5928 = vmatmul.msk.f32.gmra.mxu2 %vm2026_vm14, %v5918_v10  ;;  %v7862_v25 = vpop.f32.mrf.mxu2 }
 0x3c4   :  { %5926 = vmatmul.msk.f32.gmra.mxu1 %vm2026_vm14, %v5918_v10 }
 0x3c5   :  { %v6300_v22 = vpop.permute.xlu0 %6299 }
 0x3c6   :  { %5933 = vmatmul.msk.f32.vlgmr.msrb.gmra.mxu0 %vm2026_vm14, %v7853_v38  ;;  %v6301_v58 = vunpack.i.l.bf16 %v6300_v22  ;;  %v6302_v19 = vunpack.i.h.bf16 %v6300_v22 }
 0x3c7   :  { %5930 = vmatmul.msk.f32.gmra.mxu3 %vm2026_vm14, %v5918_v10  ;;  %3280 = vmatpush.msrb.mxu0 %v3198_v54  ;;  %v6282_v10 = vunpack.i.h.bf16 %v7859_v59  ;;  %v6305_v39 = vpop.permute.xlu1 %6304  ;;  %v6325_v1 = vpop.permute.xlu2 %6324 }
 0x3c8   :  { %v3404_v34 = vsel %vm1426_vm11, %v6287_v9, %v6302_v19  ;;  %v6307_v27 = vunpack.i.h.bf16 %v6305_v39  ;;  %v6306_v40 = vunpack.i.l.bf16 %v6305_v39  ;;  %v6327_v51 = vunpack.i.h.bf16 %v6325_v1 }
 0x3c9   :  { %3281 = vmatpush.msrb.mxu0 %v3192_v47  ;;  %v3409_v37 = vsel %vm1426_vm11, %v6281_v14, %v6282_v10  ;;  %v3410_v11 = vsel %vm1426_vm11, %v6282_v10, %v6301_v58 }
 0x3ca   :  { %v3613_v22 = vsel %vm1618_vm12, %v6312_v18, %v6327_v51 }
 0x3cb   :  { %5937 = vmatmul.msk.f32.vlgmr.msrb.gmra.mxu2 %vm2026_vm14, %v7853_v38  ;;  %v7893_v33 = vpop.f32.mrf.mxu2 }
 0x3cc   :  { %5935 = vmatmul.msk.f32.vlgmr.msrb.gmra.mxu1 %vm2026_vm14, %v7853_v38  ;;  %3326 = vmatpush.msrb.mxu2 %v3200_v52  ;;  %v6326_v52 = vunpack.i.l.bf16 %v6325_v1 }
 0x3cd   :  { %3303 = vmatpush.msrb.mxu1 %v3199_v44  ;;  %v6311_v44 = vunpack.i.l.bf16 %v7914_v42 }
 0x3ce   :  { %5934 = vmatmul.msk.f32.gmra.mxu0 %vm2026_vm14, %v7875_v8  ;;  %3327 = vmatpush.msrb.mxu2 %v3194_v48  ;;  %v3619_v15 = vsel %vm1618_vm12, %v6307_v27, %v6326_v52 }
 0x3cf   :  { %5939 = vmatmul.msk.f32.vlgmr.msrb.gmra.mxu3 %vm2026_vm14, %v7853_v38  ;;  %3304 = vmatpush.msrb.mxu1 %v3193_v7  ;;  %v7884_v20 = vpop.f32.mrf.mxu3  ;;  %v6320_v2 = vpop.permute.xlu1 %6319  ;;  %v3618_v7 = vsel %vm1618_vm12, %v6306_v40, %v6307_v27 }
 0x3d0   :  { %3349 = vmatpush.msrb.mxu3 %v3201_v50  ;;  %v7887_v13 = vpop.f32.mrf.mxu0  ;;  %v6315_v41 = vpop.permute.xlu0 %6314  ;;  %v6321_v49 = vunpack.i.l.bf16 %v6320_v2  ;;  %v6322_v48 = vunpack.i.h.bf16 %v6320_v2 }
 0x3d1   :  { %v6316_v62 = vunpack.i.l.bf16 %v6315_v41  ;;  %v6335_v60 = vpop.permute.xlu2 %6334 }
 0x3d2   :  { %3350 = vmatpush.msrb.mxu3 %v3195_v53  ;;  %v3612_v53 = vsel %vm1618_vm12, %v6311_v44, %v6312_v18  ;;  %v6336_v10 = vunpack.i.l.bf16 %v6335_v60 }
 0x3d3   :  { %5938 = vmatmul.msk.f32.gmra.mxu2 %vm2026_vm14, %v7875_v8  ;;  %v3411_v54 = vsel %vm1426_vm11, %v6301_v58, %v6316_v62  ;;  %v3412_v30 = vsel %vm1426_vm11, %v6316_v62, %v6321_v49 }
 0x3d4   :  { %5936 = vmatmul.msk.f32.gmra.mxu1 %vm2026_vm14, %v7875_v8  ;;  %v3620_v9 = vsel %vm1618_vm12, %v6326_v52, %v6336_v10 }
 0x3d6   :  { %5941 = vmatmul.msk.f32.vlgmr.msra.gmra.mxu0 %vm2026_vm14, %v7853_v38 }
 0x3d7   :  { %5940 = vmatmul.msk.f32.gmra.mxu3 %vm2026_vm14, %v7875_v8  ;;  %3445 = vmatpush.msra.mxu0 %v3407_v57  ;;  %v7905_v16 = vpop.f32.mrf.mxu3  ;;  %v6330_v42 = vpop.permute.xlu1 %6329 }
 0x3d8   :  { %v7902_v26 = vpop.f32.mrf.mxu1  ;;  %v6340_v50 = vpop.permute.xlu0 %6339 }
 0x3d9   :  { %3446 = vmatpush.msra.mxu0 %v3401_v4  ;;  %v5959_v4 = vld [vmem:[%s8916_s4 + $0x70] sm:$0xff]  ;;  %v6342_v58 = vunpack.i.h.bf16 %v6340_v50 }
 0x3db   :  { %v7916_v0 = vpop.f32.mrf.mxu0  ;;  %5947 = vmatmul.msk.f32.vlgmr.msra.gmra.mxu2 %vm2026_vm14, %v7910_v56 }
 0x3dc   :  { %5943 = vmatmul.msk.f32.vlgmr.msra.gmra.mxu1 %vm2026_vm14, %v7853_v38  ;;  %3491 = vmatpush.msra.mxu2 %v3409_v37  ;;  %v6317_v38 = vunpack.i.h.bf16 %v6315_v41  ;;  %v6331_v41 = vunpack.i.l.bf16 %v6330_v42 }
 0x3dd   :  { %3468 = vmatpush.msra.mxu1 %v3408_v17  ;;  %v6341_v17 = vunpack.i.l.bf16 %v6340_v50 }
 0x3de   :  { %5942 = vmatmul.msk.f32.gmra.mxu0 %vm2026_vm14, %v7875_v8  ;;  %v7930_v35 = vpop.f32.mrf.mxu2  ;;  %3492 = vmatpush.msra.mxu2 %v3403_v63  ;;  %v3405_v47 = vsel %vm1426_vm11, %v6302_v19, %v6317_v38  ;;  %v3406_v12 = vsel %vm1426_vm11, %v6317_v38, %v6322_v48  ;;  %v6332_v63 = vunpack.i.h.bf16 %v6330_v42  ;;  %v5960_v38 = vld [vmem:[%s8916_s4 + $0x78] sm:$0xff]  ;;  %v5973_v48 = vld [vmem:[%s8916_s4 + $0x80] sm:$0xff] }
 0x3df   :  { %5949 = vmatmul.msk.f32.vlgmr.msra.gmra.mxu3 %vm2026_vm14, %v7910_v56  ;;  %3469 = vmatpush.msra.mxu1 %v3402_v23  ;;  %v3622_v62 = vsel %vm1618_vm12, %v6341_v17, %v6342_v58 }
 0x3e0   :  { %3514 = vmatpush.msra.mxu3 %v3410_v11  ;;  %v6345_v37 = vpop.permute.xlu0 %6344 }
 0x3e1   :  { %v7933_v61 = vpop.f32.mrf.mxu1  ;;  %v6346_v11 = vunpack.i.l.bf16 %v6345_v37  ;;  %v6347_v1 = vunpack.i.h.bf16 %v6345_v37 }
 0x3e2   :  { %v7939_v32 = vpop.f32.mrf.mxu3  ;;  %3515 = vmatpush.msra.mxu3 %v3404_v34  ;;  %v3621_v34 = vsel %vm1618_vm12, %v6336_v10, %v6341_v17 }
 0x3e3   :  { %9011 = vst [vmem:[#allocation38_spill] sm:$0xff] %v7939_v32  ;;  %v7941_v6 = vpop.f32.mrf.mxu0  ;;  %5948 = vmatmul.msk.f32.gmra.mxu2 %vm2026_vm14, %v5946_v45  ;;  %v3623_v40 = vsel %vm1618_vm12, %v6342_v58, %v6346_v11  ;;  %v3617_v49 = vsel %vm1618_vm12, %v6332_v63, %v6347_v1 }
 0x3e4   :  { %5944 = vmatmul.msk.f32.gmra.mxu1 %vm2026_vm14, %v7875_v8 }
 0x3e6   :  { %5951 = vmatmul.msk.f32.vlgmr.msrb.gmra.mxu0 %vm2026_vm14, %v7910_v56  ;;  %v7950_v59 = vpop.f32.mrf.mxu2 }
 0x3e7   :  { %5950 = vmatmul.msk.f32.gmra.mxu3 %vm2026_vm14, %v5946_v45  ;;  %3537 = vmatpush.msrb.mxu0 %v3411_v54  ;;  %v3616_v54 = vsel %vm1618_vm12, %v6331_v41, %v6332_v63 }
 0x3e9   :  { %v7953_v3 = vpop.f32.mrf.mxu1  ;;  %3538 = vmatpush.msrb.mxu0 %v3405_v47 }
 0x3ea   :  { %v7955_v31 = vpop.f32.mrf.mxu3 }
 0x3eb   :  { %9012 = vst [vmem:[#allocation6_spill] sm:$0xff] %v7955_v31  ;;  %v7959_v8 = vpop.f32.mrf.mxu0  ;;  %5955 = vmatmul.msk.f32.vlgmr.msrb.gmra.mxu2 %vm2026_vm14, %v7910_v56 }
 0x3ec   :  { %5953 = vmatmul.msk.f32.vlgmr.msrb.gmra.mxu1 %vm2026_vm14, %v7910_v56  ;;  %3656 = vmatpush.msrb.mxu2 %v3618_v7 }
 0x3ed   :  { %3560 = vmatpush.msrb.mxu1 %v3412_v30  ;;  %v3793_v30 = vld [vmem:[%s8917_s5 + $0x8] sm:$0xff] }
 0x3ee   :  { %5952 = vmatmul.msk.f32.gmra.mxu0 %vm2026_vm14, %v5946_v45  ;;  %v7972_v36 = vpop.f32.mrf.mxu2  ;;  %3657 = vmatpush.msrb.mxu2 %v3612_v53 }
 0x3ef   :  { %5957 = vmatmul.msk.f32.vlgmr.msrb.gmra.mxu3 %vm2026_vm14, %v7910_v56  ;;  %3561 = vmatpush.msrb.mxu1 %v3406_v12  ;;  %v6337_v56 = vunpack.i.h.bf16 %v6335_v60  ;;  %v5974_v60 = vld [vmem:[%s8916_s4 + $0x88] sm:$0xff] }
 0x3f0   :  { %3679 = vmatpush.msrb.mxu3 %v3619_v15  ;;  %3801 = vperm.xlu1 %6348, %v3793_v30  }
 0x3f1   :  { %v7975_v24 = vpop.f32.mrf.mxu1  ;;  %v3614_v39 = vsel %vm1618_vm12, %v6327_v51, %v6337_v56  ;;  %v3615_v2 = vsel %vm1618_vm12, %v6337_v56, %v6331_v41 }
 0x3f2   :  { %v7978_v57 = vpop.f32.mrf.mxu3  ;;  %3680 = vmatpush.msrb.mxu3 %v3613_v22 }
 0x3f3   :  { %v7980_v14 = vpop.f32.mrf.mxu0  ;;  %5956 = vmatmul.msk.f32.gmra.mxu2 %vm2026_vm14, %v5946_v45 }
 0x3f4   :  { %5954 = vmatmul.msk.f32.gmra.mxu1 %vm2026_vm14, %v5946_v45 }
 0x3f6   :  { %5961 = vmatmul.msk.f32.vlgmr.msra.gmra.mxu0 %vm2026_vm14, %v5959_v4  ;;  %v7990_v43 = vpop.f32.mrf.mxu2 }
 0x3f7   :  { %5958 = vmatmul.msk.f32.gmra.mxu3 %vm2026_vm14, %v5946_v45  ;;  %3702 = vmatpush.msra.mxu0 %v3620_v9 }
 0x3f9   :  { %v7993_v19 = vpop.f32.mrf.mxu1  ;;  %3703 = vmatpush.msra.mxu0 %v3614_v39 }
 0x3fa   :  { %9013 = vst [vmem:[#allocation7_spill] sm:$0xff] %v7993_v19  ;;  %v7995_v23 = vpop.f32.mrf.mxu3 }
 0x3fb   :  { %v7997_v45 = vpop.f32.mrf.mxu0  ;;  %5965 = vmatmul.msk.f32.vlgmr.msra.gmra.mxu2 %vm2026_vm14, %v5959_v4 }
 0x3fc   :  { %5963 = vmatmul.msk.f32.vlgmr.msra.gmra.mxu1 %vm2026_vm14, %v5959_v4  ;;  %3748 = vmatpush.msra.mxu2 %v3622_v62 }
 0x3fd   :  { %3725 = vmatpush.msra.mxu1 %v3621_v34 }
 0x3fe   :  { %5962 = vmatmul.msk.f32.gmra.mxu0 %vm2026_vm14, %v5960_v38  ;;  %v8010_v27 = vpop.f32.mrf.mxu2  ;;  %3749 = vmatpush.msra.mxu2 %v3616_v54 }
 0x3ff   :  { %5967 = vmatmul.msk.f32.vlgmr.msra.gmra.mxu3 %vm2026_vm14, %v5959_v4  ;;  %3726 = vmatpush.msra.mxu1 %v3615_v2 }
 0x400   :  { %3771 = vmatpush.msra.mxu3 %v3623_v40 }
 0x401   :  { %v8013_v47 = vpop.f32.mrf.mxu1 }
 0x402   :  { %9014 = vst [vmem:[#allocation8_spill] sm:$0xff] %v8013_v47  ;;  %v8016_v18 = vpop.f32.mrf.mxu3  ;;  %3772 = vmatpush.msra.mxu3 %v3617_v49  ;;  %v2287_v47 = vadd.f32 %v7980_v14, %v7930_v35 }
 0x403   :  { %v8018_v44 = vpop.f32.mrf.mxu0  ;;  %5966 = vmatmul.msk.f32.gmra.mxu2 %vm2026_vm14, %v5960_v38 }
 0x404   :  { %5964 = vmatmul.msk.f32.gmra.mxu1 %vm2026_vm14, %v5960_v38 }
 0x406   :  { %5969 = vmatmul.msk.f32.vlgmr.msrb.gmra.mxu0 %vm2026_vm14, %v5959_v4  ;;  %v8024_v52 = vpop.f32.mrf.mxu2 }
 0x407   :  { %5968 = vmatmul.msk.f32.gmra.mxu3 %vm2026_vm14, %v5960_v38 }
 0x409   :  { %v8029_v7 = vpop.f32.mrf.mxu1 }
 0x40a   :  { %v8034_v51 = vpop.f32.mrf.mxu3 }
 0x40b   :  { %v8036_v50 = vpop.f32.mrf.mxu0  ;;  %5975 = vmatmul.msk.f32.vlgmr.msrb.gmra.mxu2 %vm2026_vm14, %v5973_v48 }
 0x40c   :  { %5971 = vmatmul.msk.f32.vlgmr.msrb.gmra.mxu1 %vm2026_vm14, %v5959_v4 }
 0x40e   :  { %5970 = vmatmul.msk.f32.gmra.mxu0 %vm2026_vm14, %v5960_v38  ;;  %v2485_v12 = vpop.f32.mrf.mxu2 }
 0x40f   :  { %5977 = vmatmul.msk.f32.vlgmr.msrb.gmra.mxu3 %vm2026_vm14, %v5973_v48  ;;  %v2518_v31 = vadd.f32 %v2485_v12, %v2287_v47 }
 0x411   :  { %v2465_v53 = vpop.f32.mrf.mxu1 }
 0x412   :  { %v8045_v15 = vpop.f32.mrf.mxu3 }
 0x413   :  { %9015 = vst [vmem:[#allocation9_spill] sm:$0xff] %v8045_v15  ;;  %v8047_v22 = vpop.f32.mrf.mxu0  ;;  %5976 = vmatmul.msk.f32.gmra.mxu2 %vm2026_vm14, %v5974_v60 }
 0x414   :  { %5972 = vmatmul.msk.f32.gmra.mxu1 %vm2026_vm14, %v5960_v38 }
 0x416   :  { %5979 = vmatmul.msk.f32.vlgmr.msra.gmra.mxu0 %vm2026_vm14, %v5973_v48  ;;  %v2488_v10 = vpop.f32.mrf.mxu2 }
 0x417   :  { %5978 = vmatmul.msk.f32.gmra.mxu3 %vm2026_vm14, %v5974_v60 }
 0x419   :  { %v8053_v4 = vpop.f32.mrf.mxu1 }
 0x41a   :  { %v8055_v56 = vpop.f32.mrf.mxu3 }
 0x41b   :  { %9016 = vst [vmem:[#allocation10_spill] sm:$0xff] %v8055_v56  ;;  %v8057_v9 = vpop.f32.mrf.mxu0  ;;  %5983 = vmatmul.msk.f32.vlgmr.msra.gmra.mxu2 %vm2026_vm14, %v5973_v48 }
 0x41c   :  { %5981 = vmatmul.msk.f32.vlgmr.msra.gmra.mxu1 %vm2026_vm14, %v5973_v48 }
 0x41e   :  { %5980 = vmatmul.msk.f32.gmra.mxu0 %vm2026_vm14, %v5974_v60  ;;  %v8063_v42 = vpop.f32.mrf.mxu2 }
 0x41f   :  { %5985 = vmatmul.msk.f32.vlgmr.msra.gmra.mxu3 %vm2026_vm14, %v5973_v48 }
 0x421   :  { %v8065_v58 = vpop.f32.mrf.mxu1 }
 0x422   :  { %v8067_v17 = vpop.f32.mrf.mxu3 }
 0x423   :  { %v2696_v37 = vpop.f32.mrf.mxu0  ;;  %5984 = vmatmul.msk.f32.gmra.mxu2 %vm2026_vm14, %v5974_v60 }
 0x424   :  { %5982 = vmatmul.msk.f32.gmra.mxu1 %vm2026_vm14, %v5974_v60  ;;  %v2729_v5 = vadd.f32 %v2696_v37, %v2518_v31 }
 0x426   :  { %v8072_v39 = vpop.f32.mrf.mxu2 }
 0x427   :  { %5986 = vmatmul.msk.f32.gmra.mxu3 %vm2026_vm14, %v5974_v60 }
 0x429   :  { %v8074_v63 = vpop.f32.mrf.mxu1 }
 0x42a   :  { %9017 = vst [vmem:[#allocation11_spill] sm:$0xff] %v8074_v63  ;;  %v2676_v41 = vpop.f32.mrf.mxu3 }
 0x42b   :  { %v2699_v11 = vpop.f32.mrf.mxu0 }
 0x42e   :  { %v8076_v34 = vpop.f32.mrf.mxu2 }
 0x431   :  { %v8078_v62 = vpop.f32.mrf.mxu1 }
 0x432   :  { %9018 = vst [vmem:[#allocation13_spill] sm:$0xff] %v8078_v62  ;;  %v8080_v38 = vpop.f32.mrf.mxu3 }
 0x433   :  { %v8082_v1 = vpop.f32.mrf.mxu0 }
 0x436   :  { %v8084_v2 = vpop.f32.mrf.mxu2 }
 0x439   :  { %v8086_v54 = vpop.f32.mrf.mxu1 }
 0x43a   :  { %v8088_v40 = vpop.f32.mrf.mxu3 }
 0x43b   :  { %9019 = vst [vmem:[#allocation16_spill] sm:$0xff] %v8088_v40  ;;  %v8090_v49 = vpop.f32.mrf.mxu0 }
 0x43c   :  { %9020 = vst [vmem:[#allocation14_spill] sm:$0xff] %v8090_v49 }
 0x43e   :  { %v2907_v30 = vpop.f32.mrf.mxu2 }
 0x43f   :  { %v2940_v15 = vadd.f32 %v2907_v30, %v2729_v5 }
 0x441   :  { %v2887_v48 = vpop.f32.mrf.mxu1 }
 0x442   :  { %v8092_v60 = vpop.f32.mrf.mxu3 }
 0x443   :  { %9021 = vst [vmem:[#allocation20_spill] sm:$0xff] %v8092_v60  ;;  %v3026_v21 = vpop.f32.mrf.mxu0  ;;  %v2267_v60 = vadd.f32 %v7995_v23, %v7933_v61 }
 0x445   :  { %v2523_v19 = vadd.f32 %v2465_v53, %v2267_v60 }
 0x446   :  { %v2910_v55 = vpop.f32.mrf.mxu2 }
 0x447   :  { %v2734_v14 = vadd.f32 %v2676_v41, %v2523_v19 }
 0x449   :  { %v8094_v28 = vpop.f32.mrf.mxu1  ;;  %v2945_v12 = vadd.f32 %v2887_v48, %v2734_v14  ;;  %v2195_v14 = vadd.f32 %v7941_v6, %v7862_v25 }
 0x44a   :  { %v8096_v62 = vpop.f32.mrf.mxu3 }
 0x44b   :  { %9022 = vst [vmem:[#allocation15_spill] sm:$0xff] %v8096_v62  ;;  %v8098_v56 = vpop.f32.mrf.mxu0  ;;  %v2290_v62 = vadd.f32 %v7997_v45, %v7950_v59 }
 0x44d   :  { %v2524_v35 = vadd.f32 %v2488_v10, %v2290_v62 }
 0x44e   :  { %v8102_v46 = vpop.f32.mrf.mxu2 }
 0x44f   :  { %v2735_v31 = vadd.f32 %v2699_v11, %v2524_v35 }
 0x451   :  { %v8104_v63 = vpop.f32.mrf.mxu1 }
 0x452   :  { %9023 = vst [vmem:[#allocation21_spill] sm:$0xff] %v8104_v63  ;;  %v8106_v29 = vpop.f32.mrf.mxu3 }
 0x453   :  { %9024 = vst [vmem:[#allocation12_spill] sm:$0xff] %v8106_v29  ;;  %v3118_v49 = vpop.f32.mrf.mxu0  ;;  %v2946_v29 = vadd.f32 %v2910_v55, %v2735_v31 }
 0x454   :  { %v8112_v32 = vadd.f32 %v3118_v49, %v2940_v15 }
 0x456   :  { %v8114_v47 = vpop.f32.mrf.mxu2 }
 0x459   :  { %v8116_v37 = vpop.f32.mrf.mxu1 }
 0x45a   :  { %v3098_v63 = vpop.f32.mrf.mxu3 }
 0x45b   :  { %v8118_v40 = vadd.f32 %v3098_v63, %v2945_v12  ;;  %v3121_v5 = vpop.f32.mrf.mxu0  ;;  %v2514_v12 = vadd.f32 %v8010_v27, %v2195_v14 }
 0x45c   :  { %v8120_v61 = vadd.f32 %v3121_v5, %v2946_v29 }
 0x45e   :  { %9025 = vst [vmem:[#allocation17_spill] sm:$0xff] %v8120_v61  ;;  %v3237_v23 = vpop.f32.mrf.mxu2 }
 0x461   :  { %v8122_v59 = vpop.f32.mrf.mxu1 }
 0x462   :  { %9026 = vst [vmem:[#allocation22_spill] sm:$0xff] %v8122_v59  ;;  %v3260_v45 = vpop.f32.mrf.mxu3  ;;  %v2218_v59 = vadd.f32 %v7953_v3, %v7884_v20  ;;  %v2198_v20 = vadd.f32 %v7959_v8, %v7893_v33 }
 0x463   :  { %v3283_v53 = vpop.f32.mrf.mxu0 }
 0x464   :  { %v2515_v61 = vadd.f32 %v8016_v18, %v2218_v59  ;;  %v2264_v18 = vadd.f32 %v7978_v57, %v7902_v26  ;;  %v2244_v26 = vadd.f32 %v7990_v43, %v7916_v0 }
 0x466   :  { %v8124_v15 = vpop.f32.mrf.mxu2  ;;  %v2726_v27 = vadd.f32 %v8053_v4, %v2515_v61  ;;  %v2221_v4 = vadd.f32 %v7975_v24, %v7905_v16  ;;  %v2517_v8 = vadd.f32 %v8029_v7, %v2264_v18  ;;  %v2522_v7 = vadd.f32 %v8036_v50, %v2244_v26  ;;  %v9031_v50 = vld [vmem:[#allocation38_spill] sm:$0xff] }
 0x468   :  { %v2521_v57 = vadd.f32 %v8034_v51, %v2221_v4  ;;  %v2728_v16 = vadd.f32 %v8067_v17, %v2517_v8 }
 0x469   :  { %v8126_v19 = vpop.f32.mrf.mxu1 }
 0x46a   :  { %v8128_v10 = vpop.f32.mrf.mxu3  ;;  %v2939_v43 = vadd.f32 %v8086_v54, %v2728_v16 }
 0x46b   :  { %v8130_v41 = vpop.f32.mrf.mxu0 }
 0x46e   :  { %v8132_v11 = vpop.f32.mrf.mxu2 }
 0x471   :  { %v8134_v55 = vpop.f32.mrf.mxu1 }
 0x472   :  { %v8136_v63 = vpop.f32.mrf.mxu3 }
 0x473   :  { %9027 = vst [vmem:[#allocation25_spill] sm:$0xff] %v8136_v63  ;;  %v3448_v29 = vpop.f32.mrf.mxu0 }
 0x476   :  { %v8138_v62 = vpop.f32.mrf.mxu2 }
 0x477   :  { %9028 = vst [vmem:[#allocation18_spill] sm:$0xff] %v8138_v62  ;;  %v2725_v62 = vadd.f32 %v8047_v22, %v2514_v12 }
 0x479   :  { %v3471_v49 = vpop.f32.mrf.mxu1  ;;  %v2936_v25 = vadd.f32 %v8076_v34, %v2725_v62  ;;  %v2520_v34 = vadd.f32 %v8024_v52, %v2198_v20 }
 0x47a   :  { %v8140_v30 = vpop.f32.mrf.mxu3 }
 0x47b   :  { %9029 = vst [vmem:[#allocation28_spill] sm:$0xff] %v8140_v30  ;;  %v8142_v48 = vpop.f32.mrf.mxu0  ;;  %v2241_v30 = vadd.f32 %v7972_v36, %v7887_v13  ;;  %v3147_v3 = vadd.f32 %v3026_v21, %v2936_v25  ;;  %v2937_v36 = vadd.f32 %v8080_v38, %v2726_v27 }
 0x47d   :  { %v2516_v6 = vadd.f32 %v8018_v44, %v2241_v30  ;;  %v3358_v44 = vadd.f32 %v3237_v23, %v3147_v3  ;;  %v3148_v21 = vadd.f32 %v8094_v28, %v2937_v36  ;;  %v8189_v28 = vpop.permute.xlu2 %3796  ;;  %v9034_v3 = vld [vmem:[#allocation14_spill] sm:$0xff] }
 0x47e   :  { %v3494_v60 = vpop.f32.mrf.mxu2 }
 0x47f   :  { %v2727_v13 = vadd.f32 %v8063_v42, %v2516_v6  ;;  %v2731_v42 = vadd.f32 %v8057_v9, %v2520_v34  ;;  %v3569_v38 = vadd.f32 %v3448_v29, %v3358_v44  ;;  %v3359_v61 = vadd.f32 %v3260_v45, %v3148_v21  ;;  %v9030_v45 = vld [vmem:[#allocation16_spill] sm:$0xff]  ;;  %v9032_v6 = vld [vmem:[#allocation7_spill] sm:$0xff]  ;;  %v9036_v34 = vld [vmem:[#allocation9_spill] sm:$0xff] }
 0x480   :  { %v2732_v9 = vadd.f32 %v8065_v58, %v2521_v57  ;;  %v2310_v58 = vadd.f32 %v9032_v6, %v9031_v50  ;;  %v8214_v57 = vpop.permute.xlu1 %3801 }
 0x481   :  { %v8144_v35 = vpop.f32.mrf.mxu1  ;;  %v2938_v33 = vadd.f32 %v8082_v1, %v2727_v13  ;;  %v2942_v24 = vadd.f32 %v8084_v2, %v2731_v42  ;;  %v3570_v62 = vadd.f32 %v3471_v49, %v3359_v61  ;;  %v2733_v2 = vadd.f32 %v8072_v39, %v2522_v7  ;;  %v9035_v13 = vld [vmem:[#allocation21_spill] sm:$0xff] }
 0x482   :  { %v8148_v31 = vpop.f32.mrf.mxu3  ;;  %v2943_v30 = vadd.f32 %v9030_v45, %v2732_v9  ;;  %v2519_v44 = vadd.f32 %v9036_v34, %v2310_v58  ;;  %v9042_v45 = vld [vmem:[#allocation6_spill] sm:$0xff] }
 0x483   :  { %v8151_v5 = vpop.f32.mrf.mxu0  ;;  %v3149_v52 = vadd.f32 %v8102_v46, %v2938_v33  ;;  %v3153_v46 = vadd.f32 %v8098_v56, %v2942_v24  ;;  %v2944_v56 = vadd.f32 %v9034_v3, %v2733_v2  ;;  %v9037_v33 = vld [vmem:[#allocation39_spill] sm:$0xff] }
 0x484   :  { %v3154_v36 = vadd.f32 %v9035_v13, %v2943_v30  ;;  %v9043_v30 = vld [vmem:[#allocation8_spill] sm:$0xff] }
 0x485   :  { %v3360_v29 = vadd.f32 %v3283_v53, %v3149_v52  ;;  %v9033_v53 = vld [vmem:[#allocation12_spill] sm:$0xff]  ;;  %v3364_v27 = vadd.f32 %v8124_v15, %v3153_v46  ;;  %v3155_v8 = vadd.f32 %v8114_v47, %v2944_v56  ;;  %v9038_v52 = vld [vmem:[#allocation11_spill] sm:$0xff] }
 0x486   :  { %v8159_v63 = vpop.f32.mrf.mxu2  ;;  %v3150_v49 = vadd.f32 %v9033_v53, %v2939_v43  ;;  %v3365_v15 = vadd.f32 %v8128_v10, %v3154_v36  ;;  %v2730_v61 = vadd.f32 %v9038_v52, %v2519_v44  ;;  %v9039_v10 = vld [vmem:[#allocation29_spill] sm:$0xff] }
 0x487   :  { %v3571_v12 = vadd.f32 %v3494_v60, %v3360_v29  ;;  %v3575_v4 = vadd.f32 %v8142_v48, %v3364_v27  ;;  %v9045_v27 = vld [vmem:[#allocation25_spill] sm:$0xff] }
 0x488   :  { %v3361_v60 = vadd.f32 %v8126_v19, %v3150_v49  ;;  %v3366_v19 = vadd.f32 %v8130_v41, %v3155_v8  ;;  %v3576_v48 = vadd.f32 %v8144_v35, %v3365_v15  ;;  %v3362_v41 = vadd.f32 %v8132_v11, %v8112_v32  ;;  %v9044_v11 = vld [vmem:[#allocation10_spill] sm:$0xff]  ;;  %v9048_v15 = vld [vmem:[#allocation17_spill] sm:$0xff] }
 0x489   :  { %v8164_v14 = vpop.f32.mrf.mxu1 }
 0x48a   :  { %v8168_v22 = vpop.f32.mrf.mxu3  ;;  %v3577_v46 = vadd.f32 %v8159_v63, %v3366_v19  ;;  %v3367_v63 = vadd.f32 %v8134_v55, %v8118_v40  ;;  %v3573_v58 = vadd.f32 %v8151_v5, %v3362_v41  ;;  %v9046_v40 = vld [vmem:[#allocation13_spill] sm:$0xff]  ;;  %v9051_v19 = vld [vmem:[#allocation3_spill] sm:$0xff] }
 0x48b   :  { %v8175_v59 = vpop.f32.mrf.mxu0 }
 0x48c   :  { %v3578_v56 = vadd.f32 %v8168_v22, %v3367_v63 }
 0x48e   :  { %v3659_v23 = vpop.f32.mrf.mxu2 }
 0x48f   :  { %v3780_v1 = vadd.f32 %v3659_v23, %v3569_v38  ;;  %v3572_v23 = vadd.f32 %v8148_v31, %v3361_v60 }
 0x491   :  { %v8193_v0 = vpop.f32.mrf.mxu1  ;;  %v3804_v51 = vadd.f32 %v8189_v28, %v3780_v1 }
 0x492   :  { %v3682_v17 = vpop.f32.mrf.mxu3 }
 0x493   :  { %v3781_v25 = vadd.f32 %v3682_v17, %v3570_v62  ;;  %v3816_v20 = vmax.f32 %v3804_v51, 0.0  ;;  %v3705_v54 = vpop.f32.mrf.mxu0  ;;  %v9040_v62 = vld [vmem:[#allocation20_spill] sm:$0xff] }
 0x494   :  { %v3782_v39 = vadd.f32 %v3705_v54, %v3571_v12  ;;  %v2941_v43 = vadd.f32 %v9040_v62, %v2730_v61  ;;  %v9041_v51 = vld [vmem:[#allocation36_spill] sm:$0xff]  ;;  %v2313_v12 = vadd.f32 %v9043_v30, %v9042_v45 }
 0x495   :  { %v3805_v18 = vadd.f32 %v8189_v28, %v3781_v25  ;;  %v3828_v21 = vmul.f32 %v3816_v20, %v9037_v33 }
 0x496   :  { %v3806_v38 = vadd.f32 %v8189_v28, %v3782_v39  ;;  %v3662_v26 = vpop.f32.mrf.mxu2  ;;  %v3152_v25 = vadd.f32 %v8116_v37, %v2941_v43  ;;  %v2525_v49 = vadd.f32 %v9044_v11, %v2313_v12 }
 0x497   :  { %v3817_v42 = vmax.f32 %v3805_v18, 0.0  ;;  %v3786_v16 = vadd.f32 %v3662_v26, %v3575_v4  ;;  %3852 = vrot.lane.b32.xlu0 %v3828_v21, %s6653_s11 }
 0x498   :  { %v3818_v47 = vmax.f32 %v3806_v38, 0.0  ;;  %v3363_v20 = vadd.f32 %v9045_v27, %v3152_v25  ;;  %v2736_v55 = vadd.f32 %v9046_v40, %v2525_v49 }
 0x499   :  { %v3728_v24 = vpop.f32.mrf.mxu1  ;;  %v3829_v1 = vmul.f32 %v3817_v42, %v9039_v10  ;;  %v3810_v29 = vadd.f32 %v8214_v57, %v3786_v16  ;;  %v9049_v42 = vld [vmem:[#allocation18_spill] sm:$0xff] }
 0x49a   :  { %v3685_v7 = vpop.f32.mrf.mxu3  ;;  %v3783_v9 = vadd.f32 %v3728_v24, %v3572_v23  ;;  %v3830_v17 = vmul.f32 %v3818_v47, %v9041_v51  ;;  %v3574_v5 = vadd.f32 %v8164_v14, %v3363_v20  ;;  %v3368_v38 = vadd.f32 %v9049_v42, %v9048_v15  ;;  %v9050_v14 = vld [vmem:[#allocation22_spill] sm:$0xff]  ;;  %v9052_v47 = vld [vmem:[#allocation28_spill] sm:$0xff] }
 0x49b   :  { %v3787_v31 = vadd.f32 %v3685_v7, %v3576_v48  ;;  %3854 = vrot.lane.b32.xlu1 %v3829_v1, %s6653_s11  ;;  %v3708_v35 = vpop.f32.mrf.mxu0  ;;  %v3822_v2 = vmax.f32 %v3810_v29, 0.0  ;;  %v9053_v29 = vld [vmem:[#allocation5_spill] sm:$0xff] }
 0x49c   :  { %v3788_v6 = vadd.f32 %v3708_v35, %v3577_v46  ;;  %3856 = vrot.lane.b32.xlu2 %v3830_v17, %s6653_s11  ;;  %v3807_v53 = vadd.f32 %v8189_v28, %v3783_v9  ;;  %v3579_v23 = vadd.f32 %v8175_v59, %v3368_v38 }
 0x49d   :  { %v3811_v50 = vadd.f32 %v8214_v57, %v3787_v31  ;;  %v3834_v32 = vmul.f32 %v3822_v2, %v9037_v33  ;;  %v9047_v33 = vld [vmem:[#allocation15_spill] sm:$0xff]  ;;  %v9054_v31 = vld [vmem:[#allocation4_spill] sm:$0xff] }
 0x49e   :  { %v3812_v37 = vadd.f32 %v8214_v57, %v3788_v6  ;;  %v3751_v3 = vpop.f32.mrf.mxu2  ;;  %v3819_v34 = vmax.f32 %v3807_v53, 0.0  ;;  %v2947_v21 = vadd.f32 %v9047_v33, %v2736_v55 }
 0x49f   :  { %v3823_v54 = vmax.f32 %v3811_v50, 0.0  ;;  %v3784_v13 = vadd.f32 %v3751_v3, %v3573_v58  ;;  %3864 = vrot.lane.b32.xlu0 %v3834_v32, %s6653_s11 }
 0x4a0   :  { %v3824_v36 = vmax.f32 %v3812_v37, 0.0  ;;  %v3158_v26 = vadd.f32 %v9050_v14, %v2947_v21  ;;  %v3831_v48 = vmul.f32 %v3819_v34, %v9051_v19 }
 0x4a1   :  { %v3731_v18 = vpop.f32.mrf.mxu1  ;;  %v3835_v39 = vmul.f32 %v3823_v54, %v9039_v10  ;;  %v3808_v44 = vadd.f32 %v8189_v28, %v3784_v13 }
 0x4a2   :  { %v3789_v60 = vadd.f32 %v3731_v18, %v3578_v56  ;;  %v3774_v4 = vpop.f32.mrf.mxu3  ;;  %v3836_v22 = vmul.f32 %v3824_v36, %v9041_v51  ;;  %v3369_v24 = vadd.f32 %v9052_v47, %v3158_v26 }
 0x4a3   :  { %v3785_v8 = vadd.f32 %v3774_v4, %v3574_v5  ;;  %3866 = vrot.lane.b32.xlu1 %v3835_v39, %s6653_s11  ;;  %v3820_v52 = vmax.f32 %v3808_v44, 0.0 }
 0x4a4   :  { %3868 = vrot.lane.b32.xlu2 %v3836_v22, %s6653_s11  ;;  %v3813_v16 = vadd.f32 %v8214_v57, %v3789_v60  ;;  %v3580_v9 = vadd.f32 %v8193_v0, %v3369_v24 }
 0x4a5   :  { %v3809_v61 = vadd.f32 %v8189_v28, %v3785_v8  ;;  %v3832_v62 = vmul.f32 %v3820_v52, %v9053_v29 }
 0x4a6   :  { %v3754_v1 = vpop.f32.mrf.mxu2  ;;  %v3825_v28 = vmax.f32 %v3813_v16, 0.0 }
 0x4a7   :  { %v3821_v10 = vmax.f32 %v3809_v61, 0.0  ;;  %v3790_v7 = vadd.f32 %v3754_v1, %v3579_v23  ;;  %3858 = vrot.lane.b32.xlu0 %v3831_v48, %s6653_s11 }
 0x4a8   :  { %v3837_v35 = vmul.f32 %v3825_v28, %v9051_v19 }
 0x4a9   :  { %v3814_v43 = vadd.f32 %v8214_v57, %v3790_v7  ;;  %v3833_v51 = vmul.f32 %v3821_v10, %v9054_v31 }
 0x4aa   :  { %v3777_v46 = vpop.f32.mrf.mxu3 }
 0x4ab   :  { %v3791_v59 = vadd.f32 %v3777_v46, %v3580_v9  ;;  %3860 = vrot.lane.b32.xlu1 %v3832_v62, %s6653_s11  ;;  %v3826_v17 = vmax.f32 %v3814_v43, 0.0 }
 0x4ac   :  { %3862 = vrot.lane.b32.xlu2 %v3833_v51, %s6653_s11 }
 0x4ad   :  { %v3815_v41 = vadd.f32 %v8214_v57, %v3791_v59  ;;  %v3838_v0 = vmul.f32 %v3826_v17, %v9053_v29  ;;  %v8474_v17 = vld [vmem:[%s8918_s6 + $0x4] sm:$0xf] }
 0x4af   :  { %v3827_v2 = vmax.f32 %v3815_v41, 0.0  ;;  %3870 = vrot.lane.b32.xlu0 %v3837_v35, %s6653_s11 }
 0x4b1   :  { %v3839_v45 = vmul.f32 %v3827_v2, %v9054_v31 }
 0x4b3   :  { %3872 = vrot.lane.b32.xlu1 %v3838_v0, %s6653_s11 }
 0x4b4   :  { %3874 = vrot.lane.b32.xlu2 %v3839_v45, %s6653_s11 }
 0x4f6   :  { %v3857_v30 = vpop.permute.xlu2 %3856 }
 0x4fe   :  { %v3869_v12 = vpop.permute.xlu2 %3868 }
 0x506   :  { %v3863_v25 = vpop.permute.xlu2 %3862 }
 0x507   :  { %3906 = vst.msk [vmem:[#allocation2 + $0x30] sm:$0xff] %vm73_vm1, %v3863_v25 }
 0x509   :  { %v3853_v57 = vpop.permute.xlu0 %3852 }
 0x50a   :  { %3900 = vst.msk [vmem:[#allocation2] sm:$0xff] %vm1914_vm13, %v3853_v57 }
 0x50d   :  { %v3855_v50 = vpop.permute.xlu1 %3854 }
 0x50e   :  { %v8277_v6 = vsel %vm73_vm1, %v3853_v57, %v3855_v50  ;;  %v8280_v63 = vsel %vm73_vm1, %v3855_v50, %v3857_v30  ;;  %v3875_v58 = vpop.permute.xlu2 %3874  ;;  %v3933_v21 = vld [vmem:[#allocation2 + $0x30] sm:$0xff] }
 0x50f   :  { %3901 = vst [vmem:[#allocation2 + $0x8] sm:$0xff] %v8277_v6  ;;  %v8309_v13 = vpack.i.bf16 %v8280_v63, %v8277_v6 }
 0x510   :  { %3902 = vst [vmem:[#allocation2 + $0x10] sm:$0xff] %v8280_v63 }
 0x511   :  { %3913 = vst.msk [vmem:[#allocation2 + $0x68] sm:$0xff] %vm73_vm1, %v3875_v58  ;;  %v3865_v53 = vpop.permute.xlu0 %3864  ;;  %v8285_v32 = vld [vmem:[#allocation2] sm:$0xff] }
 0x512   :  { %3907 = vst.msk [vmem:[#allocation2 + $0x38] sm:$0xff] %vm1914_vm13, %v3865_v53  ;;  %v6349_v11 = vpack.i.bf16 %v8277_v6, %v8285_v32 }
 0x514   :  { %6350 = vrot.lane.b32.xlu0 %v6349_v11, %s6655_s0  ;;  %6355 = vrot.lane.b32.xlu1 %v6349_v11, %s6656_s12 }
 0x515   :  { %v3867_v49 = vpop.permute.xlu1 %3866 }
 0x516   :  { %v8293_v27 = vsel %vm73_vm1, %v3865_v53, %v3867_v49  ;;  %v8296_v20 = vsel %vm73_vm1, %v3867_v49, %v3869_v12 }
 0x517   :  { %v8336_v44 = vpack.i.bf16 %v8296_v20, %v8293_v27 }
 0x518   :  { %v3940_v38 = vld [vmem:[#allocation2 + $0x68] sm:$0xff] }
 0x519   :  { %v3859_v54 = vpop.permute.xlu0 %3858  ;;  %v8298_v37 = vld [vmem:[#allocation2 + $0x38] sm:$0xff]  ;;  %v6449_v14 = vpack.i.bf16 %v3933_v21, %v3940_v38 }
 0x51a   :  { %v8301_v3 = vsel %vm73_vm1, %v3857_v30, %v3859_v54  ;;  %v8305_v56 = vpack.i.bf16 %v8285_v32, %v8298_v37  ;;  %v6404_v8 = vpack.i.bf16 %v8298_v37, %v3933_v21 }
 0x51b   :  { %3903 = vst [vmem:[#allocation2 + $0x18] sm:$0xff] %v8301_v3  ;;  %v6374_v40 = vpack.i.bf16 %v8301_v3, %v8280_v63 }
 0x51c   :  { %6365 = vrot.lane.b32.xlu1 %v8305_v56, %s6657_s13  ;;  %6360 = vrot.lane.b32.xlu0 %v8309_v13, %s6657_s13 }
 0x51d   :  { %v3861_v55 = vpop.permute.xlu1 %3860  ;;  %6375 = vrot.lane.b32.xlu2 %v6374_v40, %s6656_s12 }
 0x51e   :  { %v8319_v5 = vsel %vm73_vm1, %v3859_v54, %v3861_v55  ;;  %v8322_v36 = vsel %vm73_vm1, %v3861_v55, %v3863_v25 }
 0x51f   :  { %3904 = vst [vmem:[#allocation2 + $0x20] sm:$0xff] %v8319_v5  ;;  %v8332_v34 = vpack.i.bf16 %v8319_v5, %v8301_v3  ;;  %v6414_v15 = vpack.i.bf16 %v8322_v36, %v8319_v5  ;;  %v8376_v52 = vpack.i.bf16 %v3933_v21, %v8322_v36 }
 0x520   :  { %3905 = vst [vmem:[#allocation2 + $0x28] sm:$0xff] %v8322_v36 }
 0x521   :  { %v3871_v18 = vpop.permute.xlu0 %3870 }
 0x522   :  { %v8328_v39 = vsel %vm73_vm1, %v3869_v12, %v3871_v18 }
 0x523   :  { %v8352_v22 = vpack.i.bf16 %v8328_v39, %v8298_v37 }
 0x524   :  { %6370 = vrot.lane.b32.xlu1 %v6374_v40, %s6655_s0  ;;  %6395 = vrot.lane.b32.xlu0 %v8332_v34, %s6657_s13 }
 0x525   :  { %v3873_v60 = vpop.permute.xlu1 %3872  ;;  %6390 = vrot.lane.b32.xlu2 %v8336_v44, %s6657_s13 }
 0x526   :  { %v8342_v4 = vsel %vm73_vm1, %v3871_v18, %v3873_v60  ;;  %v8345_v33 = vsel %vm73_vm1, %v3873_v60, %v3875_v58 }
 0x527   :  { %v6419_v42 = vpack.i.bf16 %v8342_v4, %v8328_v39  ;;  %v8373_v26 = vpack.i.bf16 %v3940_v38, %v8345_v33  ;;  %v6459_v61 = vpack.i.bf16 %v8285_v32, %v8342_v4  ;;  %v6469_v23 = vpack.i.bf16 %v8345_v33, %v8342_v4 }
 0x52c   :  { %6380 = vrot.lane.b32.xlu1 %v8336_v44, %s6655_s0  ;;  %6405 = vrot.lane.b32.xlu0 %v6404_v8, %s6655_s0 }
 0x52d   :  { %6400 = vrot.lane.b32.xlu2 %v8352_v22, %s6656_s12 }
 0x534   :  { %6385 = vrot.lane.b32.xlu1 %v8336_v44, %s6656_s12  ;;  %6415 = vrot.lane.b32.xlu0 %v6414_v15, %s6656_s12 }
 0x535   :  { %6410 = vrot.lane.b32.xlu2 %v6414_v15, %s6655_s0 }
 0x53c   :  { %6435 = vrot.lane.b32.xlu1 %v8309_v13, %s6658_s14  ;;  %6430 = vrot.lane.b32.xlu0 %v8336_v44, %s6658_s14 }
 0x53d   :  { %6420 = vrot.lane.b32.xlu2 %v6419_v42, %s6655_s0 }
 0x544   :  { %6450 = vrot.lane.b32.xlu1 %v6449_v14, %s6656_s12  ;;  %6455 = vrot.lane.b32.xlu0 %v8373_v26, %s6655_s0 }
 0x545   :  { %6425 = vrot.lane.b32.xlu2 %v8376_v52, %s6657_s13 }
 0x54c   :  { %6465 = vrot.lane.b32.xlu1 %v8332_v34, %s6658_s14  ;;  %6460 = vrot.lane.b32.xlu0 %v6459_v61, %s6658_s14 }
 0x54d   :  { %6440 = vrot.lane.b32.xlu2 %v8352_v22, %s6658_s14 }
 0x554   :  { %6480 = vrot.lane.b32.xlu1 %v8336_v44, %s6659_s15  ;;  %6470 = vrot.lane.b32.xlu0 %v6469_v23, %s6656_s12 }
 0x555   :  { %6445 = vrot.lane.b32.xlu2 %v6419_v42, %s6657_s13 }
 0x55c   :  { %6495 = vrot.lane.b32.xlu1 %v6419_v42, %s6659_s15  ;;  %6475 = vrot.lane.b32.xlu0 %v8376_v52, %s6658_s14 }
 0x55d   :  { %6485 = vrot.lane.b32.xlu2 %v8309_v13, %s6659_s15 }
 0x564   :  { %6505 = vrot.lane.b32.xlu1 %v8373_v26, %s6657_s13  ;;  %6490 = vrot.lane.b32.xlu0 %v8305_v56, %s6659_s15 }
 0x565   :  { %6500 = vrot.lane.b32.xlu2 %v8332_v34, %s6659_s15 }
 0x56c   :  { %6510 = vrot.lane.b32.xlu1 %v8376_v52, %s6659_s15  ;;  %6520 = vrot.lane.b32.xlu0 %v8309_v13, %s6660_s16 }
 0x56d   :  { %6515 = vrot.lane.b32.xlu2 %v8336_v44, %s6660_s16 }
 0x574   :  { %6525 = vrot.lane.b32.xlu1 %v8352_v22, %s6660_s16  ;;  %6540 = vrot.lane.b32.xlu0 %v8332_v34, %s6660_s16 }
 0x575   :  { %6530 = vrot.lane.b32.xlu2 %v8373_v26, %s6658_s14 }
 0x577   :  { %v8419_v16 = vpop.permute.xlu2 %6375 }
 0x578   :  { %v6378_v55 = vunpack.i.h.bf16 %v8419_v16 }
 0x57c   :  { %6560 = vrot.lane.b32.xlu1 %v8309_v13, %s6661_s17  ;;  %6550 = vrot.lane.b32.xlu0 %v8373_v26, %s6659_s15 }
 0x57d   :  { %6535 = vrot.lane.b32.xlu2 %v6459_v61, %s6660_s16 }
 0x57f   :  { %v8426_v19 = vpop.permute.xlu2 %6390 }
 0x584   :  { %6575 = vrot.lane.b32.xlu1 %v8373_v26, %s6660_s16  ;;  %6555 = vrot.lane.b32.xlu0 %v8336_v44, %s6661_s17 }
 0x585   :  { %6545 = vrot.lane.b32.xlu2 %v8376_v52, %s6660_s16 }
 0x586   :  { %v6351_v48 = vpop.permute.xlu0 %6350  ;;  %v8434_v47 = vpop.permute.xlu1 %6355 }
 0x587   :  { %v8436_v24 = vpop.permute.xlu2 %6400  ;;  %v6353_v41 = vunpack.i.h.bf16 %v6351_v48  ;;  %v6352_v35 = vunpack.i.l.bf16 %v6351_v48 }
 0x588   :  { %v6403_v18 = vunpack.i.h.bf16 %v8436_v24 }
 0x589   :  { %v3985_v11 = vsel %vm128_vm3, %v6352_v35, %v6353_v41  ;;  %v8605_v35 = vld [vmem:[%s8918_s6 + $0xc] sm:$0xf] }
 0x58c   :  { %6580 = vrot.lane.b32.xlu1 %v8332_v34, %s6661_s17  ;;  %6570 = vrot.lane.b32.xlu0 %v6419_v42, %s6661_s17 }
 0x58d   :  { %6565 = vrot.lane.b32.xlu2 %v8305_v56, %s6661_s17 }
 0x58e   :  { %v8443_v10 = vpop.permute.xlu1 %6365  ;;  %v8445_v1 = vpop.permute.xlu0 %6360 }
 0x58f   :  { %v8447_v7 = vpop.permute.xlu2 %6410  ;;  %v6368_v21 = vunpack.i.h.bf16 %v8443_v10  ;;  %v6362_v8 = vunpack.i.l.bf16 %v8445_v1 }
 0x590   :  { %v6412_v59 = vunpack.i.l.bf16 %v8447_v7  ;;  %v6413_v42 = vunpack.i.h.bf16 %v8447_v7  ;;  %v6357_v7 = vunpack.i.l.bf16 %v8434_v47 }
 0x591   :  { %v4468_v23 = vsel %vm658_vm7, %v6368_v21, %v6362_v8 }
 0x594   :  { %6590 = vrot.lane.b32.xlu1 %v8336_v44, %s6662_s22  ;;  %6585 = vrot.lane.b32.xlu0 %v8376_v52, %s6661_s17 }
 0x595   :  { %6595 = vrot.lane.b32.xlu2 %v8373_v26, %s6661_s17 }
 0x596   :  { %v6371_v9 = vpop.permute.xlu1 %6370  ;;  %v8455_v29 = vpop.permute.xlu0 %6395 }
 0x597   :  { %v8457_v62 = vpop.permute.xlu2 %6420  ;;  %v6373_v28 = vunpack.i.h.bf16 %v6371_v9  ;;  %v6372_v45 = vunpack.i.l.bf16 %v6371_v9  ;;  %v3989_v9 = vsel %vm128_vm3, %v6412_v59, %v6413_v42 }
 0x598   :  { %v6423_v43 = vunpack.i.h.bf16 %v8457_v62  ;;  %v6422_v46 = vunpack.i.l.bf16 %v8457_v62  ;;  %v8577_v62 = vld [vmem:[%s8918_s6 + $0x8] sm:$0xf] }
 0x599   :  { %v3988_v51 = vsel %vm128_vm3, %v6373_v28, %v6412_v59  ;;  %v3986_v49 = vsel %vm128_vm3, %v6353_v41, %v6372_v45  ;;  %v6402_v59 = vunpack.i.l.bf16 %v8436_v24 }
 0x59a   :  { %v3994_v31 = vsel %vm128_vm3, %v6422_v46, %v6423_v43 }
 0x59b   :  { %4086 = vmatpush.msrb.mxu3 %v3994_v31 }
 0x59c   :  { %6610 = vrot.lane.b32.xlu1 %v6459_v61, %s6662_s22  ;;  %6605 = vrot.lane.b32.xlu0 %v8352_v22, %s6662_s22 }
 0x59d   :  { %6600 = vrot.lane.b32.xlu2 %v8309_v13, %s6662_s22  ;;  %4087 = vmatpush.msrb.mxu3 %v3988_v51  ;;  %v8515_v13 = vld [vmem:[%s8918_s6] sm:$0xf] }
 0x59e   :  { %v6381_v2 = vpop.permute.xlu1 %6380  ;;  %v8478_v0 = vpop.permute.xlu0 %6405  ;;  %5991 = vmatmul.msk.f32.vlgmr.msrb.gmra.mxu3 %vm2026_vm14, %v8474_v17 }
 0x59f   :  { %4169 = vmatpush.msra.mxu3 %v8293_v27  ;;  %v6383_v30 = vunpack.i.h.bf16 %v6381_v2  ;;  %v6382_v12 = vunpack.i.l.bf16 %v6381_v2  ;;  %v6408_v25 = vunpack.i.h.bf16 %v8478_v0  ;;  %v8482_v57 = vpop.permute.xlu2 %6425  ;;  %v6407_v61 = vunpack.i.l.bf16 %v8478_v0 }
 0x5a1   :  { %4170 = vmatpush.msra.mxu3 %v8277_v6  ;;  %v3991_v50 = vsel %vm128_vm3, %v6408_v25, %v6382_v12  ;;  %v3992_v58 = vsel %vm128_vm3, %v6382_v12, %v6383_v30  ;;  %v3993_v53 = vsel %vm128_vm3, %v6383_v30, %v6422_v46  ;;  %v3987_v6 = vsel %vm128_vm3, %v6372_v45, %v6373_v28 }
 0x5a2   :  { %4026 = vmatpush.msrb.mxu0 %v3991_v50  ;;  %4046 = vmatpush.msrb.mxu1 %v3992_v58  ;;  %v3990_v46 = vsel %vm128_vm3, %v6413_v42, %v6407_v61 }
 0x5a3   :  { %4249 = vmatpush.msrb.mxu3 %v8345_v33  ;;  %4066 = vmatpush.msrb.mxu2 %v3993_v53  ;;  %v6392_v33 = vunpack.i.l.bf16 %v8426_v19 }
 0x5a4   :  { %4027 = vmatpush.msrb.mxu0 %v3985_v11  ;;  %4047 = vmatpush.msrb.mxu1 %v3986_v49  ;;  %v6393_v49 = vunpack.i.h.bf16 %v8426_v19 }
 0x5a5   :  { %4250 = vmatpush.msrb.mxu3 %v8322_v36  ;;  %6625 = vrot.lane.b32.xlu1 %v8376_v52, %s6662_s22  ;;  %v6377_v36 = vunpack.i.l.bf16 %v8419_v16 }
 0x5a6   :  { %6620 = vrot.lane.b32.xlu0 %v8373_v26, %s6662_s22  ;;  %4067 = vmatpush.msrb.mxu2 %v3987_v6  ;;  %v8499_v27 = vpop.permute.xlu1 %6385  ;;  %v8501_v54 = vpop.permute.xlu0 %6415  ;;  %v4475_v16 = vsel %vm658_vm7, %v6392_v33, %v6393_v49 }
 0x5a7   :  { %6615 = vrot.lane.b32.xlu2 %v8332_v34, %s6662_s22  ;;  %5990 = vmatmul.msk.f32.vlgmr.msrb.gmra.mxu2 %vm2026_vm14, %v8474_v17  ;;  %v8507_v56 = vpop.permute.xlu2 %6440  ;;  %v6388_v40 = vunpack.i.h.bf16 %v8499_v27  ;;  %v6387_v28 = vunpack.i.l.bf16 %v8499_v27  ;;  %v6417_v0 = vunpack.i.l.bf16 %v8501_v54 }
 0x5a8   :  { %5988 = vmatmul.msk.f32.vlgmr.msrb.gmra.mxu0 %vm2026_vm14, %v8474_v17  ;;  %4149 = vmatpush.msra.mxu2 %v8298_v37  ;;  %v5536_v37 = vld [vmem:[%s8919_s7] sm:$0xf] }
 0x5a9   :  { %5989 = vmatmul.msk.f32.vlgmr.msrb.gmra.mxu1 %vm2026_vm14, %v8474_v17  ;;  %5995 = vmatmul.msk.f32.vlgmr.msra.gmra.mxu3 %vm2026_vm14, %v8515_v13 }
 0x5aa   :  { %4150 = vmatpush.msra.mxu2 %v8285_v32  ;;  %v4293_v32 = vsel %vm466_vm6, %v6388_v40, %v6403_v18 }
 0x5ac   :  { %4229 = vmatpush.msrb.mxu2 %v8342_v4  ;;  %v4287_v4 = vsel %vm466_vm6, %v6377_v36, %v6378_v55 }
 0x5ae   :  { %4230 = vmatpush.msrb.mxu2 %v8319_v5  ;;  %v8531_v34 = vpop.permute.xlu1 %6435  ;;  %v8533_v44 = vpop.permute.xlu0 %6430  ;;  %v6367_v5 = vunpack.i.l.bf16 %v8443_v10 }
 0x5af   :  { %5539 = vperm.xlu2 %6066, %v5536_v37   ;;  %5994 = vmatmul.msk.f32.vlgmr.msra.gmra.mxu2 %vm2026_vm14, %v8515_v13  ;;  %v8540_v60 = vpop.permute.xlu2 %6445  ;;  %v6432_v21 = vunpack.i.l.bf16 %v8533_v44  ;;  %v6437_v42 = vunpack.i.l.bf16 %v8531_v34 }
 0x5b0   :  { %4366 = vmatpush.msra.mxu2 %v4293_v32  ;;  %v4474_v38 = vsel %vm658_vm7, %v6367_v5, %v6392_v33  ;;  %v6447_v6 = vunpack.i.l.bf16 %v8540_v60  ;;  %v6448_v27 = vunpack.i.h.bf16 %v8540_v60  ;;  %v6433_v33 = vunpack.i.h.bf16 %v8533_v44 }
 0x5b1   :  { %5999 = vmatmul.msk.f32.vlgmr.msrb.gmra.mxu3 %vm2026_vm14, %v8515_v13 }
 0x5b2   :  { %4367 = vmatpush.msra.mxu2 %v4287_v4 }
 0x5b6   :  { %v8551_v22 = vpop.permute.xlu1 %6450  ;;  %v6456_v15 = vpop.permute.xlu0 %6455 }
 0x5b7   :  { %5998 = vmatmul.msk.f32.vlgmr.msrb.gmra.mxu2 %vm2026_vm14, %v8515_v13  ;;  %v6458_v14 = vunpack.i.h.bf16 %v6456_v15  ;;  %v6457_v26 = vunpack.i.l.bf16 %v6456_v15  ;;  %v8559_v52 = vpop.permute.xlu2 %6485  ;;  %v6452_v45 = vunpack.i.l.bf16 %v8551_v22  ;;  %v6453_v50 = vunpack.i.h.bf16 %v8551_v22 }
 0x5b8   :  { %4509 = vmatpush.msrb.mxu2 %v4474_v38  ;;  %v6442_v22 = vunpack.i.l.bf16 %v8507_v56  ;;  %v6438_v15 = vunpack.i.h.bf16 %v8531_v34  ;;  %v4658_v38 = vsel %vm850_vm8, %v6432_v21, %v6433_v33  ;;  %v6428_v34 = vunpack.i.h.bf16 %v8482_v57 }
 0x5b9   :  { %v3995_v48 = vsel %vm128_vm3, %v6423_v43, %v6457_v26  ;;  %v3996_v10 = vsel %vm128_vm3, %v6457_v26, %v6458_v14  ;;  %v6358_v43 = vunpack.i.h.bf16 %v8434_v47  ;;  %v4291_v47 = vsel %vm466_vm6, %v6402_v59, %v6387_v28 }
 0x5ba   :  { %4510 = vmatpush.msrb.mxu2 %v4468_v23  ;;  %4106 = vmatpush.msra.mxu0 %v3995_v48  ;;  %v4657_v44 = vsel %vm850_vm8, %v6442_v22, %v6432_v21  ;;  %v6021_v21 = vld [vmem:[%s8918_s6 + $0x14] sm:$0xf] }
 0x5bb   :  { %4126 = vmatpush.msra.mxu1 %v3996_v10  ;;  %v4652_v10 = vsel %vm850_vm8, %v6437_v42, %v6438_v15 }
 0x5bc   :  { %4107 = vmatpush.msra.mxu0 %v3989_v9 }
 0x5bd   :  { %4127 = vmatpush.msra.mxu1 %v3990_v46  ;;  %5992 = vmatmul.msk.f32.vlgmr.msra.gmra.mxu0 %vm2026_vm14, %v8474_v17 }
 0x5be   :  { %5993 = vmatmul.msk.f32.vlgmr.msra.gmra.mxu1 %vm2026_vm14, %v8474_v17  ;;  %4189 = vmatpush.msrb.mxu0 %v8296_v20  ;;  %v8587_v31 = vpop.permute.xlu1 %6465  ;;  %v8589_v51 = vpop.permute.xlu0 %6460  ;;  %v4292_v20 = vsel %vm466_vm6, %v6387_v28, %v6388_v40  ;;  %v4285_v17 = vsel %vm466_vm6, %v6357_v7, %v6358_v43  ;;  %v6397_v40 = vunpack.i.l.bf16 %v8455_v29 }
 0x5bf   :  { %4209 = vmatpush.msrb.mxu1 %v8328_v39  ;;  %6003 = vmatmul.msk.f32.vlgmr.msra.gmra.mxu2 %vm2026_vm14, %v8577_v62  ;;  %v8594_v41 = vpop.permute.xlu2 %6500  ;;  %v4286_v39 = vsel %vm466_vm6, %v6358_v43, %v6377_v36  ;;  %v6398_v36 = vunpack.i.h.bf16 %v8455_v29  ;;  %v4477_v29 = vsel %vm658_vm7, %v6447_v6, %v6448_v27  ;;  %v6443_v43 = vunpack.i.h.bf16 %v8507_v56 }
 0x5c0   :  { %4190 = vmatpush.msrb.mxu0 %v8280_v63  ;;  %v6418_v63 = vunpack.i.h.bf16 %v8501_v54  ;;  %v4288_v54 = vsel %vm466_vm6, %v6378_v55, %v6417_v0  ;;  %v4476_v55 = vsel %vm658_vm7, %v6393_v49, %v6447_v6 }
 0x5c1   :  { %4210 = vmatpush.msrb.mxu1 %v8301_v3  ;;  %v4471_v5 = vsel %vm658_vm7, %v6397_v40, %v6398_v36  ;;  %v4659_v56 = vsel %vm850_vm8, %v6433_v33, %v6443_v43 }
 0x5c2   :  { %4326 = vmatpush.msra.mxu0 %v4291_v47  ;;  %v4289_v24 = vsel %vm466_vm6, %v6417_v0, %v6418_v63  ;;  %v4290_v37 = vsel %vm466_vm6, %v6418_v63, %v6453_v50 }
 0x5c3   :  { %4346 = vmatpush.msra.mxu1 %v4292_v20  ;;  %v6468_v20 = vunpack.i.h.bf16 %v8587_v31 }
 0x5c4   :  { %4327 = vmatpush.msra.mxu0 %v4285_v17  ;;  %v6467_v17 = vunpack.i.l.bf16 %v8587_v31 }
 0x5c5   :  { %4347 = vmatpush.msra.mxu1 %v4286_v39  ;;  %5996 = vmatmul.msk.f32.vlgmr.msrb.gmra.mxu0 %vm2026_vm14, %v8515_v13 }
 0x5c6   :  { %5997 = vmatmul.msk.f32.vlgmr.msrb.gmra.mxu1 %vm2026_vm14, %v8515_v13  ;;  %v8612_v3 = vpop.permute.xlu1 %6480  ;;  %v6471_v2 = vpop.permute.xlu0 %6470  ;;  %v6363_v13 = vunpack.i.h.bf16 %v8445_v1  ;;  %v6463_v1 = vunpack.i.h.bf16 %v8589_v51 }
 0x5c7   :  { %v6473_v30 = vunpack.i.h.bf16 %v6471_v2  ;;  %v6472_v12 = vunpack.i.l.bf16 %v6471_v2  ;;  %6008 = vmatmul.msk.f32.vlgmr.msrb.gmra.mxu2 %vm2026_vm14, %v8605_v35  ;;  %v8618_v25 = vpop.permute.xlu2 %6515  ;;  %v6483_v63 = vunpack.i.h.bf16 %v8612_v3  ;;  %v6482_v2 = vunpack.i.l.bf16 %v8612_v3 }
 0x5c8   :  { %v4469_v4 = vsel %vm658_vm7, %v6362_v8, %v6363_v13  ;;  %v4470_v19 = vsel %vm658_vm7, %v6363_v13, %v6397_v40  ;;  %v6427_v8 = vunpack.i.l.bf16 %v8482_v57  ;;  %v4651_v48 = vsel %vm850_vm8, %v6463_v1, %v6437_v42  ;;  %v6014_v40 = vld [vmem:[%s8918_s6 + $0x10] sm:$0xf] }
 0x5c9   :  { %v4294_v58 = vsel %vm466_vm6, %v6403_v18, %v6472_v12  ;;  %v4295_v53 = vsel %vm466_vm6, %v6472_v12, %v6473_v30  ;;  %v4296_v11 = vsel %vm466_vm6, %v6473_v30, %v6452_v45  ;;  %v6488_v12 = vunpack.i.h.bf16 %v8559_v52 }
 0x5ca   :  { %4386 = vmatpush.msra.mxu3 %v4294_v58  ;;  %4406 = vmatpush.msrb.mxu0 %v4295_v53  ;;  %v4472_v57 = vsel %vm658_vm7, %v6398_v36, %v6427_v8  ;;  %v4473_v47 = vsel %vm658_vm7, %v6427_v8, %v6428_v34  ;;  %v6487_v58 = vunpack.i.l.bf16 %v8559_v52  ;;  %v4841_v52 = vsel %vm1042_vm9, %v6482_v2, %v6483_v63 }
 0x5cb   :  { %4426 = vmatpush.msrb.mxu1 %v4296_v11  ;;  %v4654_v11 = vsel %vm850_vm8, %v6467_v17, %v6468_v20 }
 0x5cc   :  { %4387 = vmatpush.msra.mxu3 %v4288_v54  ;;  %4407 = vmatpush.msrb.mxu0 %v4289_v24  ;;  %v4835_v36 = vsel %vm1042_vm9, %v6487_v58, %v6488_v12 }
 0x5cd   :  { %4427 = vmatpush.msrb.mxu1 %v4290_v37  ;;  %6001 = vmatmul.msk.f32.vlgmr.msra.gmra.mxu0 %vm2026_vm14, %v8577_v62 }
 0x5ce   :  { %6002 = vmatmul.msk.f32.vlgmr.msra.gmra.mxu1 %vm2026_vm14, %v8577_v62  ;;  %6004 = vmatmul.msk.f32.vlgmr.msra.gmra.mxu3 %vm2026_vm14, %v8577_v62  ;;  %v8647_v18 = vpop.permute.xlu1 %6495  ;;  %v8649_v32 = vpop.permute.xlu0 %6475 }
 0x5cf   :  { %4529 = vmatpush.msrb.mxu3 %v4475_v16  ;;  %4549 = vmatpush.msra.mxu0 %v4476_v55  ;;  %v8652_v60 = vpop.permute.xlu2 %6530  ;;  %v6477_v39 = vunpack.i.l.bf16 %v8649_v32  ;;  %v6498_v54 = vunpack.i.h.bf16 %v8647_v18  ;;  %v6497_v24 = vunpack.i.l.bf16 %v8647_v18  ;;  %v6503_v16 = vunpack.i.h.bf16 %v8594_v41 }
 0x5d0   :  { %4569 = vmatpush.msra.mxu1 %v4477_v29  ;;  %v6533_v7 = vunpack.i.h.bf16 %v8652_v60  ;;  %v6532_v59 = vunpack.i.l.bf16 %v8652_v60  ;;  %v6502_v55 = vunpack.i.l.bf16 %v8594_v41 }
 0x5d1   :  { %4530 = vmatpush.msrb.mxu3 %v4469_v4  ;;  %4550 = vmatpush.msra.mxu0 %v4470_v19  ;;  %v4655_v49 = vsel %vm850_vm8, %v6468_v20, %v6477_v39  ;;  %v4842_v29 = vsel %vm1042_vm9, %v6483_v63, %v6497_v24  ;;  %v4843_v60 = vsel %vm1042_vm9, %v6497_v24, %v6498_v54  ;;  %v6518_v19 = vunpack.i.h.bf16 %v8618_v25  ;;  %v6028_v24 = vld [vmem:[%s8918_s6 + $0x18] sm:$0xf] }
 0x5d2   :  { %4570 = vmatpush.msra.mxu1 %v4471_v5  ;;  %v4662_v50 = vsel %vm850_vm8, %v6532_v59, %v6533_v7  ;;  %v4836_v41 = vsel %vm1042_vm9, %v6488_v12, %v6502_v55  ;;  %v4837_v4 = vsel %vm1042_vm9, %v6502_v55, %v6503_v16  ;;  %v6517_v5 = vunpack.i.l.bf16 %v8618_v25 }
 0x5d4   :  { %v5024_v1 = vsel %vm1234_vm10, %v6517_v5, %v6518_v19 }
 0x5d5   :  { %6005 = vmatmul.msk.f32.vlgmr.msrb.gmra.mxu0 %vm2026_vm14, %v8577_v62 }
 0x5d6   :  { %6006 = vmatmul.msk.f32.vlgmr.msrb.gmra.mxu1 %vm2026_vm14, %v8577_v62  ;;  %6009 = vmatmul.msk.f32.vlgmr.msrb.gmra.mxu3 %vm2026_vm14, %v8605_v35  ;;  %v6506_v14 = vpop.permute.xlu1 %6505  ;;  %v8674_v26 = vpop.permute.xlu0 %6490  ;;  %v6462_v62 = vunpack.i.l.bf16 %v8589_v51  ;;  %v6478_v51 = vunpack.i.h.bf16 %v8649_v32 }
 0x5d7   :  { %4692 = vmatpush.msrb.mxu0 %v4657_v44  ;;  %4712 = vmatpush.msrb.mxu1 %v4658_v38  ;;  %v6508_v61 = vunpack.i.h.bf16 %v6506_v14  ;;  %v6507_v23 = vunpack.i.l.bf16 %v6506_v14  ;;  %v8681_v46 = vpop.permute.xlu2 %6535  ;;  %v6492_v31 = vunpack.i.l.bf16 %v8674_v26  ;;  %v6493_v53 = vunpack.i.h.bf16 %v8674_v26 }
 0x5d8   :  { %v4660_v0 = vsel %vm850_vm8, %v6443_v43, %v6462_v62  ;;  %v4661_v3 = vsel %vm850_vm8, %v6462_v62, %v6532_v59  ;;  %v4656_v6 = vsel %vm850_vm8, %v6477_v39, %v6478_v51  ;;  %v6538_v44 = vunpack.i.h.bf16 %v8681_v46 }
 0x5d9   :  { %4693 = vmatpush.msrb.mxu0 %v4651_v48  ;;  %4713 = vmatpush.msrb.mxu1 %v4652_v10  ;;  %v4478_v9 = vsel %vm658_vm7, %v6448_v27, %v6507_v23  ;;  %v4479_v28 = vsel %vm658_vm7, %v6507_v23, %v6508_v61  ;;  %v4840_v27 = vsel %vm1042_vm9, %v6492_v31, %v6482_v2  ;;  %v6537_v62 = vunpack.i.l.bf16 %v8681_v46 }
 0x5da   :  { %4589 = vmatpush.msra.mxu2 %v4478_v9  ;;  %4609 = vmatpush.msra.mxu3 %v4479_v28  ;;  %v4834_v37 = vsel %vm1042_vm9, %v6493_v53, %v6487_v58 }
 0x5dc   :  { %4590 = vmatpush.msra.mxu2 %v4472_v57  ;;  %4610 = vmatpush.msra.mxu3 %v4473_v47 }
 0x5dd   :  { %6010 = vmatmul.msk.f32.vlgmr.msra.gmra.mxu0 %vm2026_vm14, %v8605_v35  ;;  %6012 = vmatmul.msk.f32.vlgmr.msra.gmra.mxu2 %vm2026_vm14, %v8605_v35 }
 0x5de   :  { %6011 = vmatmul.msk.f32.vlgmr.msra.gmra.mxu1 %vm2026_vm14, %v8605_v35  ;;  %6013 = vmatmul.msk.f32.vlgmr.msra.gmra.mxu3 %vm2026_vm14, %v8605_v35  ;;  %v8706_v45 = vpop.permute.xlu1 %6510  ;;  %v8708_v30 = vpop.permute.xlu0 %6520  ;;  %v4653_v35 = vsel %vm850_vm8, %v6438_v15, %v6467_v17 }
 0x5df   :  { %4732 = vmatpush.msrb.mxu2 %v4659_v56  ;;  %4752 = vmatpush.msrb.mxu3 %v4660_v0  ;;  %v8723_v13 = vpop.permute.xlu2 %6545  ;;  %v6523_v22 = vunpack.i.h.bf16 %v8708_v30  ;;  %v6522_v15 = vunpack.i.l.bf16 %v8708_v30  ;;  %v6513_v34 = vunpack.i.h.bf16 %v8706_v45  ;;  %v6512_v61 = vunpack.i.l.bf16 %v8706_v45 }
 0x5e0   :  { %4772 = vmatpush.msra.mxu0 %v4661_v3  ;;  %4792 = vmatpush.msra.mxu1 %v4662_v50  ;;  %v6548_v47 = vunpack.i.h.bf16 %v8723_v13  ;;  %v6547_v20 = vunpack.i.l.bf16 %v8723_v13 }
 0x5e1   :  { %4733 = vmatpush.msrb.mxu2 %v4653_v35  ;;  %4753 = vmatpush.msrb.mxu3 %v4654_v11  ;;  %v5017_v23 = vsel %vm1234_vm10, %v6538_v44, %v6522_v15  ;;  %v5018_v48 = vsel %vm1234_vm10, %v6522_v15, %v6523_v22  ;;  %v4838_v7 = vsel %vm1042_vm9, %v6503_v16, %v6512_v61 }
 0x5e2   :  { %4773 = vmatpush.msra.mxu0 %v4655_v49  ;;  %4793 = vmatpush.msra.mxu1 %v4656_v6  ;;  %v4839_v59 = vsel %vm1042_vm9, %v6512_v61, %v6513_v34 }
 0x5e3   :  { %4875 = vmatpush.msra.mxu2 %v4840_v27  ;;  %4895 = vmatpush.msra.mxu3 %v4841_v52 }
 0x5e5   :  { %4876 = vmatpush.msra.mxu2 %v4834_v37  ;;  %4896 = vmatpush.msra.mxu3 %v4835_v36 }
 0x5e6   :  { %6015 = vmatmul.msk.f32.vlgmr.msrb.gmra.mxu0 %vm2026_vm14, %v6014_v40  ;;  %6016 = vmatmul.msk.f32.vlgmr.msrb.gmra.mxu1 %vm2026_vm14, %v6014_v40  ;;  %v6526_v18 = vpop.permute.xlu1 %6525  ;;  %v8734_v32 = vpop.permute.xlu0 %6540 }
 0x5e7   :  { %6017 = vmatmul.msk.f32.vlgmr.msrb.gmra.mxu2 %vm2026_vm14, %v6014_v40  ;;  %6018 = vmatmul.msk.f32.vlgmr.msrb.gmra.mxu3 %vm2026_vm14, %v6014_v40  ;;  %v6527_v33 = vunpack.i.l.bf16 %v6526_v18  ;;  %v8749_v42 = vpop.permute.xlu2 %6565  ;;  %v6528_v28 = vunpack.i.h.bf16 %v6526_v18  ;;  %v6543_v57 = vunpack.i.h.bf16 %v8734_v32  ;;  %v6542_v43 = vunpack.i.l.bf16 %v8734_v32 }
 0x5e8   :  { %4915 = vmatpush.msrb.mxu0 %v4842_v29  ;;  %4935 = vmatpush.msrb.mxu1 %v4843_v60  ;;  %v6567_v17 = vunpack.i.l.bf16 %v8749_v42  ;;  %v6568_v49 = vunpack.i.h.bf16 %v8749_v42 }
 0x5e9   :  { %v5023_v38 = vsel %vm1234_vm10, %v6527_v33, %v6517_v5  ;;  %v5025_v46 = vsel %vm1234_vm10, %v6518_v19, %v6528_v28  ;;  %v5026_v51 = vsel %vm1234_vm10, %v6528_v28, %v6537_v62  ;;  %v5019_v3 = vsel %vm1234_vm10, %v6523_v22, %v6542_v43 }
 0x5ea   :  { %4916 = vmatpush.msrb.mxu0 %v4836_v41  ;;  %4936 = vmatpush.msrb.mxu1 %v4837_v4  ;;  %v5020_v50 = vsel %vm1234_vm10, %v6542_v43, %v6543_v57  ;;  %v5021_v52 = vsel %vm1234_vm10, %v6543_v57, %v6547_v20 }
 0x5ee   :  { %6019 = vmatmul.msk.f32.vlgmr.msra.gmra.mxu0 %vm2026_vm14, %v6014_v40  ;;  %6020 = vmatmul.msk.f32.vlgmr.msra.gmra.mxu1 %vm2026_vm14, %v6014_v40  ;;  %v8754_v25 = vpop.permute.xlu1 %6560  ;;  %v6551_v8 = vpop.permute.xlu0 %6550 }
 0x5ef   :  { %6022 = vmatmul.msk.f32.vlgmr.msra.gmra.mxu2 %vm2026_vm14, %v6021_v21  ;;  %6023 = vmatmul.msk.f32.vlgmr.msra.gmra.mxu3 %vm2026_vm14, %v6021_v21  ;;  %v6553_v14 = vunpack.i.h.bf16 %v6551_v8  ;;  %v6552_v26 = vunpack.i.l.bf16 %v6551_v8  ;;  %v6596_v63 = vpop.permute.xlu2 %6595  ;;  %v6563_v30 = vunpack.i.h.bf16 %v8754_v25  ;;  %v6562_v12 = vunpack.i.l.bf16 %v8754_v25 }
 0x5f0   :  { %5058 = vmatpush.msra.mxu0 %v5023_v38  ;;  %5078 = vmatpush.msra.mxu1 %v5024_v1  ;;  %v6598_v6 = vunpack.i.h.bf16 %v6596_v63  ;;  %v6597_v27 = vunpack.i.l.bf16 %v6596_v63 }
 0x5f1   :  { %v4844_v10 = vsel %vm1042_vm9, %v6498_v54, %v6552_v26  ;;  %v4845_v9 = vsel %vm1042_vm9, %v6552_v26, %v6553_v14  ;;  %v5022_v54 = vsel %vm1234_vm10, %v6547_v20, %v6548_v47  ;;  %v5200_v13 = vsel %vm1426_vm11, %v6568_v49, %v6562_v12 }
 0x5f2   :  { %5059 = vmatpush.msra.mxu0 %v5017_v23  ;;  %5079 = vmatpush.msra.mxu1 %v5018_v48  ;;  %v5201_v40 = vsel %vm1426_vm11, %v6562_v12, %v6563_v30  ;;  %v5211_v29 = vsel %vm1426_vm11, %v6597_v27, %v6598_v6 }
 0x5f3   :  { %4955 = vmatpush.msrb.mxu2 %v4844_v10  ;;  %4975 = vmatpush.msrb.mxu3 %v4845_v9 }
 0x5f5   :  { %4956 = vmatpush.msrb.mxu2 %v4838_v7  ;;  %4976 = vmatpush.msrb.mxu3 %v4839_v59 }
 0x5f6   :  { %6024 = vmatmul.msk.f32.vlgmr.msrb.gmra.mxu0 %vm2026_vm14, %v6021_v21  ;;  %6025 = vmatmul.msk.f32.vlgmr.msrb.gmra.mxu1 %vm2026_vm14, %v6021_v21  ;;  %v6576_v39 = vpop.permute.xlu1 %6575  ;;  %v6556_v56 = vpop.permute.xlu0 %6555 }
 0x5f7   :  { %6026 = vmatmul.msk.f32.vlgmr.msrb.gmra.mxu2 %vm2026_vm14, %v6021_v21  ;;  %6027 = vmatmul.msk.f32.vlgmr.msrb.gmra.mxu3 %vm2026_vm14, %v6021_v21  ;;  %v6578_v2 = vunpack.i.h.bf16 %v6576_v39  ;;  %v6577_v31 = vunpack.i.l.bf16 %v6576_v39  ;;  %v6558_v0 = vunpack.i.h.bf16 %v6556_v56  ;;  %v6557_v45 = vunpack.i.l.bf16 %v6556_v56  ;;  %v6601_v60 = vpop.permute.xlu2 %6600  ;;  %v6035_v21 = vld [vmem:[%s8918_s6 + $0x1c] sm:$0xf]  ;;  %v6042_v39 = vld [vmem:[%s8918_s6 + $0x20] sm:$0xf] }
 0x5f8   :  { %5098 = vmatpush.msra.mxu2 %v5025_v46  ;;  %5118 = vmatpush.msra.mxu3 %v5026_v51  ;;  %v6603_v44 = vunpack.i.h.bf16 %v6601_v60  ;;  %v6602_v38 = vunpack.i.l.bf16 %v6601_v60 }
 0x5f9   :  { %v5027_v58 = vsel %vm1234_vm10, %v6537_v62, %v6577_v31  ;;  %v5028_v53 = vsel %vm1234_vm10, %v6577_v31, %v6578_v2  ;;  %v5206_v35 = vsel %vm1426_vm11, %v6567_v17, %v6557_v45  ;;  %v5207_v11 = vsel %vm1426_vm11, %v6557_v45, %v6558_v0 }
 0x5fa   :  { %5099 = vmatpush.msra.mxu2 %v5019_v3  ;;  %5119 = vmatpush.msra.mxu3 %v5020_v50  ;;  %v5384_v23 = vsel %vm1618_vm12, %v6602_v38, %v6603_v44 }
 0x5fb   :  { %5138 = vmatpush.msrb.mxu0 %v5027_v58  ;;  %5158 = vmatpush.msrb.mxu1 %v5028_v53 }
 0x5fc   :  { %5241 = vmatpush.msrb.mxu2 %v5206_v35  ;;  %5261 = vmatpush.msrb.mxu3 %v5207_v11 }
 0x5fd   :  { %5139 = vmatpush.msrb.mxu0 %v5021_v52  ;;  %5159 = vmatpush.msrb.mxu1 %v5022_v54 }
 0x5fe   :  { %5242 = vmatpush.msrb.mxu2 %v5200_v13  ;;  %5262 = vmatpush.msrb.mxu3 %v5201_v40  ;;  %v6581_v37 = vpop.permute.xlu1 %6580  ;;  %v6571_v36 = vpop.permute.xlu0 %6570 }
 0x5ff   :  { %6029 = vmatmul.msk.f32.vlgmr.msra.gmra.mxu0 %vm2026_vm14, %v6028_v24  ;;  %6030 = vmatmul.msk.f32.vlgmr.msra.gmra.mxu1 %vm2026_vm14, %v6028_v24  ;;  %v6583_v16 = vunpack.i.h.bf16 %v6581_v37  ;;  %v6582_v55 = vunpack.i.l.bf16 %v6581_v37  ;;  %v6573_v18 = vunpack.i.h.bf16 %v6571_v36  ;;  %v6572_v32 = vunpack.i.l.bf16 %v6571_v36 }
 0x600   :  { %6031 = vmatmul.msk.f32.vlgmr.msra.gmra.mxu2 %vm2026_vm14, %v6028_v24  ;;  %6032 = vmatmul.msk.f32.vlgmr.msra.gmra.mxu3 %vm2026_vm14, %v6028_v24 }
 0x601   :  { %5341 = vmatpush.msra.mxu3 %v5211_v29  ;;  %v5208_v41 = vsel %vm1426_vm11, %v6558_v0, %v6572_v32  ;;  %v5209_v4 = vsel %vm1426_vm11, %v6572_v32, %v6573_v18  ;;  %v5210_v19 = vsel %vm1426_vm11, %v6573_v18, %v6597_v27  ;;  %v5202_v5 = vsel %vm1426_vm11, %v6563_v30, %v6582_v55  ;;  %v6616_v61 = vpop.permute.xlu2 %6615 }
 0x602   :  { %5281 = vmatpush.msra.mxu0 %v5208_v41  ;;  %5301 = vmatpush.msra.mxu1 %v5209_v4  ;;  %v5203_v33 = vsel %vm1426_vm11, %v6582_v55, %v6583_v16  ;;  %v6617_v48 = vunpack.i.l.bf16 %v6616_v61  ;;  %v6618_v7 = vunpack.i.h.bf16 %v6616_v61 }
 0x603   :  { %5321 = vmatpush.msra.mxu2 %v5210_v19 }
 0x604   :  { %5282 = vmatpush.msra.mxu0 %v5202_v5  ;;  %5302 = vmatpush.msra.mxu1 %v5203_v33  ;;  %v5385_v46 = vsel %vm1618_vm12, %v6603_v44, %v6617_v48  ;;  %v5386_v51 = vsel %vm1618_vm12, %v6617_v48, %v6618_v7 }
 0x606   :  { %v6591_v22 = vpop.permute.xlu1 %6590  ;;  %v6586_v15 = vpop.permute.xlu0 %6585 }
 0x607   :  { %6033 = vmatmul.msk.f32.vlgmr.msrb.gmra.mxu0 %vm2026_vm14, %v6028_v24  ;;  %6034 = vmatmul.msk.f32.vlgmr.msrb.gmra.mxu1 %vm2026_vm14, %v6028_v24  ;;  %v6593_v42 = vunpack.i.h.bf16 %v6591_v22  ;;  %v6592_v1 = vunpack.i.l.bf16 %v6591_v22  ;;  %v6588_v25 = vunpack.i.h.bf16 %v6586_v15  ;;  %v6587_v8 = vunpack.i.l.bf16 %v6586_v15 }
 0x608   :  { %6036 = vmatmul.msk.f32.vlgmr.msrb.gmra.mxu2 %vm2026_vm14, %v6035_v21  ;;  %6037 = vmatmul.msk.f32.vlgmr.msrb.gmra.mxu3 %vm2026_vm14, %v6035_v21 }
 0x609   :  { %v5204_v14 = vsel %vm1426_vm11, %v6583_v16, %v6587_v8  ;;  %v5205_v26 = vsel %vm1426_vm11, %v6587_v8, %v6588_v25  ;;  %v5390_v34 = vsel %vm1618_vm12, %v6592_v1, %v6593_v42 }
 0x60a   :  { %5322 = vmatpush.msra.mxu2 %v5204_v14  ;;  %5342 = vmatpush.msra.mxu3 %v5205_v26 }
 0x60b   :  { %5444 = vmatpush.msrb.mxu1 %v5390_v34 }
 0x60d   :  { %5445 = vmatpush.msrb.mxu1 %v5384_v23 }
 0x60e   :  { %v6611_v10 = vpop.permute.xlu1 %6610  ;;  %v6606_v9 = vpop.permute.xlu0 %6605 }
 0x60f   :  { %6038 = vmatmul.msk.f32.vlgmr.msra.gmra.mxu0 %vm2026_vm14, %v6035_v21  ;;  %6039 = vmatmul.msk.f32.vlgmr.msra.gmra.mxu1 %vm2026_vm14, %v6035_v21  ;;  %v6613_v28 = vunpack.i.h.bf16 %v6611_v10  ;;  %v6612_v62 = vunpack.i.l.bf16 %v6611_v10  ;;  %v6608_v57 = vunpack.i.h.bf16 %v6606_v9  ;;  %v6607_v43 = vunpack.i.l.bf16 %v6606_v9 }
 0x610   :  { %6040 = vmatmul.msk.f32.vlgmr.msra.gmra.mxu2 %vm2026_vm14, %v6035_v21  ;;  %6041 = vmatmul.msk.f32.vlgmr.msra.gmra.mxu3 %vm2026_vm14, %v6035_v21 }
 0x611   :  { %v5389_v59 = vsel %vm1618_vm12, %v6607_v43, %v6592_v1  ;;  %v5391_v47 = vsel %vm1618_vm12, %v6593_v42, %v6608_v57  ;;  %v5392_v20 = vsel %vm1618_vm12, %v6608_v57, %v6612_v62  ;;  %v5383_v17 = vsel %vm1618_vm12, %v6613_v28, %v6602_v38 }
 0x612   :  { %5424 = vmatpush.msrb.mxu0 %v5389_v59  ;;  %5464 = vmatpush.msrb.mxu2 %v5391_v47 }
 0x613   :  { %5484 = vmatpush.msrb.mxu3 %v5392_v20 }
 0x614   :  { %5425 = vmatpush.msrb.mxu0 %v5383_v17  ;;  %5465 = vmatpush.msrb.mxu2 %v5385_v46 }
 0x615   :  { %5485 = vmatpush.msrb.mxu3 %v5386_v51 }
 0x617   :  { %6043 = vmatmul.msk.f32.vlgmr.msrb.gmra.mxu0 %vm2026_vm14, %v6042_v39  ;;  %6044 = vmatmul.msk.f32.vlgmr.msrb.gmra.mxu1 %vm2026_vm14, %v6042_v39  ;;  %v6626_v56 = vpop.permute.xlu1 %6625 }
 0x618   :  { %v6621_v63 = vpop.permute.xlu0 %6620  ;;  %6045 = vmatmul.msk.f32.vlgmr.msrb.gmra.mxu2 %vm2026_vm14, %v6042_v39  ;;  %6046 = vmatmul.msk.f32.vlgmr.msrb.gmra.mxu3 %vm2026_vm14, %v6042_v39  ;;  %v6628_v2 = vunpack.i.h.bf16 %v6626_v56  ;;  %v6627_v31 = vunpack.i.l.bf16 %v6626_v56 }
 0x619   :  { %v6623_v0 = vunpack.i.h.bf16 %v6621_v63  ;;  %v6622_v45 = vunpack.i.l.bf16 %v6621_v63 }
 0x61a   :  { %v5387_v3 = vsel %vm1618_vm12, %v6618_v7, %v6627_v31  ;;  %v5388_v50 = vsel %vm1618_vm12, %v6627_v31, %v6628_v2 }
 0x61b   :  { %v5393_v30 = vsel %vm1618_vm12, %v6612_v62, %v6622_v45  ;;  %v5394_v12 = vsel %vm1618_vm12, %v6622_v45, %v6623_v0 }
 0x61c   :  { %5504 = vmatpush.msra.mxu0 %v5393_v30  ;;  %5524 = vmatpush.msra.mxu1 %v5394_v12 }
 0x61e   :  { %5505 = vmatpush.msra.mxu0 %v5387_v3  ;;  %5525 = vmatpush.msra.mxu1 %v5388_v50 }
 0x61f   :  { %6047 = vmatmul.msk.f32.vlgmr.msra.gmra.mxu0 %vm2026_vm14, %v6042_v39  ;;  %6048 = vmatmul.msk.f32.vlgmr.msra.gmra.mxu1 %vm2026_vm14, %v6042_v39 }
 0x621   :  { %v4089_v58 = vpop.f32.mrf.mxu3 }
 0x625   :  { %v4029_v6 = vpop.f32.mrf.mxu0 }
 0x626   :  { %v4049_v35 = vpop.f32.mrf.mxu1 }
 0x62a   :  { %v4069_v53 = vpop.f32.mrf.mxu2 }
 0x62c   :  { %v4172_v11 = vpop.f32.mrf.mxu3 }
 0x62d   :  { %v4173_v49 = vadd.f32 %v4172_v11, %v4049_v35 }
 0x632   :  { %v4152_v27 = vpop.f32.mrf.mxu2 }
 0x633   :  { %v4153_v52 = vadd.f32 %v4152_v27, %v4029_v6 }
 0x634   :  { %v4252_v54 = vpop.f32.mrf.mxu3 }
 0x63a   :  { %v4109_v24 = vpop.f32.mrf.mxu0  ;;  %v4232_v13 = vpop.f32.mrf.mxu2 }
 0x63b   :  { %v4129_v40 = vpop.f32.mrf.mxu1  ;;  %v4233_v37 = vadd.f32 %v4232_v13, %v4109_v24 }
 0x63c   :  { %v4253_v36 = vadd.f32 %v4252_v54, %v4129_v40 }
 0x642   :  { %v4192_v16 = vpop.f32.mrf.mxu0  ;;  %v4369_v41 = vpop.f32.mrf.mxu2 }
 0x643   :  { %v4193_v55 = vadd.f32 %v4192_v16, %v4069_v53  ;;  %v4212_v18 = vpop.f32.mrf.mxu1 }
 0x644   :  { %v4213_v32 = vadd.f32 %v4212_v18, %v4089_v58 }
 0x645   :  { %v4434_v3 = vadd.f32 %v4369_v41, %v4193_v55  ;;  %v5540_v55 = vpop.permute.xlu2 %5539 }
 0x64a   :  { %v4329_v29 = vpop.f32.mrf.mxu0  ;;  %v4512_v22 = vpop.f32.mrf.mxu2 }
 0x64b   :  { %v4349_v60 = vpop.f32.mrf.mxu1  ;;  %v4432_v17 = vadd.f32 %v4329_v29, %v4153_v52 }
 0x64c   :  { %v4433_v46 = vadd.f32 %v4349_v60, %v4173_v49 }
 0x64d   :  { %v4615_v51 = vadd.f32 %v4512_v22, %v4432_v17 }
 0x651   :  { %v4389_v4 = vpop.f32.mrf.mxu3 }
 0x652   :  { %v4409_v19 = vpop.f32.mrf.mxu0  ;;  %v4435_v50 = vadd.f32 %v4389_v4, %v4213_v32 }
 0x653   :  { %v4436_v5 = vadd.f32 %v4409_v19, %v4233_v37  ;;  %v4429_v33 = vpop.f32.mrf.mxu1 }
 0x654   :  { %v4437_v21 = vadd.f32 %v4429_v33, %v4253_v36 }
 0x659   :  { %v4532_v15 = vpop.f32.mrf.mxu3 }
 0x65a   :  { %v4552_v42 = vpop.f32.mrf.mxu0  ;;  %v4616_v39 = vadd.f32 %v4532_v15, %v4433_v46 }
 0x65b   :  { %v4572_v1 = vpop.f32.mrf.mxu1  ;;  %v4617_v35 = vadd.f32 %v4552_v42, %v4434_v3 }
 0x65c   :  { %v4618_v11 = vadd.f32 %v4572_v1, %v4435_v50 }
 0x660   :  { %v4592_v25 = vpop.f32.mrf.mxu2 }
 0x661   :  { %v4612_v8 = vpop.f32.mrf.mxu3  ;;  %v4619_v6 = vadd.f32 %v4592_v25, %v4436_v5 }
 0x662   :  { %v4620_v27 = vadd.f32 %v4612_v8, %v4437_v21 }
 0x663   :  { %v4695_v44 = vpop.f32.mrf.mxu0  ;;  %v4715_v38 = vpop.f32.mrf.mxu1 }
 0x664   :  { %v4798_v0 = vadd.f32 %v4695_v44, %v4615_v51  ;;  %v4799_v45 = vadd.f32 %v4715_v38, %v4616_v39 }
 0x66a   :  { %v4735_v14 = vpop.f32.mrf.mxu2  ;;  %v4755_v26 = vpop.f32.mrf.mxu3 }
 0x66b   :  { %v4775_v34 = vpop.f32.mrf.mxu0  ;;  %v4795_v61 = vpop.f32.mrf.mxu1  ;;  %v4800_v13 = vadd.f32 %v4735_v14, %v4617_v35  ;;  %v4801_v40 = vadd.f32 %v4755_v26, %v4618_v11 }
 0x66c   :  { %v4802_v16 = vadd.f32 %v4775_v34, %v4619_v6  ;;  %v4803_v18 = vadd.f32 %v4795_v61, %v4620_v27 }
 0x672   :  { %v4878_v23 = vpop.f32.mrf.mxu2  ;;  %v4898_v48 = vpop.f32.mrf.mxu3 }
 0x673   :  { %v4918_v10 = vpop.f32.mrf.mxu0  ;;  %v4938_v9 = vpop.f32.mrf.mxu1  ;;  %v4981_v30 = vadd.f32 %v4878_v23, %v4798_v0  ;;  %v4982_v12 = vadd.f32 %v4898_v48, %v4799_v45 }
 0x674   :  { %v4983_v32 = vadd.f32 %v4918_v10, %v4800_v13  ;;  %v4984_v41 = vadd.f32 %v4938_v9, %v4801_v40 }
 0x67a   :  { %v4958_v28 = vpop.f32.mrf.mxu2  ;;  %v4978_v62 = vpop.f32.mrf.mxu3 }
 0x67b   :  { %v4985_v4 = vadd.f32 %v4958_v28, %v4802_v16  ;;  %v4986_v19 = vadd.f32 %v4978_v62, %v4803_v18 }
 0x67c   :  { %v5061_v57 = vpop.f32.mrf.mxu0  ;;  %v5081_v43 = vpop.f32.mrf.mxu1 }
 0x67d   :  { %v5164_v58 = vadd.f32 %v5061_v57, %v4981_v30  ;;  %v5165_v53 = vadd.f32 %v5081_v43, %v4982_v12 }
 0x683   :  { %v5101_v7 = vpop.f32.mrf.mxu2  ;;  %v5121_v59 = vpop.f32.mrf.mxu3 }
 0x684   :  { %v5141_v47 = vpop.f32.mrf.mxu0  ;;  %v5161_v20 = vpop.f32.mrf.mxu1  ;;  %v5166_v21 = vadd.f32 %v5101_v7, %v4983_v32  ;;  %v5167_v22 = vadd.f32 %v5121_v59, %v4984_v41 }
 0x685   :  { %v5168_v15 = vadd.f32 %v5141_v47, %v4985_v4  ;;  %v5169_v42 = vadd.f32 %v5161_v20, %v4986_v19 }
 0x68b   :  { %v5244_v56 = vpop.f32.mrf.mxu2  ;;  %v5264_v63 = vpop.f32.mrf.mxu3 }
 0x68c   :  { %v5284_v2 = vpop.f32.mrf.mxu0  ;;  %v5304_v31 = vpop.f32.mrf.mxu1  ;;  %v5347_v52 = vadd.f32 %v5244_v56, %v5164_v58  ;;  %v5348_v49 = vadd.f32 %v5264_v63, %v5165_v53 }
 0x68d   :  { %v5349_v8 = vadd.f32 %v5284_v2, %v5166_v21  ;;  %v5350_v44 = vadd.f32 %v5304_v31, %v5167_v22 }
 0x693   :  { %v5324_v54 = vpop.f32.mrf.mxu2  ;;  %v5344_v24 = vpop.f32.mrf.mxu3 }
 0x694   :  { %v5427_v37 = vpop.f32.mrf.mxu0  ;;  %v5447_v36 = vpop.f32.mrf.mxu1  ;;  %v5351_v38 = vadd.f32 %v5324_v54, %v5168_v15  ;;  %v5352_v14 = vadd.f32 %v5344_v24, %v5169_v42 }
 0x695   :  { %v5530_v29 = vadd.f32 %v5427_v37, %v5347_v52  ;;  %v5531_v60 = vadd.f32 %v5447_v36, %v5348_v49 }
 0x697   :  { %v5542_v33 = vadd.f32 %v5540_v55, %v5530_v29  ;;  %v5543_v5 = vadd.f32 %v5540_v55, %v5531_v60 }
 0x699   :  { %v6049_v1 = vmul.f32 -1.442695, %v5542_v33  ;;  %v6050_v25 = vmul.f32 -1.442695, %v5543_v5 }
 0x69b   :  { %6629 = vpow2.f32 %v6049_v1  ;;  %v5467_v26 = vpop.f32.mrf.mxu2  ;;  %v5487_v34 = vpop.f32.mrf.mxu3 }
 0x69c   :  { %6631 = vpow2.f32 %v6050_v25  ;;  %v5532_v61 = vadd.f32 %v5467_v26, %v5349_v8  ;;  %v5533_v23 = vadd.f32 %v5487_v34, %v5350_v44  ;;  %v5507_v48 = vpop.f32.mrf.mxu0  ;;  %v5527_v10 = vpop.f32.mrf.mxu1 }
 0x69d   :  { %v5534_v9 = vadd.f32 %v5507_v48, %v5351_v38  ;;  %v5535_v28 = vadd.f32 %v5527_v10, %v5352_v14 }
 0x69e   :  { %v5544_v62 = vadd.f32 %v5540_v55, %v5532_v61  ;;  %v5545_v57 = vadd.f32 %v5540_v55, %v5533_v23 }
 0x69f   :  { %v5546_v43 = vadd.f32 %v5540_v55, %v5534_v9  ;;  %v5547_v7 = vadd.f32 %v5540_v55, %v5535_v28 }
 0x6a0   :  { %v6051_v59 = vmul.f32 -1.442695, %v5544_v62  ;;  %v6052_v47 = vmul.f32 -1.442695, %v5545_v57 }
 0x6a1   :  { %v6630_v20 = vpop.eup %6629  ;;  %v6053_v51 = vmul.f32 -1.442695, %v5546_v43  ;;  %v6054_v56 = vmul.f32 -1.442695, %v5547_v7 }
 0x6a2   :  { %v6632_v17 = vpop.eup %6631  ;;  %v5566_v46 = vadd.f32 1.0, %v6630_v20  ;;  %6633 = vpow2.f32 %v6051_v59 }
 0x6a3   :  { %v5567_v39 = vadd.f32 1.0, %v6632_v17  ;;  %6635 = vpow2.f32 %v6052_v47 }
 0x6a4   :  { %6637 = vrcp.f32 %v5566_v46  ;;  %v5581_v35 = vand.u32 2147483647, %v5566_v46  ;;  %vm5577_vm1 = vweird.f32 %v5566_v46  ;;  %v5583_v37 = vand.u32 2147483648, %v5566_v46 }
 0x6a5   :  { %6639 = vrcp.f32 %v5567_v39  ;;  %v5596_v6 = vand.u32 2147483647, %v5567_v39  ;;  %v5598_v27 = vand.u32 2147483648, %v5567_v39  ;;  %vm5592_vm3 = vweird.f32 %v5567_v39 }
 0x6a6   :  { %6641 = vpow2.f32 %v6053_v51  ;;  %vm8859_vm5 = vcmp.eq.f32.partialorder %v5581_v35, 8.507059e+37  ;;  %v5584_v33 = vor.u32 1.1754944e-38, %v5583_v37 }
 0x6a7   :  { %6643 = vpow2.f32 %v6054_v56  ;;  %vm5597_vm7 = vcmp.eq.f32.partialorder %v5596_v6, 8.507059e+37  ;;  %v5599_v55 = vor.u32 1.1754944e-38, %v5598_v27 }
 0x6a8   :  { %v6634_v63 = vpop.eup %6633 }
 0x6a9   :  { %v6636_v2 = vpop.eup %6635  ;;  %v8840_v31 = vadd.f32 1.0, %v6634_v63 }
 0x6aa   :  { %v6638_v0 = vpop.eup %6637  ;;  %v8842_v45 = vadd.f32 1.0, %v6636_v2 }
 0x6ab   :  { %v6640_v30 = vpop.eup %6639  ;;  %v5573_v12 = vmul.f32 %v6638_v0, %v5566_v46  ;;  %6645 = vrcp.f32 %v8840_v31  ;;  %vm5578_vm15 = vweird.f32 %v6638_v0  ;;  %v5611_v21 = vand.u32 2147483647, %v8840_v31 }
 0x6ac   :  { %v6642_v3 = vpop.eup %6641  ;;  %v5588_v50 = vmul.f32 %v6640_v30, %v5567_v39  ;;  %6647 = vrcp.f32 %v8842_v45  ;;  %vm5593_vm0 = vweird.f32 %v6640_v30  ;;  %vm8853_vm2 = vmor %vm5577_vm1, %vm5578_vm15  ;;  %v5613_v22 = vand.u32 2147483648, %v8840_v31 }
 0x6ad   :  { %v6644_v58 = vpop.eup %6643  ;;  %v5574_v53 = vsub.f32 1.0, %v5573_v12  ;;  %v8846_v49 = vadd.f32 1.0, %v6642_v3  ;;  %vm5594_vm6 = vmor %vm5592_vm3, %vm5593_vm0  ;;  %v5626_v25 = vand.u32 2147483647, %v8842_v45  ;;  %v5628_v38 = vand.u32 2147483648, %v8842_v45 }
 0x6ae   :  { %v5589_v11 = vsub.f32 1.0, %v5588_v50  ;;  %v8848_v54 = vadd.f32 1.0, %v6644_v58  ;;  %vm5607_vm10 = vweird.f32 %v8840_v31  ;;  %vm5622_vm12 = vweird.f32 %v8842_v45 }
 0x6af   :  { %v5575_v52 = vmul.f32 %v6638_v0, %v5574_v53  ;;  %6649 = vrcp.f32 %v8846_v49  ;;  %vm8888_vm13 = vcmp.eq.f32.partialorder %v5611_v21, 8.507059e+37  ;;  %v5614_v57 = vor.u32 1.1754944e-38, %v5613_v22 }
 0x6b0   :  { %v5590_v24 = vmul.f32 %v6640_v30, %v5589_v11  ;;  %6651 = vrcp.f32 %v8848_v54  ;;  %vm5627_vm15 = vcmp.eq.f32.partialorder %v5626_v25, 8.507059e+37  ;;  %v5629_v43 = vor.u32 1.1754944e-38, %v5628_v38 }
 0x6b1   :  { %v8850_v13 = vpop.eup %6645  ;;  %v5576_v40 = vadd.f32 %v6638_v0, %v5575_v52  ;;  %v5656_v46 = vand.u32 2147483647, %v8848_v54  ;;  %v5658_v51 = vand.u32 2147483648, %v8848_v54 }
 0x6b2   :  { %v5591_v16 = vadd.f32 %v6640_v30, %v5590_v24  ;;  %v5603_v18 = vmul.f32 %v8850_v13, %v8840_v31  ;;  %v6648_v29 = vpop.eup %6647  ;;  %vm5608_vm8 = vweird.f32 %v8850_v13  ;;  %v5643_v31 = vand.u32 2147483648, %v8846_v49 }
 0x6b3   :  { %v5580_v32 = vsel %vm8853_vm2, %v6638_v0, %v5576_v40  ;;  %v5618_v19 = vmul.f32 %v6648_v29, %v8842_v45  ;;  %vm5623_vm9 = vweird.f32 %v6648_v29  ;;  %vm8882_vm11 = vmor %vm5607_vm10, %vm5608_vm8  ;;  %vm5637_vm2 = vweird.f32 %v8846_v49 }
 0x6b4   :  { %v5595_v41 = vsel %vm5594_vm6, %v6640_v30, %v5591_v16  ;;  %v5604_v4 = vsub.f32 1.0, %v5603_v18  ;;  %v5585_v44 = vsel %vm8859_vm5, %v5584_v33, %v5580_v32  ;;  %vm5624_vm14 = vmor %vm5622_vm12, %vm5623_vm9  ;;  %v5641_v45 = vand.u32 2147483647, %v8846_v49 }
 0x6b5   :  { %v5600_v5 = vsel %vm5597_vm7, %v5599_v55, %v5595_v41  ;;  %v5619_v1 = vsub.f32 1.0, %v5618_v19  ;;  %v6650_v8 = vpop.eup %6649  ;;  %vm5652_vm5 = vweird.f32 %v8848_v54  ;;  %v5659_v12 = vor.u32 1.1754944e-38, %v5658_v51 }
 0x6b6   :  { %v5668_v15 = vrot.slane %v5600_v5, 4  ;;  %v5605_v42 = vmul.f32 %v8850_v13, %v5604_v4  ;;  %v5633_v61 = vmul.f32 %v6650_v8, %v8846_v49  ;;  %v6652_v23 = vpop.eup %6651  ;;  %vm5638_vm0 = vweird.f32 %v6650_v8 }
 0x6b7   :  { %v5620_v34 = vmul.f32 %v6648_v29, %v5619_v1  ;;  %v5648_v28 = vmul.f32 %v6652_v23, %v8848_v54  ;;  %vm5653_vm1 = vweird.f32 %v6652_v23  ;;  %vm5639_vm3 = vmor %vm5637_vm2, %vm5638_vm0  ;;  %vm5657_vm7 = vcmp.eq.f32.partialorder %v5656_v46, 8.507059e+37 }
 0x6b8   :  { %v5672_v14 = vsel %vm5671_vm4, %v5585_v44, %v5668_v15  ;;  %v5606_v26 = vadd.f32 %v8850_v13, %v5605_v42  ;;  %v5634_v9 = vsub.f32 1.0, %v5633_v61  ;;  %vm5654_vm6 = vmor %vm5652_vm5, %vm5653_vm1  ;;  %v5644_v58 = vor.u32 1.1754944e-38, %v5643_v31 }
 0x6b9   :  { %5678 = vst [vmem:[%s8920_s8] sm:$0xff] %v5672_v14  ;;  %v5621_v10 = vadd.f32 %v6648_v29, %v5620_v34  ;;  %v5649_v20 = vsub.f32 1.0, %v5648_v28  ;;  %vm5642_vm8 = vcmp.eq.f32.partialorder %v5641_v45, 8.507059e+37 }
 0x6ba   :  { %v5610_v7 = vsel %vm8882_vm11, %v8850_v13, %v5606_v26  ;;  %v5635_v47 = vmul.f32 %v6650_v8, %v5634_v9 }
 0x6bb   :  { %v5625_v59 = vsel %vm5624_vm14, %v6648_v29, %v5621_v10  ;;  %v5650_v63 = vmul.f32 %v6652_v23, %v5649_v20  ;;  %v5615_v2 = vsel %vm8888_vm13, %v5614_v57, %v5610_v7 }
 0x6bc   :  { %v5630_v17 = vsel %vm5627_vm15, %v5629_v43, %v5625_v59  ;;  %v5636_v56 = vadd.f32 %v6650_v8, %v5635_v47 }
 0x6bd   :  { %v5669_v39 = vrot.slane %v5630_v17, 4  ;;  %v5651_v30 = vadd.f32 %v6652_v23, %v5650_v63 }
 0x6be   :  { %v5640_v3 = vsel %vm5639_vm3, %v6650_v8, %v5636_v56 }
 0x6bf   :  { %v5673_v0 = vsel %vm5671_vm4, %v5615_v2, %v5669_v39  ;;  %v5655_v50 = vsel %vm5654_vm6, %v6652_v23, %v5651_v30  ;;  %v5645_v11 = vsel %vm5642_vm8, %v5644_v58, %v5640_v3 }
 0x6c0   :  { %5679 = vst [vmem:[%s8920_s8 + $0x8] sm:$0xff] %v5673_v0  ;;  %v5660_v53 = vsel %vm5657_vm7, %v5659_v12, %v5655_v50 }
 0x6c1   :  { %v5670_v35 = vrot.slane %v5660_v53, 4 }
 0x6c3   :  { %v5674_v6 = vsel %vm5671_vm4, %v5645_v11, %v5670_v35 }
 0x6c4   :  { %5680 = vst [vmem:[%s8920_s8 + $0x10] sm:$0xff] %v5674_v6 }

</bundles_post_ra>
